<compile_context>
chip_gen: v5e
topology: v5e:2x2
jax: 0.10.0
libtpu: 0.0.40
codegen_flags: <defaults>
</compile_context>

<pallas_src>
import jax
import jax.numpy as jnp
from jax import lax
from jax.experimental import pallas as pl
from jax.experimental.pallas import tpu as pltpu


# Contraction dims at/below this use the VPU broadcast-MAC path; above it,
# fall back to MXU matmuls (f32 accumulate).
_VPU_CONTRACTION_LIMIT = 64
# Fully unroll the time loop up to this many time points; beyond it, use a
# partially-unrolled lax.fori_loop with per-step dynamic stores.
_UNROLL_T_LIMIT = 32


def _tree_sum(terms):
    """Pairwise (tree) sum: dependent VALU add chain is log2(K), not K."""
    while len(terms) > 1:
        nxt = [terms[i] + terms[i + 1] for i in range(0, len(terms) - 1, 2)]
        if len(terms) % 2:
            nxt.append(terms[-1])
        terms = nxt
    return terms[0]


def rk4_kernel(dt_ref, half_ref, sixth_ref, z_ref, w1_ref, b1_ref, w2_ref,
               b2_ref, out_ref):
    """Single invocation (no grid): walks the whole time grid in-kernel."""
    T, B, D = out_ref.shape
    H = w1_ref.shape[1]

    # ---- hoisted once per kernel entry (JAX does not CSE broadcasts) -------
    b1_b = jnp.broadcast_to(b1_ref[...], (B, H)).astype(jnp.float32)
    b2_b = jnp.broadcast_to(b2_ref[...], (B, D)).astype(jnp.float32)

    use_vpu = (D <= _VPU_CONTRACTION_LIMIT) and (H <= _VPU_CONTRACTION_LIMIT)

    if use_vpu:
        w1 = w1_ref[...].astype(jnp.float32)
        w2 = w2_ref[...].astype(jnp.float32)
        # Pre-broadcast every weight row to (B, N) once (sublane broadcast),
        # so each f() call only pays the LHS-column lane broadcasts.
        w1_rows = [jnp.broadcast_to(w1[k:k + 1, :], (B, H)) for k in range(D)]
        w2_rows = [jnp.broadcast_to(w2[k:k + 1, :], (B, D)) for k in range(H)]

        def f(y):
            # Layer 1: (B,D)->(B,H).  VPU-only, exact f32, no MXU round trip.
            h = _tree_sum([b1_b] +
                          [y[:, k:k + 1] * w1_rows[k] for k in range(D)])
            h = jnp.tanh(h)  # EUP
            # Layer 2: (B,H)->(B,D).
            return _tree_sum([b2_b] +
                             [h[:, k:k + 1] * w2_rows[k] for k in range(H)])
    else:
        # Wider layers: MXU with f32 accumulation.
        w1 = w1_ref[...]
        w2 = w2_ref[...]

        def f(y):
            h = jnp.tanh(
                jnp.dot(y, w1, preferred_element_type=jnp.float32) + b1_b)
            return jnp.dot(h, w2, preferred_element_type=jnp.float32) + b2_b

    def rk4_step(y, i):
        dt = dt_ref[i]
        sixth = sixth_ref[i]
        # One splat for dt/2, reused for both k2 and k3 pre-adds.
        half_b = jnp.broadcast_to(half_ref[i], (B, D))
        k1 = f(y)
        k2 = f(y + half_b * k1)
        k3 = f(y + half_b * k2)
        k4 = f(y + dt * k3)
        return y + sixth * (k1 + 2.0 * k2 + 2.0 * k3 + k4)

    y0 = z_ref[...].astype(jnp.float32)

    if T <= _UNROLL_T_LIMIT:
        # Fully unrolled static loop; trajectory carried in vregs and written
        # back with a single dense store (no per-step masked vst).
        ys = [y0]
        y = y0
        for i in range(T - 1):
            y = rk4_step(y, i)
            ys.append(y)
        out_ref[...] = jnp.stack(ys, axis=0).astype(out_ref.dtype)
    else:
        out_ref[0] = y0.astype(out_ref.dtype)

        def body(i, y):
            y = rk4_step(y, i - 1)
            out_ref[i] = y.astype(out_ref.dtype)
            return y

        lax.fori_loop(1, T, body, y0, unroll=4)


def deterministic_wrapper_forward(z, t, w1, b1, w2, b2, n_samples=10):
    """Pallas equivalent of DeterministicWrapper.forward(z, t, n_samples).

    n_samples is accepted for API parity but unused (deterministic path).
    Biases may be (H,)/(D,) or (1,H)/(1,D).  Returns zt_pred [T, batch, dim].
    """
    del n_samples
    B, D = z.shape
    T = t.shape[0]

    b1 = jnp.reshape(b1, (1, -1))
    b2 = jnp.reshape(b2, (1, -1))

    # Precompute step sizes and RK4 coefficients once; SMEM scalars in-kernel.
    t = t.astype(jnp.float32)
    dt = jnp.diff(t) if T > 1 else jnp.zeros((1,), jnp.float32)
    half_dt = 0.5 * dt
    sixth_dt = dt * (1.0 / 6.0)

    smem = pl.BlockSpec(memory_space=pltpu.MemorySpace.SMEM)
    vmem = pl.BlockSpec(memory_space=pltpu.MemorySpace.VMEM)

    return pl.pallas_call(
        rk4_kernel,
        out_shape=jax.ShapeDtypeStruct((T, B, D), z.dtype),
        in_specs=[
            smem,   # dt
            smem,   # dt / 2
            smem,   # dt / 6
            vmem,   # z
            vmem,   # w1
            vmem,   # b1
            vmem,   # w2
            vmem,   # b2
        ],
        out_specs=vmem,
    )(dt, half_dt, sixth_dt, z, w1, b1, w2, b2)


def _reference_rk4(z, t, w1, b1, w2, b2):
    """Pure-JAX reference (highest-precision dots) for correctness checking."""
    hp = jax.lax.Precision.HIGHEST

    def f(y):
        h = jnp.tanh(jnp.dot(y, w1, precision=hp) + b1)
        return jnp.dot(h, w2, precision=hp) + b2

    def step(y, dt):
        k1 = f(y)
        k2 = f(y + 0.5 * dt * k1)
        k3 = f(y + 0.5 * dt * k2)
        k4 = f(y + dt * k3)
        return y + (dt / 6.0) * (k1 + 2 * k2 + 2 * k3 + k4)

    out = [z]
    y = z
    for i in range(1, t.shape[0]):
        y = step(y, t[i] - t[i - 1])
        out.append(y)
    return jnp.stack(out, axis=0)


if __name__ == "__main__":
    key = jax.random.PRNGKey(0)
    k_z, k_w1, k_b1, k_w2, k_b2 = jax.random.split(key, 5)

    B, D, H, T = 4, 8, 16, 5  # batch, latent dim, hidden width, time points

    z = jax.random.normal(k_z, (B, D), dtype=jnp.float32)
    t = jnp.linspace(0.0, 1.0, T, dtype=jnp.float32)

    # Deterministic synthetic parameters for the wrapped ODE model's MLP.
    w1 = 0.2 * jax.random.normal(k_w1, (D, H), dtype=jnp.float32)
    b1 = 0.05 * jax.random.normal(k_b1, (1, H), dtype=jnp.float32)
    w2 = 0.2 * jax.random.normal(k_w2, (H, D), dtype=jnp.float32)
    b2 = 0.05 * jax.random.normal(k_b2, (1, D), dtype=jnp.float32)

    zt_pred = deterministic_wrapper_forward(z, t, w1, b1, w2, b2, n_samples=10)
    zt_pred = jax.block_until_ready(zt_pred)

    ref = _reference_rk4(z, t, w1, b1, w2, b2)
    assert zt_pred.shape == (T, B, D)
    assert jnp.allclose(zt_pred, ref, atol=1e-5, rtol=1e-5)

    print("KERNEL_OK")
</pallas_src>

<mosaic_0001>
module attributes {stable_mosaic.version = 11 : i64} {
  func.func @rk4_kernel(%arg0: memref<4xf32, #tpu.memory_space<smem>>, %arg1: memref<4xf32, #tpu.memory_space<smem>>, %arg2: memref<4xf32, #tpu.memory_space<smem>>, %arg3: memref<4x8xf32, #tpu.memory_space<vmem>>, %arg4: memref<8x16xf32, #tpu.memory_space<vmem>>, %arg5: memref<1x16xf32, #tpu.memory_space<vmem>>, %arg6: memref<16x8xf32, #tpu.memory_space<vmem>>, %arg7: memref<1x8xf32, #tpu.memory_space<vmem>>, %arg8: memref<5x4x8xf32, #tpu.memory_space<vmem>>) attributes {dimension_semantics = [], scalar_prefetch = 0 : i64, scratch_operands = 0 : i64, tpu.core_type = #tpu.core_type<tc>} {
    %c0 = arith.constant 0 : index
    %c0_0 = arith.constant 0 : index
    %0 = vector.load %arg5[%c0, %c0_0] : memref<1x16xf32, #tpu.memory_space<vmem>>, vector<1x16xf32>
    %1 = vector.shape_cast %0 : vector<1x16xf32> to vector<1x16xf32>
    %2 = vector.broadcast %1 : vector<1x16xf32> to vector<4x16xf32>
    %c0_1 = arith.constant 0 : index
    %c0_2 = arith.constant 0 : index
    %3 = vector.load %arg7[%c0_1, %c0_2] : memref<1x8xf32, #tpu.memory_space<vmem>>, vector<1x8xf32>
    %4 = vector.shape_cast %3 : vector<1x8xf32> to vector<1x8xf32>
    %5 = vector.broadcast %4 : vector<1x8xf32> to vector<4x8xf32>
    %c0_3 = arith.constant 0 : index
    %c0_4 = arith.constant 0 : index
    %6 = vector.load %arg4[%c0_3, %c0_4] : memref<8x16xf32, #tpu.memory_space<vmem>>, vector<8x16xf32>
    %c0_5 = arith.constant 0 : index
    %c0_6 = arith.constant 0 : index
    %7 = vector.load %arg6[%c0_5, %c0_6] : memref<16x8xf32, #tpu.memory_space<vmem>>, vector<16x8xf32>
    %8 = vector.extract_strided_slice %6 {offsets = [0, 0], sizes = [1, 16], strides = [1, 1]} : vector<8x16xf32> to vector<1x16xf32>
    %9 = vector.shape_cast %8 : vector<1x16xf32> to vector<1x16xf32>
    %10 = vector.broadcast %9 : vector<1x16xf32> to vector<4x16xf32>
    %11 = vector.extract_strided_slice %6 {offsets = [1, 0], sizes = [1, 16], strides = [1, 1]} : vector<8x16xf32> to vector<1x16xf32>
    %12 = vector.shape_cast %11 : vector<1x16xf32> to vector<1x16xf32>
    %13 = vector.broadcast %12 : vector<1x16xf32> to vector<4x16xf32>
    %14 = vector.extract_strided_slice %6 {offsets = [2, 0], sizes = [1, 16], strides = [1, 1]} : vector<8x16xf32> to vector<1x16xf32>
    %15 = vector.shape_cast %14 : vector<1x16xf32> to vector<1x16xf32>
    %16 = vector.broadcast %15 : vector<1x16xf32> to vector<4x16xf32>
    %17 = vector.extract_strided_slice %6 {offsets = [3, 0], sizes = [1, 16], strides = [1, 1]} : vector<8x16xf32> to vector<1x16xf32>
    %18 = vector.shape_cast %17 : vector<1x16xf32> to vector<1x16xf32>
    %19 = vector.broadcast %18 : vector<1x16xf32> to vector<4x16xf32>
    %20 = vector.extract_strided_slice %6 {offsets = [4, 0], sizes = [1, 16], strides = [1, 1]} : vector<8x16xf32> to vector<1x16xf32>
    %21 = vector.shape_cast %20 : vector<1x16xf32> to vector<1x16xf32>
    %22 = vector.broadcast %21 : vector<1x16xf32> to vector<4x16xf32>
    %23 = vector.extract_strided_slice %6 {offsets = [5, 0], sizes = [1, 16], strides = [1, 1]} : vector<8x16xf32> to vector<1x16xf32>
    %24 = vector.shape_cast %23 : vector<1x16xf32> to vector<1x16xf32>
    %25 = vector.broadcast %24 : vector<1x16xf32> to vector<4x16xf32>
    %26 = vector.extract_strided_slice %6 {offsets = [6, 0], sizes = [1, 16], strides = [1, 1]} : vector<8x16xf32> to vector<1x16xf32>
    %27 = vector.shape_cast %26 : vector<1x16xf32> to vector<1x16xf32>
    %28 = vector.broadcast %27 : vector<1x16xf32> to vector<4x16xf32>
    %29 = vector.extract_strided_slice %6 {offsets = [7, 0], sizes = [1, 16], strides = [1, 1]} : vector<8x16xf32> to vector<1x16xf32>
    %30 = vector.shape_cast %29 : vector<1x16xf32> to vector<1x16xf32>
    %31 = vector.broadcast %30 : vector<1x16xf32> to vector<4x16xf32>
    %32 = vector.extract_strided_slice %7 {offsets = [0, 0], sizes = [1, 8], strides = [1, 1]} : vector<16x8xf32> to vector<1x8xf32>
    %33 = vector.shape_cast %32 : vector<1x8xf32> to vector<1x8xf32>
    %34 = vector.broadcast %33 : vector<1x8xf32> to vector<4x8xf32>
    %35 = vector.extract_strided_slice %7 {offsets = [1, 0], sizes = [1, 8], strides = [1, 1]} : vector<16x8xf32> to vector<1x8xf32>
    %36 = vector.shape_cast %35 : vector<1x8xf32> to vector<1x8xf32>
    %37 = vector.broadcast %36 : vector<1x8xf32> to vector<4x8xf32>
    %38 = vector.extract_strided_slice %7 {offsets = [2, 0], sizes = [1, 8], strides = [1, 1]} : vector<16x8xf32> to vector<1x8xf32>
    %39 = vector.shape_cast %38 : vector<1x8xf32> to vector<1x8xf32>
    %40 = vector.broadcast %39 : vector<1x8xf32> to vector<4x8xf32>
    %41 = vector.extract_strided_slice %7 {offsets = [3, 0], sizes = [1, 8], strides = [1, 1]} : vector<16x8xf32> to vector<1x8xf32>
    %42 = vector.shape_cast %41 : vector<1x8xf32> to vector<1x8xf32>
    %43 = vector.broadcast %42 : vector<1x8xf32> to vector<4x8xf32>
    %44 = vector.extract_strided_slice %7 {offsets = [4, 0], sizes = [1, 8], strides = [1, 1]} : vector<16x8xf32> to vector<1x8xf32>
    %45 = vector.shape_cast %44 : vector<1x8xf32> to vector<1x8xf32>
    %46 = vector.broadcast %45 : vector<1x8xf32> to vector<4x8xf32>
    %47 = vector.extract_strided_slice %7 {offsets = [5, 0], sizes = [1, 8], strides = [1, 1]} : vector<16x8xf32> to vector<1x8xf32>
    %48 = vector.shape_cast %47 : vector<1x8xf32> to vector<1x8xf32>
    %49 = vector.broadcast %48 : vector<1x8xf32> to vector<4x8xf32>
    %50 = vector.extract_strided_slice %7 {offsets = [6, 0], sizes = [1, 8], strides = [1, 1]} : vector<16x8xf32> to vector<1x8xf32>
    %51 = vector.shape_cast %50 : vector<1x8xf32> to vector<1x8xf32>
    %52 = vector.broadcast %51 : vector<1x8xf32> to vector<4x8xf32>
    %53 = vector.extract_strided_slice %7 {offsets = [7, 0], sizes = [1, 8], strides = [1, 1]} : vector<16x8xf32> to vector<1x8xf32>
    %54 = vector.shape_cast %53 : vector<1x8xf32> to vector<1x8xf32>
    %55 = vector.broadcast %54 : vector<1x8xf32> to vector<4x8xf32>
    %56 = vector.extract_strided_slice %7 {offsets = [8, 0], sizes = [1, 8], strides = [1, 1]} : vector<16x8xf32> to vector<1x8xf32>
    %57 = vector.shape_cast %56 : vector<1x8xf32> to vector<1x8xf32>
    %58 = vector.broadcast %57 : vector<1x8xf32> to vector<4x8xf32>
    %59 = vector.extract_strided_slice %7 {offsets = [9, 0], sizes = [1, 8], strides = [1, 1]} : vector<16x8xf32> to vector<1x8xf32>
    %60 = vector.shape_cast %59 : vector<1x8xf32> to vector<1x8xf32>
    %61 = vector.broadcast %60 : vector<1x8xf32> to vector<4x8xf32>
    %62 = vector.extract_strided_slice %7 {offsets = [10, 0], sizes = [1, 8], strides = [1, 1]} : vector<16x8xf32> to vector<1x8xf32>
    %63 = vector.shape_cast %62 : vector<1x8xf32> to vector<1x8xf32>
    %64 = vector.broadcast %63 : vector<1x8xf32> to vector<4x8xf32>
    %65 = vector.extract_strided_slice %7 {offsets = [11, 0], sizes = [1, 8], strides = [1, 1]} : vector<16x8xf32> to vector<1x8xf32>
    %66 = vector.shape_cast %65 : vector<1x8xf32> to vector<1x8xf32>
    %67 = vector.broadcast %66 : vector<1x8xf32> to vector<4x8xf32>
    %68 = vector.extract_strided_slice %7 {offsets = [12, 0], sizes = [1, 8], strides = [1, 1]} : vector<16x8xf32> to vector<1x8xf32>
    %69 = vector.shape_cast %68 : vector<1x8xf32> to vector<1x8xf32>
    %70 = vector.broadcast %69 : vector<1x8xf32> to vector<4x8xf32>
    %71 = vector.extract_strided_slice %7 {offsets = [13, 0], sizes = [1, 8], strides = [1, 1]} : vector<16x8xf32> to vector<1x8xf32>
    %72 = vector.shape_cast %71 : vector<1x8xf32> to vector<1x8xf32>
    %73 = vector.broadcast %72 : vector<1x8xf32> to vector<4x8xf32>
    %74 = vector.extract_strided_slice %7 {offsets = [14, 0], sizes = [1, 8], strides = [1, 1]} : vector<16x8xf32> to vector<1x8xf32>
    %75 = vector.shape_cast %74 : vector<1x8xf32> to vector<1x8xf32>
    %76 = vector.broadcast %75 : vector<1x8xf32> to vector<4x8xf32>
    %77 = vector.extract_strided_slice %7 {offsets = [15, 0], sizes = [1, 8], strides = [1, 1]} : vector<16x8xf32> to vector<1x8xf32>
    %78 = vector.shape_cast %77 : vector<1x8xf32> to vector<1x8xf32>
    %79 = vector.broadcast %78 : vector<1x8xf32> to vector<4x8xf32>
    %c0_7 = arith.constant 0 : index
    %c0_8 = arith.constant 0 : index
    %80 = vector.load %arg3[%c0_7, %c0_8] : memref<4x8xf32, #tpu.memory_space<vmem>>, vector<4x8xf32>
    %c0_9 = arith.constant 0 : index
    %81 = memref.load %arg0[%c0_9] : memref<4xf32, #tpu.memory_space<smem>>
    %c0_10 = arith.constant 0 : index
    %82 = memref.load %arg2[%c0_10] : memref<4xf32, #tpu.memory_space<smem>>
    %c0_11 = arith.constant 0 : index
    %83 = memref.load %arg1[%c0_11] : memref<4xf32, #tpu.memory_space<smem>>
    %84 = vector.broadcast %83 : f32 to vector<4x8xf32>
    %85 = vector.extract_strided_slice %80 {offsets = [0, 0], sizes = [4, 1], strides = [1, 1]} : vector<4x8xf32> to vector<4x1xf32>
    %86 = vector.broadcast %85 : vector<4x1xf32> to vector<4x16xf32>
    %87 = arith.mulf %86, %10 : vector<4x16xf32>
    %88 = vector.extract_strided_slice %80 {offsets = [0, 1], sizes = [4, 1], strides = [1, 1]} : vector<4x8xf32> to vector<4x1xf32>
    %89 = vector.broadcast %88 : vector<4x1xf32> to vector<4x16xf32>
    %90 = arith.mulf %89, %13 : vector<4x16xf32>
    %91 = vector.extract_strided_slice %80 {offsets = [0, 2], sizes = [4, 1], strides = [1, 1]} : vector<4x8xf32> to vector<4x1xf32>
    %92 = vector.broadcast %91 : vector<4x1xf32> to vector<4x16xf32>
    %93 = arith.mulf %92, %16 : vector<4x16xf32>
    %94 = vector.extract_strided_slice %80 {offsets = [0, 3], sizes = [4, 1], strides = [1, 1]} : vector<4x8xf32> to vector<4x1xf32>
    %95 = vector.broadcast %94 : vector<4x1xf32> to vector<4x16xf32>
    %96 = arith.mulf %95, %19 : vector<4x16xf32>
    %97 = vector.extract_strided_slice %80 {offsets = [0, 4], sizes = [4, 1], strides = [1, 1]} : vector<4x8xf32> to vector<4x1xf32>
    %98 = vector.broadcast %97 : vector<4x1xf32> to vector<4x16xf32>
    %99 = arith.mulf %98, %22 : vector<4x16xf32>
    %100 = vector.extract_strided_slice %80 {offsets = [0, 5], sizes = [4, 1], strides = [1, 1]} : vector<4x8xf32> to vector<4x1xf32>
    %101 = vector.broadcast %100 : vector<4x1xf32> to vector<4x16xf32>
    %102 = arith.mulf %101, %25 : vector<4x16xf32>
    %103 = vector.extract_strided_slice %80 {offsets = [0, 6], sizes = [4, 1], strides = [1, 1]} : vector<4x8xf32> to vector<4x1xf32>
    %104 = vector.broadcast %103 : vector<4x1xf32> to vector<4x16xf32>
    %105 = arith.mulf %104, %28 : vector<4x16xf32>
    %106 = vector.extract_strided_slice %80 {offsets = [0, 7], sizes = [4, 1], strides = [1, 1]} : vector<4x8xf32> to vector<4x1xf32>
    %107 = vector.broadcast %106 : vector<4x1xf32> to vector<4x16xf32>
    %108 = arith.mulf %107, %31 : vector<4x16xf32>
    %109 = arith.addf %2, %87 : vector<4x16xf32>
    %110 = arith.addf %90, %93 : vector<4x16xf32>
    %111 = arith.addf %96, %99 : vector<4x16xf32>
    %112 = arith.addf %102, %105 : vector<4x16xf32>
    %113 = arith.addf %109, %110 : vector<4x16xf32>
    %114 = arith.addf %111, %112 : vector<4x16xf32>
    %115 = arith.addf %113, %114 : vector<4x16xf32>
    %116 = arith.addf %115, %108 : vector<4x16xf32>
    %117 = math.tanh %116 : vector<4x16xf32>
    %118 = vector.extract_strided_slice %117 {offsets = [0, 0], sizes = [4, 1], strides = [1, 1]} : vector<4x16xf32> to vector<4x1xf32>
    %119 = vector.broadcast %118 : vector<4x1xf32> to vector<4x8xf32>
    %120 = arith.mulf %119, %34 : vector<4x8xf32>
    %121 = vector.extract_strided_slice %117 {offsets = [0, 1], sizes = [4, 1], strides = [1, 1]} : vector<4x16xf32> to vector<4x1xf32>
    %122 = vector.broadcast %121 : vector<4x1xf32> to vector<4x8xf32>
    %123 = arith.mulf %122, %37 : vector<4x8xf32>
    %124 = vector.extract_strided_slice %117 {offsets = [0, 2], sizes = [4, 1], strides = [1, 1]} : vector<4x16xf32> to vector<4x1xf32>
    %125 = vector.broadcast %124 : vector<4x1xf32> to vector<4x8xf32>
    %126 = arith.mulf %125, %40 : vector<4x8xf32>
    %127 = vector.extract_strided_slice %117 {offsets = [0, 3], sizes = [4, 1], strides = [1, 1]} : vector<4x16xf32> to vector<4x1xf32>
    %128 = vector.broadcast %127 : vector<4x1xf32> to vector<4x8xf32>
    %129 = arith.mulf %128, %43 : vector<4x8xf32>
    %130 = vector.extract_strided_slice %117 {offsets = [0, 4], sizes = [4, 1], strides = [1, 1]} : vector<4x16xf32> to vector<4x1xf32>
    %131 = vector.broadcast %130 : vector<4x1xf32> to vector<4x8xf32>
    %132 = arith.mulf %131, %46 : vector<4x8xf32>
    %133 = vector.extract_strided_slice %117 {offsets = [0, 5], sizes = [4, 1], strides = [1, 1]} : vector<4x16xf32> to vector<4x1xf32>
    %134 = vector.broadcast %133 : vector<4x1xf32> to vector<4x8xf32>
    %135 = arith.mulf %134, %49 : vector<4x8xf32>
    %136 = vector.extract_strided_slice %117 {offsets = [0, 6], sizes = [4, 1], strides = [1, 1]} : vector<4x16xf32> to vector<4x1xf32>
    %137 = vector.broadcast %136 : vector<4x1xf32> to vector<4x8xf32>
    %138 = arith.mulf %137, %52 : vector<4x8xf32>
    %139 = vector.extract_strided_slice %117 {offsets = [0, 7], sizes = [4, 1], strides = [1, 1]} : vector<4x16xf32> to vector<4x1xf32>
    %140 = vector.broadcast %139 : vector<4x1xf32> to vector<4x8xf32>
    %141 = arith.mulf %140, %55 : vector<4x8xf32>
    %142 = vector.extract_strided_slice %117 {offsets = [0, 8], sizes = [4, 1], strides = [1, 1]} : vector<4x16xf32> to vector<4x1xf32>
    %143 = vector.broadcast %142 : vector<4x1xf32> to vector<4x8xf32>
    %144 = arith.mulf %143, %58 : vector<4x8xf32>
    %145 = vector.extract_strided_slice %117 {offsets = [0, 9], sizes = [4, 1], strides = [1, 1]} : vector<4x16xf32> to vector<4x1xf32>
    %146 = vector.broadcast %145 : vector<4x1xf32> to vector<4x8xf32>
    %147 = arith.mulf %146, %61 : vector<4x8xf32>
    %148 = vector.extract_strided_slice %117 {offsets = [0, 10], sizes = [4, 1], strides = [1, 1]} : vector<4x16xf32> to vector<4x1xf32>
    %149 = vector.broadcast %148 : vector<4x1xf32> to vector<4x8xf32>
    %150 = arith.mulf %149, %64 : vector<4x8xf32>
    %151 = vector.extract_strided_slice %117 {offsets = [0, 11], sizes = [4, 1], strides = [1, 1]} : vector<4x16xf32> to vector<4x1xf32>
    %152 = vector.broadcast %151 : vector<4x1xf32> to vector<4x8xf32>
    %153 = arith.mulf %152, %67 : vector<4x8xf32>
    %154 = vector.extract_strided_slice %117 {offsets = [0, 12], sizes = [4, 1], strides = [1, 1]} : vector<4x16xf32> to vector<4x1xf32>
    %155 = vector.broadcast %154 : vector<4x1xf32> to vector<4x8xf32>
    %156 = arith.mulf %155, %70 : vector<4x8xf32>
    %157 = vector.extract_strided_slice %117 {offsets = [0, 13], sizes = [4, 1], strides = [1, 1]} : vector<4x16xf32> to vector<4x1xf32>
    %158 = vector.broadcast %157 : vector<4x1xf32> to vector<4x8xf32>
    %159 = arith.mulf %158, %73 : vector<4x8xf32>
    %160 = vector.extract_strided_slice %117 {offsets = [0, 14], sizes = [4, 1], strides = [1, 1]} : vector<4x16xf32> to vector<4x1xf32>
    %161 = vector.broadcast %160 : vector<4x1xf32> to vector<4x8xf32>
    %162 = arith.mulf %161, %76 : vector<4x8xf32>
    %163 = vector.extract_strided_slice %117 {offsets = [0, 15], sizes = [4, 1], strides = [1, 1]} : vector<4x16xf32> to vector<4x1xf32>
    %164 = vector.broadcast %163 : vector<4x1xf32> to vector<4x8xf32>
    %165 = arith.mulf %164, %79 : vector<4x8xf32>
    %166 = arith.addf %5, %120 : vector<4x8xf32>
    %167 = arith.addf %123, %126 : vector<4x8xf32>
    %168 = arith.addf %129, %132 : vector<4x8xf32>
    %169 = arith.addf %135, %138 : vector<4x8xf32>
    %170 = arith.addf %141, %144 : vector<4x8xf32>
    %171 = arith.addf %147, %150 : vector<4x8xf32>
    %172 = arith.addf %153, %156 : vector<4x8xf32>
    %173 = arith.addf %159, %162 : vector<4x8xf32>
    %174 = arith.addf %166, %167 : vector<4x8xf32>
    %175 = arith.addf %168, %169 : vector<4x8xf32>
    %176 = arith.addf %170, %171 : vector<4x8xf32>
    %177 = arith.addf %172, %173 : vector<4x8xf32>
    %178 = arith.addf %174, %175 : vector<4x8xf32>
    %179 = arith.addf %176, %177 : vector<4x8xf32>
    %180 = arith.addf %178, %179 : vector<4x8xf32>
    %181 = arith.addf %180, %165 : vector<4x8xf32>
    %182 = arith.mulf %84, %181 : vector<4x8xf32>
    %183 = arith.addf %80, %182 : vector<4x8xf32>
    %184 = vector.extract_strided_slice %183 {offsets = [0, 0], sizes = [4, 1], strides = [1, 1]} : vector<4x8xf32> to vector<4x1xf32>
    %185 = vector.broadcast %184 : vector<4x1xf32> to vector<4x16xf32>
    %186 = arith.mulf %185, %10 : vector<4x16xf32>
    %187 = vector.extract_strided_slice %183 {offsets = [0, 1], sizes = [4, 1], strides = [1, 1]} : vector<4x8xf32> to vector<4x1xf32>
    %188 = vector.broadcast %187 : vector<4x1xf32> to vector<4x16xf32>
    %189 = arith.mulf %188, %13 : vector<4x16xf32>
    %190 = vector.extract_strided_slice %183 {offsets = [0, 2], sizes = [4, 1], strides = [1, 1]} : vector<4x8xf32> to vector<4x1xf32>
    %191 = vector.broadcast %190 : vector<4x1xf32> to vector<4x16xf32>
    %192 = arith.mulf %191, %16 : vector<4x16xf32>
    %193 = vector.extract_strided_slice %183 {offsets = [0, 3], sizes = [4, 1], strides = [1, 1]} : vector<4x8xf32> to vector<4x1xf32>
    %194 = vector.broadcast %193 : vector<4x1xf32> to vector<4x16xf32>
    %195 = arith.mulf %194, %19 : vector<4x16xf32>
    %196 = vector.extract_strided_slice %183 {offsets = [0, 4], sizes = [4, 1], strides = [1, 1]} : vector<4x8xf32> to vector<4x1xf32>
    %197 = vector.broadcast %196 : vector<4x1xf32> to vector<4x16xf32>
    %198 = arith.mulf %197, %22 : vector<4x16xf32>
    %199 = vector.extract_strided_slice %183 {offsets = [0, 5], sizes = [4, 1], strides = [1, 1]} : vector<4x8xf32> to vector<4x1xf32>
    %200 = vector.broadcast %199 : vector<4x1xf32> to vector<4x16xf32>
    %201 = arith.mulf %200, %25 : vector<4x16xf32>
    %202 = vector.extract_strided_slice %183 {offsets = [0, 6], sizes = [4, 1], strides = [1, 1]} : vector<4x8xf32> to vector<4x1xf32>
    %203 = vector.broadcast %202 : vector<4x1xf32> to vector<4x16xf32>
    %204 = arith.mulf %203, %28 : vector<4x16xf32>
    %205 = vector.extract_strided_slice %183 {offsets = [0, 7], sizes = [4, 1], strides = [1, 1]} : vector<4x8xf32> to vector<4x1xf32>
    %206 = vector.broadcast %205 : vector<4x1xf32> to vector<4x16xf32>
    %207 = arith.mulf %206, %31 : vector<4x16xf32>
    %208 = arith.addf %2, %186 : vector<4x16xf32>
    %209 = arith.addf %189, %192 : vector<4x16xf32>
    %210 = arith.addf %195, %198 : vector<4x16xf32>
    %211 = arith.addf %201, %204 : vector<4x16xf32>
    %212 = arith.addf %208, %209 : vector<4x16xf32>
    %213 = arith.addf %210, %211 : vector<4x16xf32>
    %214 = arith.addf %212, %213 : vector<4x16xf32>
    %215 = arith.addf %214, %207 : vector<4x16xf32>
    %216 = math.tanh %215 : vector<4x16xf32>
    %217 = vector.extract_strided_slice %216 {offsets = [0, 0], sizes = [4, 1], strides = [1, 1]} : vector<4x16xf32> to vector<4x1xf32>
    %218 = vector.broadcast %217 : vector<4x1xf32> to vector<4x8xf32>
    %219 = arith.mulf %218, %34 : vector<4x8xf32>
    %220 = vector.extract_strided_slice %216 {offsets = [0, 1], sizes = [4, 1], strides = [1, 1]} : vector<4x16xf32> to vector<4x1xf32>
    %221 = vector.broadcast %220 : vector<4x1xf32> to vector<4x8xf32>
    %222 = arith.mulf %221, %37 : vector<4x8xf32>
    %223 = vector.extract_strided_slice %216 {offsets = [0, 2], sizes = [4, 1], strides = [1, 1]} : vector<4x16xf32> to vector<4x1xf32>
    %224 = vector.broadcast %223 : vector<4x1xf32> to vector<4x8xf32>
    %225 = arith.mulf %224, %40 : vector<4x8xf32>
    %226 = vector.extract_strided_slice %216 {offsets = [0, 3], sizes = [4, 1], strides = [1, 1]} : vector<4x16xf32> to vector<4x1xf32>
    %227 = vector.broadcast %226 : vector<4x1xf32> to vector<4x8xf32>
    %228 = arith.mulf %227, %43 : vector<4x8xf32>
    %229 = vector.extract_strided_slice %216 {offsets = [0, 4], sizes = [4, 1], strides = [1, 1]} : vector<4x16xf32> to vector<4x1xf32>
    %230 = vector.broadcast %229 : vector<4x1xf32> to vector<4x8xf32>
    %231 = arith.mulf %230, %46 : vector<4x8xf32>
    %232 = vector.extract_strided_slice %216 {offsets = [0, 5], sizes = [4, 1], strides = [1, 1]} : vector<4x16xf32> to vector<4x1xf32>
    %233 = vector.broadcast %232 : vector<4x1xf32> to vector<4x8xf32>
    %234 = arith.mulf %233, %49 : vector<4x8xf32>
    %235 = vector.extract_strided_slice %216 {offsets = [0, 6], sizes = [4, 1], strides = [1, 1]} : vector<4x16xf32> to vector<4x1xf32>
    %236 = vector.broadcast %235 : vector<4x1xf32> to vector<4x8xf32>
    %237 = arith.mulf %236, %52 : vector<4x8xf32>
    %238 = vector.extract_strided_slice %216 {offsets = [0, 7], sizes = [4, 1], strides = [1, 1]} : vector<4x16xf32> to vector<4x1xf32>
    %239 = vector.broadcast %238 : vector<4x1xf32> to vector<4x8xf32>
    %240 = arith.mulf %239, %55 : vector<4x8xf32>
    %241 = vector.extract_strided_slice %216 {offsets = [0, 8], sizes = [4, 1], strides = [1, 1]} : vector<4x16xf32> to vector<4x1xf32>
    %242 = vector.broadcast %241 : vector<4x1xf32> to vector<4x8xf32>
    %243 = arith.mulf %242, %58 : vector<4x8xf32>
    %244 = vector.extract_strided_slice %216 {offsets = [0, 9], sizes = [4, 1], strides = [1, 1]} : vector<4x16xf32> to vector<4x1xf32>
    %245 = vector.broadcast %244 : vector<4x1xf32> to vector<4x8xf32>
    %246 = arith.mulf %245, %61 : vector<4x8xf32>
    %247 = vector.extract_strided_slice %216 {offsets = [0, 10], sizes = [4, 1], strides = [1, 1]} : vector<4x16xf32> to vector<4x1xf32>
    %248 = vector.broadcast %247 : vector<4x1xf32> to vector<4x8xf32>
    %249 = arith.mulf %248, %64 : vector<4x8xf32>
    %250 = vector.extract_strided_slice %216 {offsets = [0, 11], sizes = [4, 1], strides = [1, 1]} : vector<4x16xf32> to vector<4x1xf32>
    %251 = vector.broadcast %250 : vector<4x1xf32> to vector<4x8xf32>
    %252 = arith.mulf %251, %67 : vector<4x8xf32>
    %253 = vector.extract_strided_slice %216 {offsets = [0, 12], sizes = [4, 1], strides = [1, 1]} : vector<4x16xf32> to vector<4x1xf32>
    %254 = vector.broadcast %253 : vector<4x1xf32> to vector<4x8xf32>
    %255 = arith.mulf %254, %70 : vector<4x8xf32>
    %256 = vector.extract_strided_slice %216 {offsets = [0, 13], sizes = [4, 1], strides = [1, 1]} : vector<4x16xf32> to vector<4x1xf32>
    %257 = vector.broadcast %256 : vector<4x1xf32> to vector<4x8xf32>
    %258 = arith.mulf %257, %73 : vector<4x8xf32>
    %259 = vector.extract_strided_slice %216 {offsets = [0, 14], sizes = [4, 1], strides = [1, 1]} : vector<4x16xf32> to vector<4x1xf32>
    %260 = vector.broadcast %259 : vector<4x1xf32> to vector<4x8xf32>
    %261 = arith.mulf %260, %76 : vector<4x8xf32>
    %262 = vector.extract_strided_slice %216 {offsets = [0, 15], sizes = [4, 1], strides = [1, 1]} : vector<4x16xf32> to vector<4x1xf32>
    %263 = vector.broadcast %262 : vector<4x1xf32> to vector<4x8xf32>
    %264 = arith.mulf %263, %79 : vector<4x8xf32>
    %265 = arith.addf %5, %219 : vector<4x8xf32>
    %266 = arith.addf %222, %225 : vector<4x8xf32>
    %267 = arith.addf %228, %231 : vector<4x8xf32>
    %268 = arith.addf %234, %237 : vector<4x8xf32>
    %269 = arith.addf %240, %243 : vector<4x8xf32>
    %270 = arith.addf %246, %249 : vector<4x8xf32>
    %271 = arith.addf %252, %255 : vector<4x8xf32>
    %272 = arith.addf %258, %261 : vector<4x8xf32>
    %273 = arith.addf %265, %266 : vector<4x8xf32>
    %274 = arith.addf %267, %268 : vector<4x8xf32>
    %275 = arith.addf %269, %270 : vector<4x8xf32>
    %276 = arith.addf %271, %272 : vector<4x8xf32>
    %277 = arith.addf %273, %274 : vector<4x8xf32>
    %278 = arith.addf %275, %276 : vector<4x8xf32>
    %279 = arith.addf %277, %278 : vector<4x8xf32>
    %280 = arith.addf %279, %264 : vector<4x8xf32>
    %281 = arith.mulf %84, %280 : vector<4x8xf32>
    %282 = arith.addf %80, %281 : vector<4x8xf32>
    %283 = vector.extract_strided_slice %282 {offsets = [0, 0], sizes = [4, 1], strides = [1, 1]} : vector<4x8xf32> to vector<4x1xf32>
    %284 = vector.broadcast %283 : vector<4x1xf32> to vector<4x16xf32>
    %285 = arith.mulf %284, %10 : vector<4x16xf32>
    %286 = vector.extract_strided_slice %282 {offsets = [0, 1], sizes = [4, 1], strides = [1, 1]} : vector<4x8xf32> to vector<4x1xf32>
    %287 = vector.broadcast %286 : vector<4x1xf32> to vector<4x16xf32>
    %288 = arith.mulf %287, %13 : vector<4x16xf32>
    %289 = vector.extract_strided_slice %282 {offsets = [0, 2], sizes = [4, 1], strides = [1, 1]} : vector<4x8xf32> to vector<4x1xf32>
    %290 = vector.broadcast %289 : vector<4x1xf32> to vector<4x16xf32>
    %291 = arith.mulf %290, %16 : vector<4x16xf32>
    %292 = vector.extract_strided_slice %282 {offsets = [0, 3], sizes = [4, 1], strides = [1, 1]} : vector<4x8xf32> to vector<4x1xf32>
    %293 = vector.broadcast %292 : vector<4x1xf32> to vector<4x16xf32>
    %294 = arith.mulf %293, %19 : vector<4x16xf32>
    %295 = vector.extract_strided_slice %282 {offsets = [0, 4], sizes = [4, 1], strides = [1, 1]} : vector<4x8xf32> to vector<4x1xf32>
    %296 = vector.broadcast %295 : vector<4x1xf32> to vector<4x16xf32>
    %297 = arith.mulf %296, %22 : vector<4x16xf32>
    %298 = vector.extract_strided_slice %282 {offsets = [0, 5], sizes = [4, 1], strides = [1, 1]} : vector<4x8xf32> to vector<4x1xf32>
    %299 = vector.broadcast %298 : vector<4x1xf32> to vector<4x16xf32>
    %300 = arith.mulf %299, %25 : vector<4x16xf32>
    %301 = vector.extract_strided_slice %282 {offsets = [0, 6], sizes = [4, 1], strides = [1, 1]} : vector<4x8xf32> to vector<4x1xf32>
    %302 = vector.broadcast %301 : vector<4x1xf32> to vector<4x16xf32>
    %303 = arith.mulf %302, %28 : vector<4x16xf32>
    %304 = vector.extract_strided_slice %282 {offsets = [0, 7], sizes = [4, 1], strides = [1, 1]} : vector<4x8xf32> to vector<4x1xf32>
    %305 = vector.broadcast %304 : vector<4x1xf32> to vector<4x16xf32>
    %306 = arith.mulf %305, %31 : vector<4x16xf32>
    %307 = arith.addf %2, %285 : vector<4x16xf32>
    %308 = arith.addf %288, %291 : vector<4x16xf32>
    %309 = arith.addf %294, %297 : vector<4x16xf32>
    %310 = arith.addf %300, %303 : vector<4x16xf32>
    %311 = arith.addf %307, %308 : vector<4x16xf32>
    %312 = arith.addf %309, %310 : vector<4x16xf32>
    %313 = arith.addf %311, %312 : vector<4x16xf32>
    %314 = arith.addf %313, %306 : vector<4x16xf32>
    %315 = math.tanh %314 : vector<4x16xf32>
    %316 = vector.extract_strided_slice %315 {offsets = [0, 0], sizes = [4, 1], strides = [1, 1]} : vector<4x16xf32> to vector<4x1xf32>
    %317 = vector.broadcast %316 : vector<4x1xf32> to vector<4x8xf32>
    %318 = arith.mulf %317, %34 : vector<4x8xf32>
    %319 = vector.extract_strided_slice %315 {offsets = [0, 1], sizes = [4, 1], strides = [1, 1]} : vector<4x16xf32> to vector<4x1xf32>
    %320 = vector.broadcast %319 : vector<4x1xf32> to vector<4x8xf32>
    %321 = arith.mulf %320, %37 : vector<4x8xf32>
    %322 = vector.extract_strided_slice %315 {offsets = [0, 2], sizes = [4, 1], strides = [1, 1]} : vector<4x16xf32> to vector<4x1xf32>
    %323 = vector.broadcast %322 : vector<4x1xf32> to vector<4x8xf32>
    %324 = arith.mulf %323, %40 : vector<4x8xf32>
    %325 = vector.extract_strided_slice %315 {offsets = [0, 3], sizes = [4, 1], strides = [1, 1]} : vector<4x16xf32> to vector<4x1xf32>
    %326 = vector.broadcast %325 : vector<4x1xf32> to vector<4x8xf32>
    %327 = arith.mulf %326, %43 : vector<4x8xf32>
    %328 = vector.extract_strided_slice %315 {offsets = [0, 4], sizes = [4, 1], strides = [1, 1]} : vector<4x16xf32> to vector<4x1xf32>
    %329 = vector.broadcast %328 : vector<4x1xf32> to vector<4x8xf32>
    %330 = arith.mulf %329, %46 : vector<4x8xf32>
    %331 = vector.extract_strided_slice %315 {offsets = [0, 5], sizes = [4, 1], strides = [1, 1]} : vector<4x16xf32> to vector<4x1xf32>
    %332 = vector.broadcast %331 : vector<4x1xf32> to vector<4x8xf32>
    %333 = arith.mulf %332, %49 : vector<4x8xf32>
    %334 = vector.extract_strided_slice %315 {offsets = [0, 6], sizes = [4, 1], strides = [1, 1]} : vector<4x16xf32> to vector<4x1xf32>
    %335 = vector.broadcast %334 : vector<4x1xf32> to vector<4x8xf32>
    %336 = arith.mulf %335, %52 : vector<4x8xf32>
    %337 = vector.extract_strided_slice %315 {offsets = [0, 7], sizes = [4, 1], strides = [1, 1]} : vector<4x16xf32> to vector<4x1xf32>
    %338 = vector.broadcast %337 : vector<4x1xf32> to vector<4x8xf32>
    %339 = arith.mulf %338, %55 : vector<4x8xf32>
    %340 = vector.extract_strided_slice %315 {offsets = [0, 8], sizes = [4, 1], strides = [1, 1]} : vector<4x16xf32> to vector<4x1xf32>
    %341 = vector.broadcast %340 : vector<4x1xf32> to vector<4x8xf32>
    %342 = arith.mulf %341, %58 : vector<4x8xf32>
    %343 = vector.extract_strided_slice %315 {offsets = [0, 9], sizes = [4, 1], strides = [1, 1]} : vector<4x16xf32> to vector<4x1xf32>
    %344 = vector.broadcast %343 : vector<4x1xf32> to vector<4x8xf32>
    %345 = arith.mulf %344, %61 : vector<4x8xf32>
    %346 = vector.extract_strided_slice %315 {offsets = [0, 10], sizes = [4, 1], strides = [1, 1]} : vector<4x16xf32> to vector<4x1xf32>
    %347 = vector.broadcast %346 : vector<4x1xf32> to vector<4x8xf32>
    %348 = arith.mulf %347, %64 : vector<4x8xf32>
    %349 = vector.extract_strided_slice %315 {offsets = [0, 11], sizes = [4, 1], strides = [1, 1]} : vector<4x16xf32> to vector<4x1xf32>
    %350 = vector.broadcast %349 : vector<4x1xf32> to vector<4x8xf32>
    %351 = arith.mulf %350, %67 : vector<4x8xf32>
    %352 = vector.extract_strided_slice %315 {offsets = [0, 12], sizes = [4, 1], strides = [1, 1]} : vector<4x16xf32> to vector<4x1xf32>
    %353 = vector.broadcast %352 : vector<4x1xf32> to vector<4x8xf32>
    %354 = arith.mulf %353, %70 : vector<4x8xf32>
    %355 = vector.extract_strided_slice %315 {offsets = [0, 13], sizes = [4, 1], strides = [1, 1]} : vector<4x16xf32> to vector<4x1xf32>
    %356 = vector.broadcast %355 : vector<4x1xf32> to vector<4x8xf32>
    %357 = arith.mulf %356, %73 : vector<4x8xf32>
    %358 = vector.extract_strided_slice %315 {offsets = [0, 14], sizes = [4, 1], strides = [1, 1]} : vector<4x16xf32> to vector<4x1xf32>
    %359 = vector.broadcast %358 : vector<4x1xf32> to vector<4x8xf32>
    %360 = arith.mulf %359, %76 : vector<4x8xf32>
    %361 = vector.extract_strided_slice %315 {offsets = [0, 15], sizes = [4, 1], strides = [1, 1]} : vector<4x16xf32> to vector<4x1xf32>
    %362 = vector.broadcast %361 : vector<4x1xf32> to vector<4x8xf32>
    %363 = arith.mulf %362, %79 : vector<4x8xf32>
    %364 = arith.addf %5, %318 : vector<4x8xf32>
    %365 = arith.addf %321, %324 : vector<4x8xf32>
    %366 = arith.addf %327, %330 : vector<4x8xf32>
    %367 = arith.addf %333, %336 : vector<4x8xf32>
    %368 = arith.addf %339, %342 : vector<4x8xf32>
    %369 = arith.addf %345, %348 : vector<4x8xf32>
    %370 = arith.addf %351, %354 : vector<4x8xf32>
    %371 = arith.addf %357, %360 : vector<4x8xf32>
    %372 = arith.addf %364, %365 : vector<4x8xf32>
    %373 = arith.addf %366, %367 : vector<4x8xf32>
    %374 = arith.addf %368, %369 : vector<4x8xf32>
    %375 = arith.addf %370, %371 : vector<4x8xf32>
    %376 = arith.addf %372, %373 : vector<4x8xf32>
    %377 = arith.addf %374, %375 : vector<4x8xf32>
    %378 = arith.addf %376, %377 : vector<4x8xf32>
    %379 = arith.addf %378, %363 : vector<4x8xf32>
    %380 = vector.broadcast %81 : f32 to vector<4x8xf32>
    %381 = arith.mulf %380, %379 : vector<4x8xf32>
    %382 = arith.addf %80, %381 : vector<4x8xf32>
    %383 = vector.extract_strided_slice %382 {offsets = [0, 0], sizes = [4, 1], strides = [1, 1]} : vector<4x8xf32> to vector<4x1xf32>
    %384 = vector.broadcast %383 : vector<4x1xf32> to vector<4x16xf32>
    %385 = arith.mulf %384, %10 : vector<4x16xf32>
    %386 = vector.extract_strided_slice %382 {offsets = [0, 1], sizes = [4, 1], strides = [1, 1]} : vector<4x8xf32> to vector<4x1xf32>
    %387 = vector.broadcast %386 : vector<4x1xf32> to vector<4x16xf32>
    %388 = arith.mulf %387, %13 : vector<4x16xf32>
    %389 = vector.extract_strided_slice %382 {offsets = [0, 2], sizes = [4, 1], strides = [1, 1]} : vector<4x8xf32> to vector<4x1xf32>
    %390 = vector.broadcast %389 : vector<4x1xf32> to vector<4x16xf32>
    %391 = arith.mulf %390, %16 : vector<4x16xf32>
    %392 = vector.extract_strided_slice %382 {offsets = [0, 3], sizes = [4, 1], strides = [1, 1]} : vector<4x8xf32> to vector<4x1xf32>
    %393 = vector.broadcast %392 : vector<4x1xf32> to vector<4x16xf32>
    %394 = arith.mulf %393, %19 : vector<4x16xf32>
    %395 = vector.extract_strided_slice %382 {offsets = [0, 4], sizes = [4, 1], strides = [1, 1]} : vector<4x8xf32> to vector<4x1xf32>
    %396 = vector.broadcast %395 : vector<4x1xf32> to vector<4x16xf32>
    %397 = arith.mulf %396, %22 : vector<4x16xf32>
    %398 = vector.extract_strided_slice %382 {offsets = [0, 5], sizes = [4, 1], strides = [1, 1]} : vector<4x8xf32> to vector<4x1xf32>
    %399 = vector.broadcast %398 : vector<4x1xf32> to vector<4x16xf32>
    %400 = arith.mulf %399, %25 : vector<4x16xf32>
    %401 = vector.extract_strided_slice %382 {offsets = [0, 6], sizes = [4, 1], strides = [1, 1]} : vector<4x8xf32> to vector<4x1xf32>
    %402 = vector.broadcast %401 : vector<4x1xf32> to vector<4x16xf32>
    %403 = arith.mulf %402, %28 : vector<4x16xf32>
    %404 = vector.extract_strided_slice %382 {offsets = [0, 7], sizes = [4, 1], strides = [1, 1]} : vector<4x8xf32> to vector<4x1xf32>
    %405 = vector.broadcast %404 : vector<4x1xf32> to vector<4x16xf32>
    %406 = arith.mulf %405, %31 : vector<4x16xf32>
    %407 = arith.addf %2, %385 : vector<4x16xf32>
    %408 = arith.addf %388, %391 : vector<4x16xf32>
    %409 = arith.addf %394, %397 : vector<4x16xf32>
    %410 = arith.addf %400, %403 : vector<4x16xf32>
    %411 = arith.addf %407, %408 : vector<4x16xf32>
    %412 = arith.addf %409, %410 : vector<4x16xf32>
    %413 = arith.addf %411, %412 : vector<4x16xf32>
    %414 = arith.addf %413, %406 : vector<4x16xf32>
    %415 = math.tanh %414 : vector<4x16xf32>
    %416 = vector.extract_strided_slice %415 {offsets = [0, 0], sizes = [4, 1], strides = [1, 1]} : vector<4x16xf32> to vector<4x1xf32>
    %417 = vector.broadcast %416 : vector<4x1xf32> to vector<4x8xf32>
    %418 = arith.mulf %417, %34 : vector<4x8xf32>
    %419 = vector.extract_strided_slice %415 {offsets = [0, 1], sizes = [4, 1], strides = [1, 1]} : vector<4x16xf32> to vector<4x1xf32>
    %420 = vector.broadcast %419 : vector<4x1xf32> to vector<4x8xf32>
    %421 = arith.mulf %420, %37 : vector<4x8xf32>
    %422 = vector.extract_strided_slice %415 {offsets = [0, 2], sizes = [4, 1], strides = [1, 1]} : vector<4x16xf32> to vector<4x1xf32>
    %423 = vector.broadcast %422 : vector<4x1xf32> to vector<4x8xf32>
    %424 = arith.mulf %423, %40 : vector<4x8xf32>
    %425 = vector.extract_strided_slice %415 {offsets = [0, 3], sizes = [4, 1], strides = [1, 1]} : vector<4x16xf32> to vector<4x1xf32>
    %426 = vector.broadcast %425 : vector<4x1xf32> to vector<4x8xf32>
    %427 = arith.mulf %426, %43 : vector<4x8xf32>
    %428 = vector.extract_strided_slice %415 {offsets = [0, 4], sizes = [4, 1], strides = [1, 1]} : vector<4x16xf32> to vector<4x1xf32>
    %429 = vector.broadcast %428 : vector<4x1xf32> to vector<4x8xf32>
    %430 = arith.mulf %429, %46 : vector<4x8xf32>
    %431 = vector.extract_strided_slice %415 {offsets = [0, 5], sizes = [4, 1], strides = [1, 1]} : vector<4x16xf32> to vector<4x1xf32>
    %432 = vector.broadcast %431 : vector<4x1xf32> to vector<4x8xf32>
    %433 = arith.mulf %432, %49 : vector<4x8xf32>
    %434 = vector.extract_strided_slice %415 {offsets = [0, 6], sizes = [4, 1], strides = [1, 1]} : vector<4x16xf32> to vector<4x1xf32>
    %435 = vector.broadcast %434 : vector<4x1xf32> to vector<4x8xf32>
    %436 = arith.mulf %435, %52 : vector<4x8xf32>
    %437 = vector.extract_strided_slice %415 {offsets = [0, 7], sizes = [4, 1], strides = [1, 1]} : vector<4x16xf32> to vector<4x1xf32>
    %438 = vector.broadcast %437 : vector<4x1xf32> to vector<4x8xf32>
    %439 = arith.mulf %438, %55 : vector<4x8xf32>
    %440 = vector.extract_strided_slice %415 {offsets = [0, 8], sizes = [4, 1], strides = [1, 1]} : vector<4x16xf32> to vector<4x1xf32>
    %441 = vector.broadcast %440 : vector<4x1xf32> to vector<4x8xf32>
    %442 = arith.mulf %441, %58 : vector<4x8xf32>
    %443 = vector.extract_strided_slice %415 {offsets = [0, 9], sizes = [4, 1], strides = [1, 1]} : vector<4x16xf32> to vector<4x1xf32>
    %444 = vector.broadcast %443 : vector<4x1xf32> to vector<4x8xf32>
    %445 = arith.mulf %444, %61 : vector<4x8xf32>
    %446 = vector.extract_strided_slice %415 {offsets = [0, 10], sizes = [4, 1], strides = [1, 1]} : vector<4x16xf32> to vector<4x1xf32>
    %447 = vector.broadcast %446 : vector<4x1xf32> to vector<4x8xf32>
    %448 = arith.mulf %447, %64 : vector<4x8xf32>
    %449 = vector.extract_strided_slice %415 {offsets = [0, 11], sizes = [4, 1], strides = [1, 1]} : vector<4x16xf32> to vector<4x1xf32>
    %450 = vector.broadcast %449 : vector<4x1xf32> to vector<4x8xf32>
    %451 = arith.mulf %450, %67 : vector<4x8xf32>
    %452 = vector.extract_strided_slice %415 {offsets = [0, 12], sizes = [4, 1], strides = [1, 1]} : vector<4x16xf32> to vector<4x1xf32>
    %453 = vector.broadcast %452 : vector<4x1xf32> to vector<4x8xf32>
    %454 = arith.mulf %453, %70 : vector<4x8xf32>
    %455 = vector.extract_strided_slice %415 {offsets = [0, 13], sizes = [4, 1], strides = [1, 1]} : vector<4x16xf32> to vector<4x1xf32>
    %456 = vector.broadcast %455 : vector<4x1xf32> to vector<4x8xf32>
    %457 = arith.mulf %456, %73 : vector<4x8xf32>
    %458 = vector.extract_strided_slice %415 {offsets = [0, 14], sizes = [4, 1], strides = [1, 1]} : vector<4x16xf32> to vector<4x1xf32>
    %459 = vector.broadcast %458 : vector<4x1xf32> to vector<4x8xf32>
    %460 = arith.mulf %459, %76 : vector<4x8xf32>
    %461 = vector.extract_strided_slice %415 {offsets = [0, 15], sizes = [4, 1], strides = [1, 1]} : vector<4x16xf32> to vector<4x1xf32>
    %462 = vector.broadcast %461 : vector<4x1xf32> to vector<4x8xf32>
    %463 = arith.mulf %462, %79 : vector<4x8xf32>
    %464 = arith.addf %5, %418 : vector<4x8xf32>
    %465 = arith.addf %421, %424 : vector<4x8xf32>
    %466 = arith.addf %427, %430 : vector<4x8xf32>
    %467 = arith.addf %433, %436 : vector<4x8xf32>
    %468 = arith.addf %439, %442 : vector<4x8xf32>
    %469 = arith.addf %445, %448 : vector<4x8xf32>
    %470 = arith.addf %451, %454 : vector<4x8xf32>
    %471 = arith.addf %457, %460 : vector<4x8xf32>
    %472 = arith.addf %464, %465 : vector<4x8xf32>
    %473 = arith.addf %466, %467 : vector<4x8xf32>
    %474 = arith.addf %468, %469 : vector<4x8xf32>
    %475 = arith.addf %470, %471 : vector<4x8xf32>
    %476 = arith.addf %472, %473 : vector<4x8xf32>
    %477 = arith.addf %474, %475 : vector<4x8xf32>
    %478 = arith.addf %476, %477 : vector<4x8xf32>
    %479 = arith.addf %478, %463 : vector<4x8xf32>
    %cst = arith.constant 2.000000e+00 : f32
    %480 = vector.broadcast %cst : f32 to vector<4x8xf32>
    %481 = arith.mulf %480, %280 : vector<4x8xf32>
    %482 = arith.addf %181, %481 : vector<4x8xf32>
    %cst_12 = arith.constant 2.000000e+00 : f32
    %483 = vector.broadcast %cst_12 : f32 to vector<4x8xf32>
    %484 = arith.mulf %483, %379 : vector<4x8xf32>
    %485 = arith.addf %482, %484 : vector<4x8xf32>
    %486 = arith.addf %485, %479 : vector<4x8xf32>
    %487 = vector.broadcast %82 : f32 to vector<4x8xf32>
    %488 = arith.mulf %487, %486 : vector<4x8xf32>
    %489 = arith.addf %80, %488 : vector<4x8xf32>
    %c1 = arith.constant 1 : index
    %490 = memref.load %arg0[%c1] : memref<4xf32, #tpu.memory_space<smem>>
    %c1_13 = arith.constant 1 : index
    %491 = memref.load %arg2[%c1_13] : memref<4xf32, #tpu.memory_space<smem>>
    %c1_14 = arith.constant 1 : index
    %492 = memref.load %arg1[%c1_14] : memref<4xf32, #tpu.memory_space<smem>>
    %493 = vector.broadcast %492 : f32 to vector<4x8xf32>
    %494 = vector.extract_strided_slice %489 {offsets = [0, 0], sizes = [4, 1], strides = [1, 1]} : vector<4x8xf32> to vector<4x1xf32>
    %495 = vector.broadcast %494 : vector<4x1xf32> to vector<4x16xf32>
    %496 = arith.mulf %495, %10 : vector<4x16xf32>
    %497 = vector.extract_strided_slice %489 {offsets = [0, 1], sizes = [4, 1], strides = [1, 1]} : vector<4x8xf32> to vector<4x1xf32>
    %498 = vector.broadcast %497 : vector<4x1xf32> to vector<4x16xf32>
    %499 = arith.mulf %498, %13 : vector<4x16xf32>
    %500 = vector.extract_strided_slice %489 {offsets = [0, 2], sizes = [4, 1], strides = [1, 1]} : vector<4x8xf32> to vector<4x1xf32>
    %501 = vector.broadcast %500 : vector<4x1xf32> to vector<4x16xf32>
    %502 = arith.mulf %501, %16 : vector<4x16xf32>
    %503 = vector.extract_strided_slice %489 {offsets = [0, 3], sizes = [4, 1], strides = [1, 1]} : vector<4x8xf32> to vector<4x1xf32>
    %504 = vector.broadcast %503 : vector<4x1xf32> to vector<4x16xf32>
    %505 = arith.mulf %504, %19 : vector<4x16xf32>
    %506 = vector.extract_strided_slice %489 {offsets = [0, 4], sizes = [4, 1], strides = [1, 1]} : vector<4x8xf32> to vector<4x1xf32>
    %507 = vector.broadcast %506 : vector<4x1xf32> to vector<4x16xf32>
    %508 = arith.mulf %507, %22 : vector<4x16xf32>
    %509 = vector.extract_strided_slice %489 {offsets = [0, 5], sizes = [4, 1], strides = [1, 1]} : vector<4x8xf32> to vector<4x1xf32>
    %510 = vector.broadcast %509 : vector<4x1xf32> to vector<4x16xf32>
    %511 = arith.mulf %510, %25 : vector<4x16xf32>
    %512 = vector.extract_strided_slice %489 {offsets = [0, 6], sizes = [4, 1], strides = [1, 1]} : vector<4x8xf32> to vector<4x1xf32>
    %513 = vector.broadcast %512 : vector<4x1xf32> to vector<4x16xf32>
    %514 = arith.mulf %513, %28 : vector<4x16xf32>
    %515 = vector.extract_strided_slice %489 {offsets = [0, 7], sizes = [4, 1], strides = [1, 1]} : vector<4x8xf32> to vector<4x1xf32>
    %516 = vector.broadcast %515 : vector<4x1xf32> to vector<4x16xf32>
    %517 = arith.mulf %516, %31 : vector<4x16xf32>
    %518 = arith.addf %2, %496 : vector<4x16xf32>
    %519 = arith.addf %499, %502 : vector<4x16xf32>
    %520 = arith.addf %505, %508 : vector<4x16xf32>
    %521 = arith.addf %511, %514 : vector<4x16xf32>
    %522 = arith.addf %518, %519 : vector<4x16xf32>
    %523 = arith.addf %520, %521 : vector<4x16xf32>
    %524 = arith.addf %522, %523 : vector<4x16xf32>
    %525 = arith.addf %524, %517 : vector<4x16xf32>
    %526 = math.tanh %525 : vector<4x16xf32>
    %527 = vector.extract_strided_slice %526 {offsets = [0, 0], sizes = [4, 1], strides = [1, 1]} : vector<4x16xf32> to vector<4x1xf32>
    %528 = vector.broadcast %527 : vector<4x1xf32> to vector<4x8xf32>
    %529 = arith.mulf %528, %34 : vector<4x8xf32>
    %530 = vector.extract_strided_slice %526 {offsets = [0, 1], sizes = [4, 1], strides = [1, 1]} : vector<4x16xf32> to vector<4x1xf32>
    %531 = vector.broadcast %530 : vector<4x1xf32> to vector<4x8xf32>
    %532 = arith.mulf %531, %37 : vector<4x8xf32>
    %533 = vector.extract_strided_slice %526 {offsets = [0, 2], sizes = [4, 1], strides = [1, 1]} : vector<4x16xf32> to vector<4x1xf32>
    %534 = vector.broadcast %533 : vector<4x1xf32> to vector<4x8xf32>
    %535 = arith.mulf %534, %40 : vector<4x8xf32>
    %536 = vector.extract_strided_slice %526 {offsets = [0, 3], sizes = [4, 1], strides = [1, 1]} : vector<4x16xf32> to vector<4x1xf32>
    %537 = vector.broadcast %536 : vector<4x1xf32> to vector<4x8xf32>
    %538 = arith.mulf %537, %43 : vector<4x8xf32>
    %539 = vector.extract_strided_slice %526 {offsets = [0, 4], sizes = [4, 1], strides = [1, 1]} : vector<4x16xf32> to vector<4x1xf32>
    %540 = vector.broadcast %539 : vector<4x1xf32> to vector<4x8xf32>
    %541 = arith.mulf %540, %46 : vector<4x8xf32>
    %542 = vector.extract_strided_slice %526 {offsets = [0, 5], sizes = [4, 1], strides = [1, 1]} : vector<4x16xf32> to vector<4x1xf32>
    %543 = vector.broadcast %542 : vector<4x1xf32> to vector<4x8xf32>
    %544 = arith.mulf %543, %49 : vector<4x8xf32>
    %545 = vector.extract_strided_slice %526 {offsets = [0, 6], sizes = [4, 1], strides = [1, 1]} : vector<4x16xf32> to vector<4x1xf32>
    %546 = vector.broadcast %545 : vector<4x1xf32> to vector<4x8xf32>
    %547 = arith.mulf %546, %52 : vector<4x8xf32>
    %548 = vector.extract_strided_slice %526 {offsets = [0, 7], sizes = [4, 1], strides = [1, 1]} : vector<4x16xf32> to vector<4x1xf32>
    %549 = vector.broadcast %548 : vector<4x1xf32> to vector<4x8xf32>
    %550 = arith.mulf %549, %55 : vector<4x8xf32>
    %551 = vector.extract_strided_slice %526 {offsets = [0, 8], sizes = [4, 1], strides = [1, 1]} : vector<4x16xf32> to vector<4x1xf32>
    %552 = vector.broadcast %551 : vector<4x1xf32> to vector<4x8xf32>
    %553 = arith.mulf %552, %58 : vector<4x8xf32>
    %554 = vector.extract_strided_slice %526 {offsets = [0, 9], sizes = [4, 1], strides = [1, 1]} : vector<4x16xf32> to vector<4x1xf32>
    %555 = vector.broadcast %554 : vector<4x1xf32> to vector<4x8xf32>
    %556 = arith.mulf %555, %61 : vector<4x8xf32>
    %557 = vector.extract_strided_slice %526 {offsets = [0, 10], sizes = [4, 1], strides = [1, 1]} : vector<4x16xf32> to vector<4x1xf32>
    %558 = vector.broadcast %557 : vector<4x1xf32> to vector<4x8xf32>
    %559 = arith.mulf %558, %64 : vector<4x8xf32>
    %560 = vector.extract_strided_slice %526 {offsets = [0, 11], sizes = [4, 1], strides = [1, 1]} : vector<4x16xf32> to vector<4x1xf32>
    %561 = vector.broadcast %560 : vector<4x1xf32> to vector<4x8xf32>
    %562 = arith.mulf %561, %67 : vector<4x8xf32>
    %563 = vector.extract_strided_slice %526 {offsets = [0, 12], sizes = [4, 1], strides = [1, 1]} : vector<4x16xf32> to vector<4x1xf32>
    %564 = vector.broadcast %563 : vector<4x1xf32> to vector<4x8xf32>
    %565 = arith.mulf %564, %70 : vector<4x8xf32>
    %566 = vector.extract_strided_slice %526 {offsets = [0, 13], sizes = [4, 1], strides = [1, 1]} : vector<4x16xf32> to vector<4x1xf32>
    %567 = vector.broadcast %566 : vector<4x1xf32> to vector<4x8xf32>
    %568 = arith.mulf %567, %73 : vector<4x8xf32>
    %569 = vector.extract_strided_slice %526 {offsets = [0, 14], sizes = [4, 1], strides = [1, 1]} : vector<4x16xf32> to vector<4x1xf32>
    %570 = vector.broadcast %569 : vector<4x1xf32> to vector<4x8xf32>
    %571 = arith.mulf %570, %76 : vector<4x8xf32>
    %572 = vector.extract_strided_slice %526 {offsets = [0, 15], sizes = [4, 1], strides = [1, 1]} : vector<4x16xf32> to vector<4x1xf32>
    %573 = vector.broadcast %572 : vector<4x1xf32> to vector<4x8xf32>
    %574 = arith.mulf %573, %79 : vector<4x8xf32>
    %575 = arith.addf %5, %529 : vector<4x8xf32>
    %576 = arith.addf %532, %535 : vector<4x8xf32>
    %577 = arith.addf %538, %541 : vector<4x8xf32>
    %578 = arith.addf %544, %547 : vector<4x8xf32>
    %579 = arith.addf %550, %553 : vector<4x8xf32>
    %580 = arith.addf %556, %559 : vector<4x8xf32>
    %581 = arith.addf %562, %565 : vector<4x8xf32>
    %582 = arith.addf %568, %571 : vector<4x8xf32>
    %583 = arith.addf %575, %576 : vector<4x8xf32>
    %584 = arith.addf %577, %578 : vector<4x8xf32>
    %585 = arith.addf %579, %580 : vector<4x8xf32>
    %586 = arith.addf %581, %582 : vector<4x8xf32>
    %587 = arith.addf %583, %584 : vector<4x8xf32>
    %588 = arith.addf %585, %586 : vector<4x8xf32>
    %589 = arith.addf %587, %588 : vector<4x8xf32>
    %590 = arith.addf %589, %574 : vector<4x8xf32>
    %591 = arith.mulf %493, %590 : vector<4x8xf32>
    %592 = arith.addf %489, %591 : vector<4x8xf32>
    %593 = vector.extract_strided_slice %592 {offsets = [0, 0], sizes = [4, 1], strides = [1, 1]} : vector<4x8xf32> to vector<4x1xf32>
    %594 = vector.broadcast %593 : vector<4x1xf32> to vector<4x16xf32>
    %595 = arith.mulf %594, %10 : vector<4x16xf32>
    %596 = vector.extract_strided_slice %592 {offsets = [0, 1], sizes = [4, 1], strides = [1, 1]} : vector<4x8xf32> to vector<4x1xf32>
    %597 = vector.broadcast %596 : vector<4x1xf32> to vector<4x16xf32>
    %598 = arith.mulf %597, %13 : vector<4x16xf32>
    %599 = vector.extract_strided_slice %592 {offsets = [0, 2], sizes = [4, 1], strides = [1, 1]} : vector<4x8xf32> to vector<4x1xf32>
    %600 = vector.broadcast %599 : vector<4x1xf32> to vector<4x16xf32>
    %601 = arith.mulf %600, %16 : vector<4x16xf32>
    %602 = vector.extract_strided_slice %592 {offsets = [0, 3], sizes = [4, 1], strides = [1, 1]} : vector<4x8xf32> to vector<4x1xf32>
    %603 = vector.broadcast %602 : vector<4x1xf32> to vector<4x16xf32>
    %604 = arith.mulf %603, %19 : vector<4x16xf32>
    %605 = vector.extract_strided_slice %592 {offsets = [0, 4], sizes = [4, 1], strides = [1, 1]} : vector<4x8xf32> to vector<4x1xf32>
    %606 = vector.broadcast %605 : vector<4x1xf32> to vector<4x16xf32>
    %607 = arith.mulf %606, %22 : vector<4x16xf32>
    %608 = vector.extract_strided_slice %592 {offsets = [0, 5], sizes = [4, 1], strides = [1, 1]} : vector<4x8xf32> to vector<4x1xf32>
    %609 = vector.broadcast %608 : vector<4x1xf32> to vector<4x16xf32>
    %610 = arith.mulf %609, %25 : vector<4x16xf32>
    %611 = vector.extract_strided_slice %592 {offsets = [0, 6], sizes = [4, 1], strides = [1, 1]} : vector<4x8xf32> to vector<4x1xf32>
    %612 = vector.broadcast %611 : vector<4x1xf32> to vector<4x16xf32>
    %613 = arith.mulf %612, %28 : vector<4x16xf32>
    %614 = vector.extract_strided_slice %592 {offsets = [0, 7], sizes = [4, 1], strides = [1, 1]} : vector<4x8xf32> to vector<4x1xf32>
    %615 = vector.broadcast %614 : vector<4x1xf32> to vector<4x16xf32>
    %616 = arith.mulf %615, %31 : vector<4x16xf32>
    %617 = arith.addf %2, %595 : vector<4x16xf32>
    %618 = arith.addf %598, %601 : vector<4x16xf32>
    %619 = arith.addf %604, %607 : vector<4x16xf32>
    %620 = arith.addf %610, %613 : vector<4x16xf32>
    %621 = arith.addf %617, %618 : vector<4x16xf32>
    %622 = arith.addf %619, %620 : vector<4x16xf32>
    %623 = arith.addf %621, %622 : vector<4x16xf32>
    %624 = arith.addf %623, %616 : vector<4x16xf32>
    %625 = math.tanh %624 : vector<4x16xf32>
    %626 = vector.extract_strided_slice %625 {offsets = [0, 0], sizes = [4, 1], strides = [1, 1]} : vector<4x16xf32> to vector<4x1xf32>
    %627 = vector.broadcast %626 : vector<4x1xf32> to vector<4x8xf32>
    %628 = arith.mulf %627, %34 : vector<4x8xf32>
    %629 = vector.extract_strided_slice %625 {offsets = [0, 1], sizes = [4, 1], strides = [1, 1]} : vector<4x16xf32> to vector<4x1xf32>
    %630 = vector.broadcast %629 : vector<4x1xf32> to vector<4x8xf32>
    %631 = arith.mulf %630, %37 : vector<4x8xf32>
    %632 = vector.extract_strided_slice %625 {offsets = [0, 2], sizes = [4, 1], strides = [1, 1]} : vector<4x16xf32> to vector<4x1xf32>
    %633 = vector.broadcast %632 : vector<4x1xf32> to vector<4x8xf32>
    %634 = arith.mulf %633, %40 : vector<4x8xf32>
    %635 = vector.extract_strided_slice %625 {offsets = [0, 3], sizes = [4, 1], strides = [1, 1]} : vector<4x16xf32> to vector<4x1xf32>
    %636 = vector.broadcast %635 : vector<4x1xf32> to vector<4x8xf32>
    %637 = arith.mulf %636, %43 : vector<4x8xf32>
    %638 = vector.extract_strided_slice %625 {offsets = [0, 4], sizes = [4, 1], strides = [1, 1]} : vector<4x16xf32> to vector<4x1xf32>
    %639 = vector.broadcast %638 : vector<4x1xf32> to vector<4x8xf32>
    %640 = arith.mulf %639, %46 : vector<4x8xf32>
    %641 = vector.extract_strided_slice %625 {offsets = [0, 5], sizes = [4, 1], strides = [1, 1]} : vector<4x16xf32> to vector<4x1xf32>
    %642 = vector.broadcast %641 : vector<4x1xf32> to vector<4x8xf32>
    %643 = arith.mulf %642, %49 : vector<4x8xf32>
    %644 = vector.extract_strided_slice %625 {offsets = [0, 6], sizes = [4, 1], strides = [1, 1]} : vector<4x16xf32> to vector<4x1xf32>
    %645 = vector.broadcast %644 : vector<4x1xf32> to vector<4x8xf32>
    %646 = arith.mulf %645, %52 : vector<4x8xf32>
    %647 = vector.extract_strided_slice %625 {offsets = [0, 7], sizes = [4, 1], strides = [1, 1]} : vector<4x16xf32> to vector<4x1xf32>
    %648 = vector.broadcast %647 : vector<4x1xf32> to vector<4x8xf32>
    %649 = arith.mulf %648, %55 : vector<4x8xf32>
    %650 = vector.extract_strided_slice %625 {offsets = [0, 8], sizes = [4, 1], strides = [1, 1]} : vector<4x16xf32> to vector<4x1xf32>
    %651 = vector.broadcast %650 : vector<4x1xf32> to vector<4x8xf32>
    %652 = arith.mulf %651, %58 : vector<4x8xf32>
    %653 = vector.extract_strided_slice %625 {offsets = [0, 9], sizes = [4, 1], strides = [1, 1]} : vector<4x16xf32> to vector<4x1xf32>
    %654 = vector.broadcast %653 : vector<4x1xf32> to vector<4x8xf32>
    %655 = arith.mulf %654, %61 : vector<4x8xf32>
    %656 = vector.extract_strided_slice %625 {offsets = [0, 10], sizes = [4, 1], strides = [1, 1]} : vector<4x16xf32> to vector<4x1xf32>
    %657 = vector.broadcast %656 : vector<4x1xf32> to vector<4x8xf32>
    %658 = arith.mulf %657, %64 : vector<4x8xf32>
    %659 = vector.extract_strided_slice %625 {offsets = [0, 11], sizes = [4, 1], strides = [1, 1]} : vector<4x16xf32> to vector<4x1xf32>
    %660 = vector.broadcast %659 : vector<4x1xf32> to vector<4x8xf32>
    %661 = arith.mulf %660, %67 : vector<4x8xf32>
    %662 = vector.extract_strided_slice %625 {offsets = [0, 12], sizes = [4, 1], strides = [1, 1]} : vector<4x16xf32> to vector<4x1xf32>
    %663 = vector.broadcast %662 : vector<4x1xf32> to vector<4x8xf32>
    %664 = arith.mulf %663, %70 : vector<4x8xf32>
    %665 = vector.extract_strided_slice %625 {offsets = [0, 13], sizes = [4, 1], strides = [1, 1]} : vector<4x16xf32> to vector<4x1xf32>
    %666 = vector.broadcast %665 : vector<4x1xf32> to vector<4x8xf32>
    %667 = arith.mulf %666, %73 : vector<4x8xf32>
    %668 = vector.extract_strided_slice %625 {offsets = [0, 14], sizes = [4, 1], strides = [1, 1]} : vector<4x16xf32> to vector<4x1xf32>
    %669 = vector.broadcast %668 : vector<4x1xf32> to vector<4x8xf32>
    %670 = arith.mulf %669, %76 : vector<4x8xf32>
    %671 = vector.extract_strided_slice %625 {offsets = [0, 15], sizes = [4, 1], strides = [1, 1]} : vector<4x16xf32> to vector<4x1xf32>
    %672 = vector.broadcast %671 : vector<4x1xf32> to vector<4x8xf32>
    %673 = arith.mulf %672, %79 : vector<4x8xf32>
    %674 = arith.addf %5, %628 : vector<4x8xf32>
    %675 = arith.addf %631, %634 : vector<4x8xf32>
    %676 = arith.addf %637, %640 : vector<4x8xf32>
    %677 = arith.addf %643, %646 : vector<4x8xf32>
    %678 = arith.addf %649, %652 : vector<4x8xf32>
    %679 = arith.addf %655, %658 : vector<4x8xf32>
    %680 = arith.addf %661, %664 : vector<4x8xf32>
    %681 = arith.addf %667, %670 : vector<4x8xf32>
    %682 = arith.addf %674, %675 : vector<4x8xf32>
    %683 = arith.addf %676, %677 : vector<4x8xf32>
    %684 = arith.addf %678, %679 : vector<4x8xf32>
    %685 = arith.addf %680, %681 : vector<4x8xf32>
    %686 = arith.addf %682, %683 : vector<4x8xf32>
    %687 = arith.addf %684, %685 : vector<4x8xf32>
    %688 = arith.addf %686, %687 : vector<4x8xf32>
    %689 = arith.addf %688, %673 : vector<4x8xf32>
    %690 = arith.mulf %493, %689 : vector<4x8xf32>
    %691 = arith.addf %489, %690 : vector<4x8xf32>
    %692 = vector.extract_strided_slice %691 {offsets = [0, 0], sizes = [4, 1], strides = [1, 1]} : vector<4x8xf32> to vector<4x1xf32>
    %693 = vector.broadcast %692 : vector<4x1xf32> to vector<4x16xf32>
    %694 = arith.mulf %693, %10 : vector<4x16xf32>
    %695 = vector.extract_strided_slice %691 {offsets = [0, 1], sizes = [4, 1], strides = [1, 1]} : vector<4x8xf32> to vector<4x1xf32>
    %696 = vector.broadcast %695 : vector<4x1xf32> to vector<4x16xf32>
    %697 = arith.mulf %696, %13 : vector<4x16xf32>
    %698 = vector.extract_strided_slice %691 {offsets = [0, 2], sizes = [4, 1], strides = [1, 1]} : vector<4x8xf32> to vector<4x1xf32>
    %699 = vector.broadcast %698 : vector<4x1xf32> to vector<4x16xf32>
    %700 = arith.mulf %699, %16 : vector<4x16xf32>
    %701 = vector.extract_strided_slice %691 {offsets = [0, 3], sizes = [4, 1], strides = [1, 1]} : vector<4x8xf32> to vector<4x1xf32>
    %702 = vector.broadcast %701 : vector<4x1xf32> to vector<4x16xf32>
    %703 = arith.mulf %702, %19 : vector<4x16xf32>
    %704 = vector.extract_strided_slice %691 {offsets = [0, 4], sizes = [4, 1], strides = [1, 1]} : vector<4x8xf32> to vector<4x1xf32>
    %705 = vector.broadcast %704 : vector<4x1xf32> to vector<4x16xf32>
    %706 = arith.mulf %705, %22 : vector<4x16xf32>
    %707 = vector.extract_strided_slice %691 {offsets = [0, 5], sizes = [4, 1], strides = [1, 1]} : vector<4x8xf32> to vector<4x1xf32>
    %708 = vector.broadcast %707 : vector<4x1xf32> to vector<4x16xf32>
    %709 = arith.mulf %708, %25 : vector<4x16xf32>
    %710 = vector.extract_strided_slice %691 {offsets = [0, 6], sizes = [4, 1], strides = [1, 1]} : vector<4x8xf32> to vector<4x1xf32>
    %711 = vector.broadcast %710 : vector<4x1xf32> to vector<4x16xf32>
    %712 = arith.mulf %711, %28 : vector<4x16xf32>
    %713 = vector.extract_strided_slice %691 {offsets = [0, 7], sizes = [4, 1], strides = [1, 1]} : vector<4x8xf32> to vector<4x1xf32>
    %714 = vector.broadcast %713 : vector<4x1xf32> to vector<4x16xf32>
    %715 = arith.mulf %714, %31 : vector<4x16xf32>
    %716 = arith.addf %2, %694 : vector<4x16xf32>
    %717 = arith.addf %697, %700 : vector<4x16xf32>
    %718 = arith.addf %703, %706 : vector<4x16xf32>
    %719 = arith.addf %709, %712 : vector<4x16xf32>
    %720 = arith.addf %716, %717 : vector<4x16xf32>
    %721 = arith.addf %718, %719 : vector<4x16xf32>
    %722 = arith.addf %720, %721 : vector<4x16xf32>
    %723 = arith.addf %722, %715 : vector<4x16xf32>
    %724 = math.tanh %723 : vector<4x16xf32>
    %725 = vector.extract_strided_slice %724 {offsets = [0, 0], sizes = [4, 1], strides = [1, 1]} : vector<4x16xf32> to vector<4x1xf32>
    %726 = vector.broadcast %725 : vector<4x1xf32> to vector<4x8xf32>
    %727 = arith.mulf %726, %34 : vector<4x8xf32>
    %728 = vector.extract_strided_slice %724 {offsets = [0, 1], sizes = [4, 1], strides = [1, 1]} : vector<4x16xf32> to vector<4x1xf32>
    %729 = vector.broadcast %728 : vector<4x1xf32> to vector<4x8xf32>
    %730 = arith.mulf %729, %37 : vector<4x8xf32>
    %731 = vector.extract_strided_slice %724 {offsets = [0, 2], sizes = [4, 1], strides = [1, 1]} : vector<4x16xf32> to vector<4x1xf32>
    %732 = vector.broadcast %731 : vector<4x1xf32> to vector<4x8xf32>
    %733 = arith.mulf %732, %40 : vector<4x8xf32>
    %734 = vector.extract_strided_slice %724 {offsets = [0, 3], sizes = [4, 1], strides = [1, 1]} : vector<4x16xf32> to vector<4x1xf32>
    %735 = vector.broadcast %734 : vector<4x1xf32> to vector<4x8xf32>
    %736 = arith.mulf %735, %43 : vector<4x8xf32>
    %737 = vector.extract_strided_slice %724 {offsets = [0, 4], sizes = [4, 1], strides = [1, 1]} : vector<4x16xf32> to vector<4x1xf32>
    %738 = vector.broadcast %737 : vector<4x1xf32> to vector<4x8xf32>
    %739 = arith.mulf %738, %46 : vector<4x8xf32>
    %740 = vector.extract_strided_slice %724 {offsets = [0, 5], sizes = [4, 1], strides = [1, 1]} : vector<4x16xf32> to vector<4x1xf32>
    %741 = vector.broadcast %740 : vector<4x1xf32> to vector<4x8xf32>
    %742 = arith.mulf %741, %49 : vector<4x8xf32>
    %743 = vector.extract_strided_slice %724 {offsets = [0, 6], sizes = [4, 1], strides = [1, 1]} : vector<4x16xf32> to vector<4x1xf32>
    %744 = vector.broadcast %743 : vector<4x1xf32> to vector<4x8xf32>
    %745 = arith.mulf %744, %52 : vector<4x8xf32>
    %746 = vector.extract_strided_slice %724 {offsets = [0, 7], sizes = [4, 1], strides = [1, 1]} : vector<4x16xf32> to vector<4x1xf32>
    %747 = vector.broadcast %746 : vector<4x1xf32> to vector<4x8xf32>
    %748 = arith.mulf %747, %55 : vector<4x8xf32>
    %749 = vector.extract_strided_slice %724 {offsets = [0, 8], sizes = [4, 1], strides = [1, 1]} : vector<4x16xf32> to vector<4x1xf32>
    %750 = vector.broadcast %749 : vector<4x1xf32> to vector<4x8xf32>
    %751 = arith.mulf %750, %58 : vector<4x8xf32>
    %752 = vector.extract_strided_slice %724 {offsets = [0, 9], sizes = [4, 1], strides = [1, 1]} : vector<4x16xf32> to vector<4x1xf32>
    %753 = vector.broadcast %752 : vector<4x1xf32> to vector<4x8xf32>
    %754 = arith.mulf %753, %61 : vector<4x8xf32>
    %755 = vector.extract_strided_slice %724 {offsets = [0, 10], sizes = [4, 1], strides = [1, 1]} : vector<4x16xf32> to vector<4x1xf32>
    %756 = vector.broadcast %755 : vector<4x1xf32> to vector<4x8xf32>
    %757 = arith.mulf %756, %64 : vector<4x8xf32>
    %758 = vector.extract_strided_slice %724 {offsets = [0, 11], sizes = [4, 1], strides = [1, 1]} : vector<4x16xf32> to vector<4x1xf32>
    %759 = vector.broadcast %758 : vector<4x1xf32> to vector<4x8xf32>
    %760 = arith.mulf %759, %67 : vector<4x8xf32>
    %761 = vector.extract_strided_slice %724 {offsets = [0, 12], sizes = [4, 1], strides = [1, 1]} : vector<4x16xf32> to vector<4x1xf32>
    %762 = vector.broadcast %761 : vector<4x1xf32> to vector<4x8xf32>
    %763 = arith.mulf %762, %70 : vector<4x8xf32>
    %764 = vector.extract_strided_slice %724 {offsets = [0, 13], sizes = [4, 1], strides = [1, 1]} : vector<4x16xf32> to vector<4x1xf32>
    %765 = vector.broadcast %764 : vector<4x1xf32> to vector<4x8xf32>
    %766 = arith.mulf %765, %73 : vector<4x8xf32>
    %767 = vector.extract_strided_slice %724 {offsets = [0, 14], sizes = [4, 1], strides = [1, 1]} : vector<4x16xf32> to vector<4x1xf32>
    %768 = vector.broadcast %767 : vector<4x1xf32> to vector<4x8xf32>
    %769 = arith.mulf %768, %76 : vector<4x8xf32>
    %770 = vector.extract_strided_slice %724 {offsets = [0, 15], sizes = [4, 1], strides = [1, 1]} : vector<4x16xf32> to vector<4x1xf32>
    %771 = vector.broadcast %770 : vector<4x1xf32> to vector<4x8xf32>
    %772 = arith.mulf %771, %79 : vector<4x8xf32>
    %773 = arith.addf %5, %727 : vector<4x8xf32>
    %774 = arith.addf %730, %733 : vector<4x8xf32>
    %775 = arith.addf %736, %739 : vector<4x8xf32>
    %776 = arith.addf %742, %745 : vector<4x8xf32>
    %777 = arith.addf %748, %751 : vector<4x8xf32>
    %778 = arith.addf %754, %757 : vector<4x8xf32>
    %779 = arith.addf %760, %763 : vector<4x8xf32>
    %780 = arith.addf %766, %769 : vector<4x8xf32>
    %781 = arith.addf %773, %774 : vector<4x8xf32>
    %782 = arith.addf %775, %776 : vector<4x8xf32>
    %783 = arith.addf %777, %778 : vector<4x8xf32>
    %784 = arith.addf %779, %780 : vector<4x8xf32>
    %785 = arith.addf %781, %782 : vector<4x8xf32>
    %786 = arith.addf %783, %784 : vector<4x8xf32>
    %787 = arith.addf %785, %786 : vector<4x8xf32>
    %788 = arith.addf %787, %772 : vector<4x8xf32>
    %789 = vector.broadcast %490 : f32 to vector<4x8xf32>
    %790 = arith.mulf %789, %788 : vector<4x8xf32>
    %791 = arith.addf %489, %790 : vector<4x8xf32>
    %792 = vector.extract_strided_slice %791 {offsets = [0, 0], sizes = [4, 1], strides = [1, 1]} : vector<4x8xf32> to vector<4x1xf32>
    %793 = vector.broadcast %792 : vector<4x1xf32> to vector<4x16xf32>
    %794 = arith.mulf %793, %10 : vector<4x16xf32>
    %795 = vector.extract_strided_slice %791 {offsets = [0, 1], sizes = [4, 1], strides = [1, 1]} : vector<4x8xf32> to vector<4x1xf32>
    %796 = vector.broadcast %795 : vector<4x1xf32> to vector<4x16xf32>
    %797 = arith.mulf %796, %13 : vector<4x16xf32>
    %798 = vector.extract_strided_slice %791 {offsets = [0, 2], sizes = [4, 1], strides = [1, 1]} : vector<4x8xf32> to vector<4x1xf32>
    %799 = vector.broadcast %798 : vector<4x1xf32> to vector<4x16xf32>
    %800 = arith.mulf %799, %16 : vector<4x16xf32>
    %801 = vector.extract_strided_slice %791 {offsets = [0, 3], sizes = [4, 1], strides = [1, 1]} : vector<4x8xf32> to vector<4x1xf32>
    %802 = vector.broadcast %801 : vector<4x1xf32> to vector<4x16xf32>
    %803 = arith.mulf %802, %19 : vector<4x16xf32>
    %804 = vector.extract_strided_slice %791 {offsets = [0, 4], sizes = [4, 1], strides = [1, 1]} : vector<4x8xf32> to vector<4x1xf32>
    %805 = vector.broadcast %804 : vector<4x1xf32> to vector<4x16xf32>
    %806 = arith.mulf %805, %22 : vector<4x16xf32>
    %807 = vector.extract_strided_slice %791 {offsets = [0, 5], sizes = [4, 1], strides = [1, 1]} : vector<4x8xf32> to vector<4x1xf32>
    %808 = vector.broadcast %807 : vector<4x1xf32> to vector<4x16xf32>
    %809 = arith.mulf %808, %25 : vector<4x16xf32>
    %810 = vector.extract_strided_slice %791 {offsets = [0, 6], sizes = [4, 1], strides = [1, 1]} : vector<4x8xf32> to vector<4x1xf32>
    %811 = vector.broadcast %810 : vector<4x1xf32> to vector<4x16xf32>
    %812 = arith.mulf %811, %28 : vector<4x16xf32>
    %813 = vector.extract_strided_slice %791 {offsets = [0, 7], sizes = [4, 1], strides = [1, 1]} : vector<4x8xf32> to vector<4x1xf32>
    %814 = vector.broadcast %813 : vector<4x1xf32> to vector<4x16xf32>
    %815 = arith.mulf %814, %31 : vector<4x16xf32>
    %816 = arith.addf %2, %794 : vector<4x16xf32>
    %817 = arith.addf %797, %800 : vector<4x16xf32>
    %818 = arith.addf %803, %806 : vector<4x16xf32>
    %819 = arith.addf %809, %812 : vector<4x16xf32>
    %820 = arith.addf %816, %817 : vector<4x16xf32>
    %821 = arith.addf %818, %819 : vector<4x16xf32>
    %822 = arith.addf %820, %821 : vector<4x16xf32>
    %823 = arith.addf %822, %815 : vector<4x16xf32>
    %824 = math.tanh %823 : vector<4x16xf32>
    %825 = vector.extract_strided_slice %824 {offsets = [0, 0], sizes = [4, 1], strides = [1, 1]} : vector<4x16xf32> to vector<4x1xf32>
    %826 = vector.broadcast %825 : vector<4x1xf32> to vector<4x8xf32>
    %827 = arith.mulf %826, %34 : vector<4x8xf32>
    %828 = vector.extract_strided_slice %824 {offsets = [0, 1], sizes = [4, 1], strides = [1, 1]} : vector<4x16xf32> to vector<4x1xf32>
    %829 = vector.broadcast %828 : vector<4x1xf32> to vector<4x8xf32>
    %830 = arith.mulf %829, %37 : vector<4x8xf32>
    %831 = vector.extract_strided_slice %824 {offsets = [0, 2], sizes = [4, 1], strides = [1, 1]} : vector<4x16xf32> to vector<4x1xf32>
    %832 = vector.broadcast %831 : vector<4x1xf32> to vector<4x8xf32>
    %833 = arith.mulf %832, %40 : vector<4x8xf32>
    %834 = vector.extract_strided_slice %824 {offsets = [0, 3], sizes = [4, 1], strides = [1, 1]} : vector<4x16xf32> to vector<4x1xf32>
    %835 = vector.broadcast %834 : vector<4x1xf32> to vector<4x8xf32>
    %836 = arith.mulf %835, %43 : vector<4x8xf32>
    %837 = vector.extract_strided_slice %824 {offsets = [0, 4], sizes = [4, 1], strides = [1, 1]} : vector<4x16xf32> to vector<4x1xf32>
    %838 = vector.broadcast %837 : vector<4x1xf32> to vector<4x8xf32>
    %839 = arith.mulf %838, %46 : vector<4x8xf32>
    %840 = vector.extract_strided_slice %824 {offsets = [0, 5], sizes = [4, 1], strides = [1, 1]} : vector<4x16xf32> to vector<4x1xf32>
    %841 = vector.broadcast %840 : vector<4x1xf32> to vector<4x8xf32>
    %842 = arith.mulf %841, %49 : vector<4x8xf32>
    %843 = vector.extract_strided_slice %824 {offsets = [0, 6], sizes = [4, 1], strides = [1, 1]} : vector<4x16xf32> to vector<4x1xf32>
    %844 = vector.broadcast %843 : vector<4x1xf32> to vector<4x8xf32>
    %845 = arith.mulf %844, %52 : vector<4x8xf32>
    %846 = vector.extract_strided_slice %824 {offsets = [0, 7], sizes = [4, 1], strides = [1, 1]} : vector<4x16xf32> to vector<4x1xf32>
    %847 = vector.broadcast %846 : vector<4x1xf32> to vector<4x8xf32>
    %848 = arith.mulf %847, %55 : vector<4x8xf32>
    %849 = vector.extract_strided_slice %824 {offsets = [0, 8], sizes = [4, 1], strides = [1, 1]} : vector<4x16xf32> to vector<4x1xf32>
    %850 = vector.broadcast %849 : vector<4x1xf32> to vector<4x8xf32>
    %851 = arith.mulf %850, %58 : vector<4x8xf32>
    %852 = vector.extract_strided_slice %824 {offsets = [0, 9], sizes = [4, 1], strides = [1, 1]} : vector<4x16xf32> to vector<4x1xf32>
    %853 = vector.broadcast %852 : vector<4x1xf32> to vector<4x8xf32>
    %854 = arith.mulf %853, %61 : vector<4x8xf32>
    %855 = vector.extract_strided_slice %824 {offsets = [0, 10], sizes = [4, 1], strides = [1, 1]} : vector<4x16xf32> to vector<4x1xf32>
    %856 = vector.broadcast %855 : vector<4x1xf32> to vector<4x8xf32>
    %857 = arith.mulf %856, %64 : vector<4x8xf32>
    %858 = vector.extract_strided_slice %824 {offsets = [0, 11], sizes = [4, 1], strides = [1, 1]} : vector<4x16xf32> to vector<4x1xf32>
    %859 = vector.broadcast %858 : vector<4x1xf32> to vector<4x8xf32>
    %860 = arith.mulf %859, %67 : vector<4x8xf32>
    %861 = vector.extract_strided_slice %824 {offsets = [0, 12], sizes = [4, 1], strides = [1, 1]} : vector<4x16xf32> to vector<4x1xf32>
    %862 = vector.broadcast %861 : vector<4x1xf32> to vector<4x8xf32>
    %863 = arith.mulf %862, %70 : vector<4x8xf32>
    %864 = vector.extract_strided_slice %824 {offsets = [0, 13], sizes = [4, 1], strides = [1, 1]} : vector<4x16xf32> to vector<4x1xf32>
    %865 = vector.broadcast %864 : vector<4x1xf32> to vector<4x8xf32>
    %866 = arith.mulf %865, %73 : vector<4x8xf32>
    %867 = vector.extract_strided_slice %824 {offsets = [0, 14], sizes = [4, 1], strides = [1, 1]} : vector<4x16xf32> to vector<4x1xf32>
    %868 = vector.broadcast %867 : vector<4x1xf32> to vector<4x8xf32>
    %869 = arith.mulf %868, %76 : vector<4x8xf32>
    %870 = vector.extract_strided_slice %824 {offsets = [0, 15], sizes = [4, 1], strides = [1, 1]} : vector<4x16xf32> to vector<4x1xf32>
    %871 = vector.broadcast %870 : vector<4x1xf32> to vector<4x8xf32>
    %872 = arith.mulf %871, %79 : vector<4x8xf32>
    %873 = arith.addf %5, %827 : vector<4x8xf32>
    %874 = arith.addf %830, %833 : vector<4x8xf32>
    %875 = arith.addf %836, %839 : vector<4x8xf32>
    %876 = arith.addf %842, %845 : vector<4x8xf32>
    %877 = arith.addf %848, %851 : vector<4x8xf32>
    %878 = arith.addf %854, %857 : vector<4x8xf32>
    %879 = arith.addf %860, %863 : vector<4x8xf32>
    %880 = arith.addf %866, %869 : vector<4x8xf32>
    %881 = arith.addf %873, %874 : vector<4x8xf32>
    %882 = arith.addf %875, %876 : vector<4x8xf32>
    %883 = arith.addf %877, %878 : vector<4x8xf32>
    %884 = arith.addf %879, %880 : vector<4x8xf32>
    %885 = arith.addf %881, %882 : vector<4x8xf32>
    %886 = arith.addf %883, %884 : vector<4x8xf32>
    %887 = arith.addf %885, %886 : vector<4x8xf32>
    %888 = arith.addf %887, %872 : vector<4x8xf32>
    %cst_15 = arith.constant 2.000000e+00 : f32
    %889 = vector.broadcast %cst_15 : f32 to vector<4x8xf32>
    %890 = arith.mulf %889, %689 : vector<4x8xf32>
    %891 = arith.addf %590, %890 : vector<4x8xf32>
    %cst_16 = arith.constant 2.000000e+00 : f32
    %892 = vector.broadcast %cst_16 : f32 to vector<4x8xf32>
    %893 = arith.mulf %892, %788 : vector<4x8xf32>
    %894 = arith.addf %891, %893 : vector<4x8xf32>
    %895 = arith.addf %894, %888 : vector<4x8xf32>
    %896 = vector.broadcast %491 : f32 to vector<4x8xf32>
    %897 = arith.mulf %896, %895 : vector<4x8xf32>
    %898 = arith.addf %489, %897 : vector<4x8xf32>
    %c2 = arith.constant 2 : index
    %899 = memref.load %arg0[%c2] : memref<4xf32, #tpu.memory_space<smem>>
    %c2_17 = arith.constant 2 : index
    %900 = memref.load %arg2[%c2_17] : memref<4xf32, #tpu.memory_space<smem>>
    %c2_18 = arith.constant 2 : index
    %901 = memref.load %arg1[%c2_18] : memref<4xf32, #tpu.memory_space<smem>>
    %902 = vector.broadcast %901 : f32 to vector<4x8xf32>
    %903 = vector.extract_strided_slice %898 {offsets = [0, 0], sizes = [4, 1], strides = [1, 1]} : vector<4x8xf32> to vector<4x1xf32>
    %904 = vector.broadcast %903 : vector<4x1xf32> to vector<4x16xf32>
    %905 = arith.mulf %904, %10 : vector<4x16xf32>
    %906 = vector.extract_strided_slice %898 {offsets = [0, 1], sizes = [4, 1], strides = [1, 1]} : vector<4x8xf32> to vector<4x1xf32>
    %907 = vector.broadcast %906 : vector<4x1xf32> to vector<4x16xf32>
    %908 = arith.mulf %907, %13 : vector<4x16xf32>
    %909 = vector.extract_strided_slice %898 {offsets = [0, 2], sizes = [4, 1], strides = [1, 1]} : vector<4x8xf32> to vector<4x1xf32>
    %910 = vector.broadcast %909 : vector<4x1xf32> to vector<4x16xf32>
    %911 = arith.mulf %910, %16 : vector<4x16xf32>
    %912 = vector.extract_strided_slice %898 {offsets = [0, 3], sizes = [4, 1], strides = [1, 1]} : vector<4x8xf32> to vector<4x1xf32>
    %913 = vector.broadcast %912 : vector<4x1xf32> to vector<4x16xf32>
    %914 = arith.mulf %913, %19 : vector<4x16xf32>
    %915 = vector.extract_strided_slice %898 {offsets = [0, 4], sizes = [4, 1], strides = [1, 1]} : vector<4x8xf32> to vector<4x1xf32>
    %916 = vector.broadcast %915 : vector<4x1xf32> to vector<4x16xf32>
    %917 = arith.mulf %916, %22 : vector<4x16xf32>
    %918 = vector.extract_strided_slice %898 {offsets = [0, 5], sizes = [4, 1], strides = [1, 1]} : vector<4x8xf32> to vector<4x1xf32>
    %919 = vector.broadcast %918 : vector<4x1xf32> to vector<4x16xf32>
    %920 = arith.mulf %919, %25 : vector<4x16xf32>
    %921 = vector.extract_strided_slice %898 {offsets = [0, 6], sizes = [4, 1], strides = [1, 1]} : vector<4x8xf32> to vector<4x1xf32>
    %922 = vector.broadcast %921 : vector<4x1xf32> to vector<4x16xf32>
    %923 = arith.mulf %922, %28 : vector<4x16xf32>
    %924 = vector.extract_strided_slice %898 {offsets = [0, 7], sizes = [4, 1], strides = [1, 1]} : vector<4x8xf32> to vector<4x1xf32>
    %925 = vector.broadcast %924 : vector<4x1xf32> to vector<4x16xf32>
    %926 = arith.mulf %925, %31 : vector<4x16xf32>
    %927 = arith.addf %2, %905 : vector<4x16xf32>
    %928 = arith.addf %908, %911 : vector<4x16xf32>
    %929 = arith.addf %914, %917 : vector<4x16xf32>
    %930 = arith.addf %920, %923 : vector<4x16xf32>
    %931 = arith.addf %927, %928 : vector<4x16xf32>
    %932 = arith.addf %929, %930 : vector<4x16xf32>
    %933 = arith.addf %931, %932 : vector<4x16xf32>
    %934 = arith.addf %933, %926 : vector<4x16xf32>
    %935 = math.tanh %934 : vector<4x16xf32>
    %936 = vector.extract_strided_slice %935 {offsets = [0, 0], sizes = [4, 1], strides = [1, 1]} : vector<4x16xf32> to vector<4x1xf32>
    %937 = vector.broadcast %936 : vector<4x1xf32> to vector<4x8xf32>
    %938 = arith.mulf %937, %34 : vector<4x8xf32>
    %939 = vector.extract_strided_slice %935 {offsets = [0, 1], sizes = [4, 1], strides = [1, 1]} : vector<4x16xf32> to vector<4x1xf32>
    %940 = vector.broadcast %939 : vector<4x1xf32> to vector<4x8xf32>
    %941 = arith.mulf %940, %37 : vector<4x8xf32>
    %942 = vector.extract_strided_slice %935 {offsets = [0, 2], sizes = [4, 1], strides = [1, 1]} : vector<4x16xf32> to vector<4x1xf32>
    %943 = vector.broadcast %942 : vector<4x1xf32> to vector<4x8xf32>
    %944 = arith.mulf %943, %40 : vector<4x8xf32>
    %945 = vector.extract_strided_slice %935 {offsets = [0, 3], sizes = [4, 1], strides = [1, 1]} : vector<4x16xf32> to vector<4x1xf32>
    %946 = vector.broadcast %945 : vector<4x1xf32> to vector<4x8xf32>
    %947 = arith.mulf %946, %43 : vector<4x8xf32>
    %948 = vector.extract_strided_slice %935 {offsets = [0, 4], sizes = [4, 1], strides = [1, 1]} : vector<4x16xf32> to vector<4x1xf32>
    %949 = vector.broadcast %948 : vector<4x1xf32> to vector<4x8xf32>
    %950 = arith.mulf %949, %46 : vector<4x8xf32>
    %951 = vector.extract_strided_slice %935 {offsets = [0, 5], sizes = [4, 1], strides = [1, 1]} : vector<4x16xf32> to vector<4x1xf32>
    %952 = vector.broadcast %951 : vector<4x1xf32> to vector<4x8xf32>
    %953 = arith.mulf %952, %49 : vector<4x8xf32>
    %954 = vector.extract_strided_slice %935 {offsets = [0, 6], sizes = [4, 1], strides = [1, 1]} : vector<4x16xf32> to vector<4x1xf32>
    %955 = vector.broadcast %954 : vector<4x1xf32> to vector<4x8xf32>
    %956 = arith.mulf %955, %52 : vector<4x8xf32>
    %957 = vector.extract_strided_slice %935 {offsets = [0, 7], sizes = [4, 1], strides = [1, 1]} : vector<4x16xf32> to vector<4x1xf32>
    %958 = vector.broadcast %957 : vector<4x1xf32> to vector<4x8xf32>
    %959 = arith.mulf %958, %55 : vector<4x8xf32>
    %960 = vector.extract_strided_slice %935 {offsets = [0, 8], sizes = [4, 1], strides = [1, 1]} : vector<4x16xf32> to vector<4x1xf32>
    %961 = vector.broadcast %960 : vector<4x1xf32> to vector<4x8xf32>
    %962 = arith.mulf %961, %58 : vector<4x8xf32>
    %963 = vector.extract_strided_slice %935 {offsets = [0, 9], sizes = [4, 1], strides = [1, 1]} : vector<4x16xf32> to vector<4x1xf32>
    %964 = vector.broadcast %963 : vector<4x1xf32> to vector<4x8xf32>
    %965 = arith.mulf %964, %61 : vector<4x8xf32>
    %966 = vector.extract_strided_slice %935 {offsets = [0, 10], sizes = [4, 1], strides = [1, 1]} : vector<4x16xf32> to vector<4x1xf32>
    %967 = vector.broadcast %966 : vector<4x1xf32> to vector<4x8xf32>
    %968 = arith.mulf %967, %64 : vector<4x8xf32>
    %969 = vector.extract_strided_slice %935 {offsets = [0, 11], sizes = [4, 1], strides = [1, 1]} : vector<4x16xf32> to vector<4x1xf32>
    %970 = vector.broadcast %969 : vector<4x1xf32> to vector<4x8xf32>
    %971 = arith.mulf %970, %67 : vector<4x8xf32>
    %972 = vector.extract_strided_slice %935 {offsets = [0, 12], sizes = [4, 1], strides = [1, 1]} : vector<4x16xf32> to vector<4x1xf32>
    %973 = vector.broadcast %972 : vector<4x1xf32> to vector<4x8xf32>
    %974 = arith.mulf %973, %70 : vector<4x8xf32>
    %975 = vector.extract_strided_slice %935 {offsets = [0, 13], sizes = [4, 1], strides = [1, 1]} : vector<4x16xf32> to vector<4x1xf32>
    %976 = vector.broadcast %975 : vector<4x1xf32> to vector<4x8xf32>
    %977 = arith.mulf %976, %73 : vector<4x8xf32>
    %978 = vector.extract_strided_slice %935 {offsets = [0, 14], sizes = [4, 1], strides = [1, 1]} : vector<4x16xf32> to vector<4x1xf32>
    %979 = vector.broadcast %978 : vector<4x1xf32> to vector<4x8xf32>
    %980 = arith.mulf %979, %76 : vector<4x8xf32>
    %981 = vector.extract_strided_slice %935 {offsets = [0, 15], sizes = [4, 1], strides = [1, 1]} : vector<4x16xf32> to vector<4x1xf32>
    %982 = vector.broadcast %981 : vector<4x1xf32> to vector<4x8xf32>
    %983 = arith.mulf %982, %79 : vector<4x8xf32>
    %984 = arith.addf %5, %938 : vector<4x8xf32>
    %985 = arith.addf %941, %944 : vector<4x8xf32>
    %986 = arith.addf %947, %950 : vector<4x8xf32>
    %987 = arith.addf %953, %956 : vector<4x8xf32>
    %988 = arith.addf %959, %962 : vector<4x8xf32>
    %989 = arith.addf %965, %968 : vector<4x8xf32>
    %990 = arith.addf %971, %974 : vector<4x8xf32>
    %991 = arith.addf %977, %980 : vector<4x8xf32>
    %992 = arith.addf %984, %985 : vector<4x8xf32>
    %993 = arith.addf %986, %987 : vector<4x8xf32>
    %994 = arith.addf %988, %989 : vector<4x8xf32>
    %995 = arith.addf %990, %991 : vector<4x8xf32>
    %996 = arith.addf %992, %993 : vector<4x8xf32>
    %997 = arith.addf %994, %995 : vector<4x8xf32>
    %998 = arith.addf %996, %997 : vector<4x8xf32>
    %999 = arith.addf %998, %983 : vector<4x8xf32>
    %1000 = arith.mulf %902, %999 : vector<4x8xf32>
    %1001 = arith.addf %898, %1000 : vector<4x8xf32>
    %1002 = vector.extract_strided_slice %1001 {offsets = [0, 0], sizes = [4, 1], strides = [1, 1]} : vector<4x8xf32> to vector<4x1xf32>
    %1003 = vector.broadcast %1002 : vector<4x1xf32> to vector<4x16xf32>
    %1004 = arith.mulf %1003, %10 : vector<4x16xf32>
    %1005 = vector.extract_strided_slice %1001 {offsets = [0, 1], sizes = [4, 1], strides = [1, 1]} : vector<4x8xf32> to vector<4x1xf32>
    %1006 = vector.broadcast %1005 : vector<4x1xf32> to vector<4x16xf32>
    %1007 = arith.mulf %1006, %13 : vector<4x16xf32>
    %1008 = vector.extract_strided_slice %1001 {offsets = [0, 2], sizes = [4, 1], strides = [1, 1]} : vector<4x8xf32> to vector<4x1xf32>
    %1009 = vector.broadcast %1008 : vector<4x1xf32> to vector<4x16xf32>
    %1010 = arith.mulf %1009, %16 : vector<4x16xf32>
    %1011 = vector.extract_strided_slice %1001 {offsets = [0, 3], sizes = [4, 1], strides = [1, 1]} : vector<4x8xf32> to vector<4x1xf32>
    %1012 = vector.broadcast %1011 : vector<4x1xf32> to vector<4x16xf32>
    %1013 = arith.mulf %1012, %19 : vector<4x16xf32>
    %1014 = vector.extract_strided_slice %1001 {offsets = [0, 4], sizes = [4, 1], strides = [1, 1]} : vector<4x8xf32> to vector<4x1xf32>
    %1015 = vector.broadcast %1014 : vector<4x1xf32> to vector<4x16xf32>
    %1016 = arith.mulf %1015, %22 : vector<4x16xf32>
    %1017 = vector.extract_strided_slice %1001 {offsets = [0, 5], sizes = [4, 1], strides = [1, 1]} : vector<4x8xf32> to vector<4x1xf32>
    %1018 = vector.broadcast %1017 : vector<4x1xf32> to vector<4x16xf32>
    %1019 = arith.mulf %1018, %25 : vector<4x16xf32>
    %1020 = vector.extract_strided_slice %1001 {offsets = [0, 6], sizes = [4, 1], strides = [1, 1]} : vector<4x8xf32> to vector<4x1xf32>
    %1021 = vector.broadcast %1020 : vector<4x1xf32> to vector<4x16xf32>
    %1022 = arith.mulf %1021, %28 : vector<4x16xf32>
    %1023 = vector.extract_strided_slice %1001 {offsets = [0, 7], sizes = [4, 1], strides = [1, 1]} : vector<4x8xf32> to vector<4x1xf32>
    %1024 = vector.broadcast %1023 : vector<4x1xf32> to vector<4x16xf32>
    %1025 = arith.mulf %1024, %31 : vector<4x16xf32>
    %1026 = arith.addf %2, %1004 : vector<4x16xf32>
    %1027 = arith.addf %1007, %1010 : vector<4x16xf32>
    %1028 = arith.addf %1013, %1016 : vector<4x16xf32>
    %1029 = arith.addf %1019, %1022 : vector<4x16xf32>
    %1030 = arith.addf %1026, %1027 : vector<4x16xf32>
    %1031 = arith.addf %1028, %1029 : vector<4x16xf32>
    %1032 = arith.addf %1030, %1031 : vector<4x16xf32>
    %1033 = arith.addf %1032, %1025 : vector<4x16xf32>
    %1034 = math.tanh %1033 : vector<4x16xf32>
    %1035 = vector.extract_strided_slice %1034 {offsets = [0, 0], sizes = [4, 1], strides = [1, 1]} : vector<4x16xf32> to vector<4x1xf32>
    %1036 = vector.broadcast %1035 : vector<4x1xf32> to vector<4x8xf32>
    %1037 = arith.mulf %1036, %34 : vector<4x8xf32>
    %1038 = vector.extract_strided_slice %1034 {offsets = [0, 1], sizes = [4, 1], strides = [1, 1]} : vector<4x16xf32> to vector<4x1xf32>
    %1039 = vector.broadcast %1038 : vector<4x1xf32> to vector<4x8xf32>
    %1040 = arith.mulf %1039, %37 : vector<4x8xf32>
    %1041 = vector.extract_strided_slice %1034 {offsets = [0, 2], sizes = [4, 1], strides = [1, 1]} : vector<4x16xf32> to vector<4x1xf32>
    %1042 = vector.broadcast %1041 : vector<4x1xf32> to vector<4x8xf32>
    %1043 = arith.mulf %1042, %40 : vector<4x8xf32>
    %1044 = vector.extract_strided_slice %1034 {offsets = [0, 3], sizes = [4, 1], strides = [1, 1]} : vector<4x16xf32> to vector<4x1xf32>
    %1045 = vector.broadcast %1044 : vector<4x1xf32> to vector<4x8xf32>
    %1046 = arith.mulf %1045, %43 : vector<4x8xf32>
    %1047 = vector.extract_strided_slice %1034 {offsets = [0, 4], sizes = [4, 1], strides = [1, 1]} : vector<4x16xf32> to vector<4x1xf32>
    %1048 = vector.broadcast %1047 : vector<4x1xf32> to vector<4x8xf32>
    %1049 = arith.mulf %1048, %46 : vector<4x8xf32>
    %1050 = vector.extract_strided_slice %1034 {offsets = [0, 5], sizes = [4, 1], strides = [1, 1]} : vector<4x16xf32> to vector<4x1xf32>
    %1051 = vector.broadcast %1050 : vector<4x1xf32> to vector<4x8xf32>
    %1052 = arith.mulf %1051, %49 : vector<4x8xf32>
    %1053 = vector.extract_strided_slice %1034 {offsets = [0, 6], sizes = [4, 1], strides = [1, 1]} : vector<4x16xf32> to vector<4x1xf32>
    %1054 = vector.broadcast %1053 : vector<4x1xf32> to vector<4x8xf32>
    %1055 = arith.mulf %1054, %52 : vector<4x8xf32>
    %1056 = vector.extract_strided_slice %1034 {offsets = [0, 7], sizes = [4, 1], strides = [1, 1]} : vector<4x16xf32> to vector<4x1xf32>
    %1057 = vector.broadcast %1056 : vector<4x1xf32> to vector<4x8xf32>
    %1058 = arith.mulf %1057, %55 : vector<4x8xf32>
    %1059 = vector.extract_strided_slice %1034 {offsets = [0, 8], sizes = [4, 1], strides = [1, 1]} : vector<4x16xf32> to vector<4x1xf32>
    %1060 = vector.broadcast %1059 : vector<4x1xf32> to vector<4x8xf32>
    %1061 = arith.mulf %1060, %58 : vector<4x8xf32>
    %1062 = vector.extract_strided_slice %1034 {offsets = [0, 9], sizes = [4, 1], strides = [1, 1]} : vector<4x16xf32> to vector<4x1xf32>
    %1063 = vector.broadcast %1062 : vector<4x1xf32> to vector<4x8xf32>
    %1064 = arith.mulf %1063, %61 : vector<4x8xf32>
    %1065 = vector.extract_strided_slice %1034 {offsets = [0, 10], sizes = [4, 1], strides = [1, 1]} : vector<4x16xf32> to vector<4x1xf32>
    %1066 = vector.broadcast %1065 : vector<4x1xf32> to vector<4x8xf32>
    %1067 = arith.mulf %1066, %64 : vector<4x8xf32>
    %1068 = vector.extract_strided_slice %1034 {offsets = [0, 11], sizes = [4, 1], strides = [1, 1]} : vector<4x16xf32> to vector<4x1xf32>
    %1069 = vector.broadcast %1068 : vector<4x1xf32> to vector<4x8xf32>
    %1070 = arith.mulf %1069, %67 : vector<4x8xf32>
    %1071 = vector.extract_strided_slice %1034 {offsets = [0, 12], sizes = [4, 1], strides = [1, 1]} : vector<4x16xf32> to vector<4x1xf32>
    %1072 = vector.broadcast %1071 : vector<4x1xf32> to vector<4x8xf32>
    %1073 = arith.mulf %1072, %70 : vector<4x8xf32>
    %1074 = vector.extract_strided_slice %1034 {offsets = [0, 13], sizes = [4, 1], strides = [1, 1]} : vector<4x16xf32> to vector<4x1xf32>
    %1075 = vector.broadcast %1074 : vector<4x1xf32> to vector<4x8xf32>
    %1076 = arith.mulf %1075, %73 : vector<4x8xf32>
    %1077 = vector.extract_strided_slice %1034 {offsets = [0, 14], sizes = [4, 1], strides = [1, 1]} : vector<4x16xf32> to vector<4x1xf32>
    %1078 = vector.broadcast %1077 : vector<4x1xf32> to vector<4x8xf32>
    %1079 = arith.mulf %1078, %76 : vector<4x8xf32>
    %1080 = vector.extract_strided_slice %1034 {offsets = [0, 15], sizes = [4, 1], strides = [1, 1]} : vector<4x16xf32> to vector<4x1xf32>
    %1081 = vector.broadcast %1080 : vector<4x1xf32> to vector<4x8xf32>
    %1082 = arith.mulf %1081, %79 : vector<4x8xf32>
    %1083 = arith.addf %5, %1037 : vector<4x8xf32>
    %1084 = arith.addf %1040, %1043 : vector<4x8xf32>
    %1085 = arith.addf %1046, %1049 : vector<4x8xf32>
    %1086 = arith.addf %1052, %1055 : vector<4x8xf32>
    %1087 = arith.addf %1058, %1061 : vector<4x8xf32>
    %1088 = arith.addf %1064, %1067 : vector<4x8xf32>
    %1089 = arith.addf %1070, %1073 : vector<4x8xf32>
    %1090 = arith.addf %1076, %1079 : vector<4x8xf32>
    %1091 = arith.addf %1083, %1084 : vector<4x8xf32>
    %1092 = arith.addf %1085, %1086 : vector<4x8xf32>
    %1093 = arith.addf %1087, %1088 : vector<4x8xf32>
    %1094 = arith.addf %1089, %1090 : vector<4x8xf32>
    %1095 = arith.addf %1091, %1092 : vector<4x8xf32>
    %1096 = arith.addf %1093, %1094 : vector<4x8xf32>
    %1097 = arith.addf %1095, %1096 : vector<4x8xf32>
    %1098 = arith.addf %1097, %1082 : vector<4x8xf32>
    %1099 = arith.mulf %902, %1098 : vector<4x8xf32>
    %1100 = arith.addf %898, %1099 : vector<4x8xf32>
    %1101 = vector.extract_strided_slice %1100 {offsets = [0, 0], sizes = [4, 1], strides = [1, 1]} : vector<4x8xf32> to vector<4x1xf32>
    %1102 = vector.broadcast %1101 : vector<4x1xf32> to vector<4x16xf32>
    %1103 = arith.mulf %1102, %10 : vector<4x16xf32>
    %1104 = vector.extract_strided_slice %1100 {offsets = [0, 1], sizes = [4, 1], strides = [1, 1]} : vector<4x8xf32> to vector<4x1xf32>
    %1105 = vector.broadcast %1104 : vector<4x1xf32> to vector<4x16xf32>
    %1106 = arith.mulf %1105, %13 : vector<4x16xf32>
    %1107 = vector.extract_strided_slice %1100 {offsets = [0, 2], sizes = [4, 1], strides = [1, 1]} : vector<4x8xf32> to vector<4x1xf32>
    %1108 = vector.broadcast %1107 : vector<4x1xf32> to vector<4x16xf32>
    %1109 = arith.mulf %1108, %16 : vector<4x16xf32>
    %1110 = vector.extract_strided_slice %1100 {offsets = [0, 3], sizes = [4, 1], strides = [1, 1]} : vector<4x8xf32> to vector<4x1xf32>
    %1111 = vector.broadcast %1110 : vector<4x1xf32> to vector<4x16xf32>
    %1112 = arith.mulf %1111, %19 : vector<4x16xf32>
    %1113 = vector.extract_strided_slice %1100 {offsets = [0, 4], sizes = [4, 1], strides = [1, 1]} : vector<4x8xf32> to vector<4x1xf32>
    %1114 = vector.broadcast %1113 : vector<4x1xf32> to vector<4x16xf32>
    %1115 = arith.mulf %1114, %22 : vector<4x16xf32>
    %1116 = vector.extract_strided_slice %1100 {offsets = [0, 5], sizes = [4, 1], strides = [1, 1]} : vector<4x8xf32> to vector<4x1xf32>
    %1117 = vector.broadcast %1116 : vector<4x1xf32> to vector<4x16xf32>
    %1118 = arith.mulf %1117, %25 : vector<4x16xf32>
    %1119 = vector.extract_strided_slice %1100 {offsets = [0, 6], sizes = [4, 1], strides = [1, 1]} : vector<4x8xf32> to vector<4x1xf32>
    %1120 = vector.broadcast %1119 : vector<4x1xf32> to vector<4x16xf32>
    %1121 = arith.mulf %1120, %28 : vector<4x16xf32>
    %1122 = vector.extract_strided_slice %1100 {offsets = [0, 7], sizes = [4, 1], strides = [1, 1]} : vector<4x8xf32> to vector<4x1xf32>
    %1123 = vector.broadcast %1122 : vector<4x1xf32> to vector<4x16xf32>
    %1124 = arith.mulf %1123, %31 : vector<4x16xf32>
    %1125 = arith.addf %2, %1103 : vector<4x16xf32>
    %1126 = arith.addf %1106, %1109 : vector<4x16xf32>
    %1127 = arith.addf %1112, %1115 : vector<4x16xf32>
    %1128 = arith.addf %1118, %1121 : vector<4x16xf32>
    %1129 = arith.addf %1125, %1126 : vector<4x16xf32>
    %1130 = arith.addf %1127, %1128 : vector<4x16xf32>
    %1131 = arith.addf %1129, %1130 : vector<4x16xf32>
    %1132 = arith.addf %1131, %1124 : vector<4x16xf32>
    %1133 = math.tanh %1132 : vector<4x16xf32>
    %1134 = vector.extract_strided_slice %1133 {offsets = [0, 0], sizes = [4, 1], strides = [1, 1]} : vector<4x16xf32> to vector<4x1xf32>
    %1135 = vector.broadcast %1134 : vector<4x1xf32> to vector<4x8xf32>
    %1136 = arith.mulf %1135, %34 : vector<4x8xf32>
    %1137 = vector.extract_strided_slice %1133 {offsets = [0, 1], sizes = [4, 1], strides = [1, 1]} : vector<4x16xf32> to vector<4x1xf32>
    %1138 = vector.broadcast %1137 : vector<4x1xf32> to vector<4x8xf32>
    %1139 = arith.mulf %1138, %37 : vector<4x8xf32>
    %1140 = vector.extract_strided_slice %1133 {offsets = [0, 2], sizes = [4, 1], strides = [1, 1]} : vector<4x16xf32> to vector<4x1xf32>
    %1141 = vector.broadcast %1140 : vector<4x1xf32> to vector<4x8xf32>
    %1142 = arith.mulf %1141, %40 : vector<4x8xf32>
    %1143 = vector.extract_strided_slice %1133 {offsets = [0, 3], sizes = [4, 1], strides = [1, 1]} : vector<4x16xf32> to vector<4x1xf32>
    %1144 = vector.broadcast %1143 : vector<4x1xf32> to vector<4x8xf32>
    %1145 = arith.mulf %1144, %43 : vector<4x8xf32>
    %1146 = vector.extract_strided_slice %1133 {offsets = [0, 4], sizes = [4, 1], strides = [1, 1]} : vector<4x16xf32> to vector<4x1xf32>
    %1147 = vector.broadcast %1146 : vector<4x1xf32> to vector<4x8xf32>
    %1148 = arith.mulf %1147, %46 : vector<4x8xf32>
    %1149 = vector.extract_strided_slice %1133 {offsets = [0, 5], sizes = [4, 1], strides = [1, 1]} : vector<4x16xf32> to vector<4x1xf32>
    %1150 = vector.broadcast %1149 : vector<4x1xf32> to vector<4x8xf32>
    %1151 = arith.mulf %1150, %49 : vector<4x8xf32>
    %1152 = vector.extract_strided_slice %1133 {offsets = [0, 6], sizes = [4, 1], strides = [1, 1]} : vector<4x16xf32> to vector<4x1xf32>
    %1153 = vector.broadcast %1152 : vector<4x1xf32> to vector<4x8xf32>
    %1154 = arith.mulf %1153, %52 : vector<4x8xf32>
    %1155 = vector.extract_strided_slice %1133 {offsets = [0, 7], sizes = [4, 1], strides = [1, 1]} : vector<4x16xf32> to vector<4x1xf32>
    %1156 = vector.broadcast %1155 : vector<4x1xf32> to vector<4x8xf32>
    %1157 = arith.mulf %1156, %55 : vector<4x8xf32>
    %1158 = vector.extract_strided_slice %1133 {offsets = [0, 8], sizes = [4, 1], strides = [1, 1]} : vector<4x16xf32> to vector<4x1xf32>
    %1159 = vector.broadcast %1158 : vector<4x1xf32> to vector<4x8xf32>
    %1160 = arith.mulf %1159, %58 : vector<4x8xf32>
    %1161 = vector.extract_strided_slice %1133 {offsets = [0, 9], sizes = [4, 1], strides = [1, 1]} : vector<4x16xf32> to vector<4x1xf32>
    %1162 = vector.broadcast %1161 : vector<4x1xf32> to vector<4x8xf32>
    %1163 = arith.mulf %1162, %61 : vector<4x8xf32>
    %1164 = vector.extract_strided_slice %1133 {offsets = [0, 10], sizes = [4, 1], strides = [1, 1]} : vector<4x16xf32> to vector<4x1xf32>
    %1165 = vector.broadcast %1164 : vector<4x1xf32> to vector<4x8xf32>
    %1166 = arith.mulf %1165, %64 : vector<4x8xf32>
    %1167 = vector.extract_strided_slice %1133 {offsets = [0, 11], sizes = [4, 1], strides = [1, 1]} : vector<4x16xf32> to vector<4x1xf32>
    %1168 = vector.broadcast %1167 : vector<4x1xf32> to vector<4x8xf32>
    %1169 = arith.mulf %1168, %67 : vector<4x8xf32>
    %1170 = vector.extract_strided_slice %1133 {offsets = [0, 12], sizes = [4, 1], strides = [1, 1]} : vector<4x16xf32> to vector<4x1xf32>
    %1171 = vector.broadcast %1170 : vector<4x1xf32> to vector<4x8xf32>
    %1172 = arith.mulf %1171, %70 : vector<4x8xf32>
    %1173 = vector.extract_strided_slice %1133 {offsets = [0, 13], sizes = [4, 1], strides = [1, 1]} : vector<4x16xf32> to vector<4x1xf32>
    %1174 = vector.broadcast %1173 : vector<4x1xf32> to vector<4x8xf32>
    %1175 = arith.mulf %1174, %73 : vector<4x8xf32>
    %1176 = vector.extract_strided_slice %1133 {offsets = [0, 14], sizes = [4, 1], strides = [1, 1]} : vector<4x16xf32> to vector<4x1xf32>
    %1177 = vector.broadcast %1176 : vector<4x1xf32> to vector<4x8xf32>
    %1178 = arith.mulf %1177, %76 : vector<4x8xf32>
    %1179 = vector.extract_strided_slice %1133 {offsets = [0, 15], sizes = [4, 1], strides = [1, 1]} : vector<4x16xf32> to vector<4x1xf32>
    %1180 = vector.broadcast %1179 : vector<4x1xf32> to vector<4x8xf32>
    %1181 = arith.mulf %1180, %79 : vector<4x8xf32>
    %1182 = arith.addf %5, %1136 : vector<4x8xf32>
    %1183 = arith.addf %1139, %1142 : vector<4x8xf32>
    %1184 = arith.addf %1145, %1148 : vector<4x8xf32>
    %1185 = arith.addf %1151, %1154 : vector<4x8xf32>
    %1186 = arith.addf %1157, %1160 : vector<4x8xf32>
    %1187 = arith.addf %1163, %1166 : vector<4x8xf32>
    %1188 = arith.addf %1169, %1172 : vector<4x8xf32>
    %1189 = arith.addf %1175, %1178 : vector<4x8xf32>
    %1190 = arith.addf %1182, %1183 : vector<4x8xf32>
    %1191 = arith.addf %1184, %1185 : vector<4x8xf32>
    %1192 = arith.addf %1186, %1187 : vector<4x8xf32>
    %1193 = arith.addf %1188, %1189 : vector<4x8xf32>
    %1194 = arith.addf %1190, %1191 : vector<4x8xf32>
    %1195 = arith.addf %1192, %1193 : vector<4x8xf32>
    %1196 = arith.addf %1194, %1195 : vector<4x8xf32>
    %1197 = arith.addf %1196, %1181 : vector<4x8xf32>
    %1198 = vector.broadcast %899 : f32 to vector<4x8xf32>
    %1199 = arith.mulf %1198, %1197 : vector<4x8xf32>
    %1200 = arith.addf %898, %1199 : vector<4x8xf32>
    %1201 = vector.extract_strided_slice %1200 {offsets = [0, 0], sizes = [4, 1], strides = [1, 1]} : vector<4x8xf32> to vector<4x1xf32>
    %1202 = vector.broadcast %1201 : vector<4x1xf32> to vector<4x16xf32>
    %1203 = arith.mulf %1202, %10 : vector<4x16xf32>
    %1204 = vector.extract_strided_slice %1200 {offsets = [0, 1], sizes = [4, 1], strides = [1, 1]} : vector<4x8xf32> to vector<4x1xf32>
    %1205 = vector.broadcast %1204 : vector<4x1xf32> to vector<4x16xf32>
    %1206 = arith.mulf %1205, %13 : vector<4x16xf32>
    %1207 = vector.extract_strided_slice %1200 {offsets = [0, 2], sizes = [4, 1], strides = [1, 1]} : vector<4x8xf32> to vector<4x1xf32>
    %1208 = vector.broadcast %1207 : vector<4x1xf32> to vector<4x16xf32>
    %1209 = arith.mulf %1208, %16 : vector<4x16xf32>
    %1210 = vector.extract_strided_slice %1200 {offsets = [0, 3], sizes = [4, 1], strides = [1, 1]} : vector<4x8xf32> to vector<4x1xf32>
    %1211 = vector.broadcast %1210 : vector<4x1xf32> to vector<4x16xf32>
    %1212 = arith.mulf %1211, %19 : vector<4x16xf32>
    %1213 = vector.extract_strided_slice %1200 {offsets = [0, 4], sizes = [4, 1], strides = [1, 1]} : vector<4x8xf32> to vector<4x1xf32>
    %1214 = vector.broadcast %1213 : vector<4x1xf32> to vector<4x16xf32>
    %1215 = arith.mulf %1214, %22 : vector<4x16xf32>
    %1216 = vector.extract_strided_slice %1200 {offsets = [0, 5], sizes = [4, 1], strides = [1, 1]} : vector<4x8xf32> to vector<4x1xf32>
    %1217 = vector.broadcast %1216 : vector<4x1xf32> to vector<4x16xf32>
    %1218 = arith.mulf %1217, %25 : vector<4x16xf32>
    %1219 = vector.extract_strided_slice %1200 {offsets = [0, 6], sizes = [4, 1], strides = [1, 1]} : vector<4x8xf32> to vector<4x1xf32>
    %1220 = vector.broadcast %1219 : vector<4x1xf32> to vector<4x16xf32>
    %1221 = arith.mulf %1220, %28 : vector<4x16xf32>
    %1222 = vector.extract_strided_slice %1200 {offsets = [0, 7], sizes = [4, 1], strides = [1, 1]} : vector<4x8xf32> to vector<4x1xf32>
    %1223 = vector.broadcast %1222 : vector<4x1xf32> to vector<4x16xf32>
    %1224 = arith.mulf %1223, %31 : vector<4x16xf32>
    %1225 = arith.addf %2, %1203 : vector<4x16xf32>
    %1226 = arith.addf %1206, %1209 : vector<4x16xf32>
    %1227 = arith.addf %1212, %1215 : vector<4x16xf32>
    %1228 = arith.addf %1218, %1221 : vector<4x16xf32>
    %1229 = arith.addf %1225, %1226 : vector<4x16xf32>
    %1230 = arith.addf %1227, %1228 : vector<4x16xf32>
    %1231 = arith.addf %1229, %1230 : vector<4x16xf32>
    %1232 = arith.addf %1231, %1224 : vector<4x16xf32>
    %1233 = math.tanh %1232 : vector<4x16xf32>
    %1234 = vector.extract_strided_slice %1233 {offsets = [0, 0], sizes = [4, 1], strides = [1, 1]} : vector<4x16xf32> to vector<4x1xf32>
    %1235 = vector.broadcast %1234 : vector<4x1xf32> to vector<4x8xf32>
    %1236 = arith.mulf %1235, %34 : vector<4x8xf32>
    %1237 = vector.extract_strided_slice %1233 {offsets = [0, 1], sizes = [4, 1], strides = [1, 1]} : vector<4x16xf32> to vector<4x1xf32>
    %1238 = vector.broadcast %1237 : vector<4x1xf32> to vector<4x8xf32>
    %1239 = arith.mulf %1238, %37 : vector<4x8xf32>
    %1240 = vector.extract_strided_slice %1233 {offsets = [0, 2], sizes = [4, 1], strides = [1, 1]} : vector<4x16xf32> to vector<4x1xf32>
    %1241 = vector.broadcast %1240 : vector<4x1xf32> to vector<4x8xf32>
    %1242 = arith.mulf %1241, %40 : vector<4x8xf32>
    %1243 = vector.extract_strided_slice %1233 {offsets = [0, 3], sizes = [4, 1], strides = [1, 1]} : vector<4x16xf32> to vector<4x1xf32>
    %1244 = vector.broadcast %1243 : vector<4x1xf32> to vector<4x8xf32>
    %1245 = arith.mulf %1244, %43 : vector<4x8xf32>
    %1246 = vector.extract_strided_slice %1233 {offsets = [0, 4], sizes = [4, 1], strides = [1, 1]} : vector<4x16xf32> to vector<4x1xf32>
    %1247 = vector.broadcast %1246 : vector<4x1xf32> to vector<4x8xf32>
    %1248 = arith.mulf %1247, %46 : vector<4x8xf32>
    %1249 = vector.extract_strided_slice %1233 {offsets = [0, 5], sizes = [4, 1], strides = [1, 1]} : vector<4x16xf32> to vector<4x1xf32>
    %1250 = vector.broadcast %1249 : vector<4x1xf32> to vector<4x8xf32>
    %1251 = arith.mulf %1250, %49 : vector<4x8xf32>
    %1252 = vector.extract_strided_slice %1233 {offsets = [0, 6], sizes = [4, 1], strides = [1, 1]} : vector<4x16xf32> to vector<4x1xf32>
    %1253 = vector.broadcast %1252 : vector<4x1xf32> to vector<4x8xf32>
    %1254 = arith.mulf %1253, %52 : vector<4x8xf32>
    %1255 = vector.extract_strided_slice %1233 {offsets = [0, 7], sizes = [4, 1], strides = [1, 1]} : vector<4x16xf32> to vector<4x1xf32>
    %1256 = vector.broadcast %1255 : vector<4x1xf32> to vector<4x8xf32>
    %1257 = arith.mulf %1256, %55 : vector<4x8xf32>
    %1258 = vector.extract_strided_slice %1233 {offsets = [0, 8], sizes = [4, 1], strides = [1, 1]} : vector<4x16xf32> to vector<4x1xf32>
    %1259 = vector.broadcast %1258 : vector<4x1xf32> to vector<4x8xf32>
    %1260 = arith.mulf %1259, %58 : vector<4x8xf32>
    %1261 = vector.extract_strided_slice %1233 {offsets = [0, 9], sizes = [4, 1], strides = [1, 1]} : vector<4x16xf32> to vector<4x1xf32>
    %1262 = vector.broadcast %1261 : vector<4x1xf32> to vector<4x8xf32>
    %1263 = arith.mulf %1262, %61 : vector<4x8xf32>
    %1264 = vector.extract_strided_slice %1233 {offsets = [0, 10], sizes = [4, 1], strides = [1, 1]} : vector<4x16xf32> to vector<4x1xf32>
    %1265 = vector.broadcast %1264 : vector<4x1xf32> to vector<4x8xf32>
    %1266 = arith.mulf %1265, %64 : vector<4x8xf32>
    %1267 = vector.extract_strided_slice %1233 {offsets = [0, 11], sizes = [4, 1], strides = [1, 1]} : vector<4x16xf32> to vector<4x1xf32>
    %1268 = vector.broadcast %1267 : vector<4x1xf32> to vector<4x8xf32>
    %1269 = arith.mulf %1268, %67 : vector<4x8xf32>
    %1270 = vector.extract_strided_slice %1233 {offsets = [0, 12], sizes = [4, 1], strides = [1, 1]} : vector<4x16xf32> to vector<4x1xf32>
    %1271 = vector.broadcast %1270 : vector<4x1xf32> to vector<4x8xf32>
    %1272 = arith.mulf %1271, %70 : vector<4x8xf32>
    %1273 = vector.extract_strided_slice %1233 {offsets = [0, 13], sizes = [4, 1], strides = [1, 1]} : vector<4x16xf32> to vector<4x1xf32>
    %1274 = vector.broadcast %1273 : vector<4x1xf32> to vector<4x8xf32>
    %1275 = arith.mulf %1274, %73 : vector<4x8xf32>
    %1276 = vector.extract_strided_slice %1233 {offsets = [0, 14], sizes = [4, 1], strides = [1, 1]} : vector<4x16xf32> to vector<4x1xf32>
    %1277 = vector.broadcast %1276 : vector<4x1xf32> to vector<4x8xf32>
    %1278 = arith.mulf %1277, %76 : vector<4x8xf32>
    %1279 = vector.extract_strided_slice %1233 {offsets = [0, 15], sizes = [4, 1], strides = [1, 1]} : vector<4x16xf32> to vector<4x1xf32>
    %1280 = vector.broadcast %1279 : vector<4x1xf32> to vector<4x8xf32>
    %1281 = arith.mulf %1280, %79 : vector<4x8xf32>
    %1282 = arith.addf %5, %1236 : vector<4x8xf32>
    %1283 = arith.addf %1239, %1242 : vector<4x8xf32>
    %1284 = arith.addf %1245, %1248 : vector<4x8xf32>
    %1285 = arith.addf %1251, %1254 : vector<4x8xf32>
    %1286 = arith.addf %1257, %1260 : vector<4x8xf32>
    %1287 = arith.addf %1263, %1266 : vector<4x8xf32>
    %1288 = arith.addf %1269, %1272 : vector<4x8xf32>
    %1289 = arith.addf %1275, %1278 : vector<4x8xf32>
    %1290 = arith.addf %1282, %1283 : vector<4x8xf32>
    %1291 = arith.addf %1284, %1285 : vector<4x8xf32>
    %1292 = arith.addf %1286, %1287 : vector<4x8xf32>
    %1293 = arith.addf %1288, %1289 : vector<4x8xf32>
    %1294 = arith.addf %1290, %1291 : vector<4x8xf32>
    %1295 = arith.addf %1292, %1293 : vector<4x8xf32>
    %1296 = arith.addf %1294, %1295 : vector<4x8xf32>
    %1297 = arith.addf %1296, %1281 : vector<4x8xf32>
    %cst_19 = arith.constant 2.000000e+00 : f32
    %1298 = vector.broadcast %cst_19 : f32 to vector<4x8xf32>
    %1299 = arith.mulf %1298, %1098 : vector<4x8xf32>
    %1300 = arith.addf %999, %1299 : vector<4x8xf32>
    %cst_20 = arith.constant 2.000000e+00 : f32
    %1301 = vector.broadcast %cst_20 : f32 to vector<4x8xf32>
    %1302 = arith.mulf %1301, %1197 : vector<4x8xf32>
    %1303 = arith.addf %1300, %1302 : vector<4x8xf32>
    %1304 = arith.addf %1303, %1297 : vector<4x8xf32>
    %1305 = vector.broadcast %900 : f32 to vector<4x8xf32>
    %1306 = arith.mulf %1305, %1304 : vector<4x8xf32>
    %1307 = arith.addf %898, %1306 : vector<4x8xf32>
    %c3 = arith.constant 3 : index
    %1308 = memref.load %arg0[%c3] : memref<4xf32, #tpu.memory_space<smem>>
    %c3_21 = arith.constant 3 : index
    %1309 = memref.load %arg2[%c3_21] : memref<4xf32, #tpu.memory_space<smem>>
    %c3_22 = arith.constant 3 : index
    %1310 = memref.load %arg1[%c3_22] : memref<4xf32, #tpu.memory_space<smem>>
    %1311 = vector.broadcast %1310 : f32 to vector<4x8xf32>
    %1312 = vector.extract_strided_slice %1307 {offsets = [0, 0], sizes = [4, 1], strides = [1, 1]} : vector<4x8xf32> to vector<4x1xf32>
    %1313 = vector.broadcast %1312 : vector<4x1xf32> to vector<4x16xf32>
    %1314 = arith.mulf %1313, %10 : vector<4x16xf32>
    %1315 = vector.extract_strided_slice %1307 {offsets = [0, 1], sizes = [4, 1], strides = [1, 1]} : vector<4x8xf32> to vector<4x1xf32>
    %1316 = vector.broadcast %1315 : vector<4x1xf32> to vector<4x16xf32>
    %1317 = arith.mulf %1316, %13 : vector<4x16xf32>
    %1318 = vector.extract_strided_slice %1307 {offsets = [0, 2], sizes = [4, 1], strides = [1, 1]} : vector<4x8xf32> to vector<4x1xf32>
    %1319 = vector.broadcast %1318 : vector<4x1xf32> to vector<4x16xf32>
    %1320 = arith.mulf %1319, %16 : vector<4x16xf32>
    %1321 = vector.extract_strided_slice %1307 {offsets = [0, 3], sizes = [4, 1], strides = [1, 1]} : vector<4x8xf32> to vector<4x1xf32>
    %1322 = vector.broadcast %1321 : vector<4x1xf32> to vector<4x16xf32>
    %1323 = arith.mulf %1322, %19 : vector<4x16xf32>
    %1324 = vector.extract_strided_slice %1307 {offsets = [0, 4], sizes = [4, 1], strides = [1, 1]} : vector<4x8xf32> to vector<4x1xf32>
    %1325 = vector.broadcast %1324 : vector<4x1xf32> to vector<4x16xf32>
    %1326 = arith.mulf %1325, %22 : vector<4x16xf32>
    %1327 = vector.extract_strided_slice %1307 {offsets = [0, 5], sizes = [4, 1], strides = [1, 1]} : vector<4x8xf32> to vector<4x1xf32>
    %1328 = vector.broadcast %1327 : vector<4x1xf32> to vector<4x16xf32>
    %1329 = arith.mulf %1328, %25 : vector<4x16xf32>
    %1330 = vector.extract_strided_slice %1307 {offsets = [0, 6], sizes = [4, 1], strides = [1, 1]} : vector<4x8xf32> to vector<4x1xf32>
    %1331 = vector.broadcast %1330 : vector<4x1xf32> to vector<4x16xf32>
    %1332 = arith.mulf %1331, %28 : vector<4x16xf32>
    %1333 = vector.extract_strided_slice %1307 {offsets = [0, 7], sizes = [4, 1], strides = [1, 1]} : vector<4x8xf32> to vector<4x1xf32>
    %1334 = vector.broadcast %1333 : vector<4x1xf32> to vector<4x16xf32>
    %1335 = arith.mulf %1334, %31 : vector<4x16xf32>
    %1336 = arith.addf %2, %1314 : vector<4x16xf32>
    %1337 = arith.addf %1317, %1320 : vector<4x16xf32>
    %1338 = arith.addf %1323, %1326 : vector<4x16xf32>
    %1339 = arith.addf %1329, %1332 : vector<4x16xf32>
    %1340 = arith.addf %1336, %1337 : vector<4x16xf32>
    %1341 = arith.addf %1338, %1339 : vector<4x16xf32>
    %1342 = arith.addf %1340, %1341 : vector<4x16xf32>
    %1343 = arith.addf %1342, %1335 : vector<4x16xf32>
    %1344 = math.tanh %1343 : vector<4x16xf32>
    %1345 = vector.extract_strided_slice %1344 {offsets = [0, 0], sizes = [4, 1], strides = [1, 1]} : vector<4x16xf32> to vector<4x1xf32>
    %1346 = vector.broadcast %1345 : vector<4x1xf32> to vector<4x8xf32>
    %1347 = arith.mulf %1346, %34 : vector<4x8xf32>
    %1348 = vector.extract_strided_slice %1344 {offsets = [0, 1], sizes = [4, 1], strides = [1, 1]} : vector<4x16xf32> to vector<4x1xf32>
    %1349 = vector.broadcast %1348 : vector<4x1xf32> to vector<4x8xf32>
    %1350 = arith.mulf %1349, %37 : vector<4x8xf32>
    %1351 = vector.extract_strided_slice %1344 {offsets = [0, 2], sizes = [4, 1], strides = [1, 1]} : vector<4x16xf32> to vector<4x1xf32>
    %1352 = vector.broadcast %1351 : vector<4x1xf32> to vector<4x8xf32>
    %1353 = arith.mulf %1352, %40 : vector<4x8xf32>
    %1354 = vector.extract_strided_slice %1344 {offsets = [0, 3], sizes = [4, 1], strides = [1, 1]} : vector<4x16xf32> to vector<4x1xf32>
    %1355 = vector.broadcast %1354 : vector<4x1xf32> to vector<4x8xf32>
    %1356 = arith.mulf %1355, %43 : vector<4x8xf32>
    %1357 = vector.extract_strided_slice %1344 {offsets = [0, 4], sizes = [4, 1], strides = [1, 1]} : vector<4x16xf32> to vector<4x1xf32>
    %1358 = vector.broadcast %1357 : vector<4x1xf32> to vector<4x8xf32>
    %1359 = arith.mulf %1358, %46 : vector<4x8xf32>
    %1360 = vector.extract_strided_slice %1344 {offsets = [0, 5], sizes = [4, 1], strides = [1, 1]} : vector<4x16xf32> to vector<4x1xf32>
    %1361 = vector.broadcast %1360 : vector<4x1xf32> to vector<4x8xf32>
    %1362 = arith.mulf %1361, %49 : vector<4x8xf32>
    %1363 = vector.extract_strided_slice %1344 {offsets = [0, 6], sizes = [4, 1], strides = [1, 1]} : vector<4x16xf32> to vector<4x1xf32>
    %1364 = vector.broadcast %1363 : vector<4x1xf32> to vector<4x8xf32>
    %1365 = arith.mulf %1364, %52 : vector<4x8xf32>
    %1366 = vector.extract_strided_slice %1344 {offsets = [0, 7], sizes = [4, 1], strides = [1, 1]} : vector<4x16xf32> to vector<4x1xf32>
    %1367 = vector.broadcast %1366 : vector<4x1xf32> to vector<4x8xf32>
    %1368 = arith.mulf %1367, %55 : vector<4x8xf32>
    %1369 = vector.extract_strided_slice %1344 {offsets = [0, 8], sizes = [4, 1], strides = [1, 1]} : vector<4x16xf32> to vector<4x1xf32>
    %1370 = vector.broadcast %1369 : vector<4x1xf32> to vector<4x8xf32>
    %1371 = arith.mulf %1370, %58 : vector<4x8xf32>
    %1372 = vector.extract_strided_slice %1344 {offsets = [0, 9], sizes = [4, 1], strides = [1, 1]} : vector<4x16xf32> to vector<4x1xf32>
    %1373 = vector.broadcast %1372 : vector<4x1xf32> to vector<4x8xf32>
    %1374 = arith.mulf %1373, %61 : vector<4x8xf32>
    %1375 = vector.extract_strided_slice %1344 {offsets = [0, 10], sizes = [4, 1], strides = [1, 1]} : vector<4x16xf32> to vector<4x1xf32>
    %1376 = vector.broadcast %1375 : vector<4x1xf32> to vector<4x8xf32>
    %1377 = arith.mulf %1376, %64 : vector<4x8xf32>
    %1378 = vector.extract_strided_slice %1344 {offsets = [0, 11], sizes = [4, 1], strides = [1, 1]} : vector<4x16xf32> to vector<4x1xf32>
    %1379 = vector.broadcast %1378 : vector<4x1xf32> to vector<4x8xf32>
    %1380 = arith.mulf %1379, %67 : vector<4x8xf32>
    %1381 = vector.extract_strided_slice %1344 {offsets = [0, 12], sizes = [4, 1], strides = [1, 1]} : vector<4x16xf32> to vector<4x1xf32>
    %1382 = vector.broadcast %1381 : vector<4x1xf32> to vector<4x8xf32>
    %1383 = arith.mulf %1382, %70 : vector<4x8xf32>
    %1384 = vector.extract_strided_slice %1344 {offsets = [0, 13], sizes = [4, 1], strides = [1, 1]} : vector<4x16xf32> to vector<4x1xf32>
    %1385 = vector.broadcast %1384 : vector<4x1xf32> to vector<4x8xf32>
    %1386 = arith.mulf %1385, %73 : vector<4x8xf32>
    %1387 = vector.extract_strided_slice %1344 {offsets = [0, 14], sizes = [4, 1], strides = [1, 1]} : vector<4x16xf32> to vector<4x1xf32>
    %1388 = vector.broadcast %1387 : vector<4x1xf32> to vector<4x8xf32>
    %1389 = arith.mulf %1388, %76 : vector<4x8xf32>
    %1390 = vector.extract_strided_slice %1344 {offsets = [0, 15], sizes = [4, 1], strides = [1, 1]} : vector<4x16xf32> to vector<4x1xf32>
    %1391 = vector.broadcast %1390 : vector<4x1xf32> to vector<4x8xf32>
    %1392 = arith.mulf %1391, %79 : vector<4x8xf32>
    %1393 = arith.addf %5, %1347 : vector<4x8xf32>
    %1394 = arith.addf %1350, %1353 : vector<4x8xf32>
    %1395 = arith.addf %1356, %1359 : vector<4x8xf32>
    %1396 = arith.addf %1362, %1365 : vector<4x8xf32>
    %1397 = arith.addf %1368, %1371 : vector<4x8xf32>
    %1398 = arith.addf %1374, %1377 : vector<4x8xf32>
    %1399 = arith.addf %1380, %1383 : vector<4x8xf32>
    %1400 = arith.addf %1386, %1389 : vector<4x8xf32>
    %1401 = arith.addf %1393, %1394 : vector<4x8xf32>
    %1402 = arith.addf %1395, %1396 : vector<4x8xf32>
    %1403 = arith.addf %1397, %1398 : vector<4x8xf32>
    %1404 = arith.addf %1399, %1400 : vector<4x8xf32>
    %1405 = arith.addf %1401, %1402 : vector<4x8xf32>
    %1406 = arith.addf %1403, %1404 : vector<4x8xf32>
    %1407 = arith.addf %1405, %1406 : vector<4x8xf32>
    %1408 = arith.addf %1407, %1392 : vector<4x8xf32>
    %1409 = arith.mulf %1311, %1408 : vector<4x8xf32>
    %1410 = arith.addf %1307, %1409 : vector<4x8xf32>
    %1411 = vector.extract_strided_slice %1410 {offsets = [0, 0], sizes = [4, 1], strides = [1, 1]} : vector<4x8xf32> to vector<4x1xf32>
    %1412 = vector.broadcast %1411 : vector<4x1xf32> to vector<4x16xf32>
    %1413 = arith.mulf %1412, %10 : vector<4x16xf32>
    %1414 = vector.extract_strided_slice %1410 {offsets = [0, 1], sizes = [4, 1], strides = [1, 1]} : vector<4x8xf32> to vector<4x1xf32>
    %1415 = vector.broadcast %1414 : vector<4x1xf32> to vector<4x16xf32>
    %1416 = arith.mulf %1415, %13 : vector<4x16xf32>
    %1417 = vector.extract_strided_slice %1410 {offsets = [0, 2], sizes = [4, 1], strides = [1, 1]} : vector<4x8xf32> to vector<4x1xf32>
    %1418 = vector.broadcast %1417 : vector<4x1xf32> to vector<4x16xf32>
    %1419 = arith.mulf %1418, %16 : vector<4x16xf32>
    %1420 = vector.extract_strided_slice %1410 {offsets = [0, 3], sizes = [4, 1], strides = [1, 1]} : vector<4x8xf32> to vector<4x1xf32>
    %1421 = vector.broadcast %1420 : vector<4x1xf32> to vector<4x16xf32>
    %1422 = arith.mulf %1421, %19 : vector<4x16xf32>
    %1423 = vector.extract_strided_slice %1410 {offsets = [0, 4], sizes = [4, 1], strides = [1, 1]} : vector<4x8xf32> to vector<4x1xf32>
    %1424 = vector.broadcast %1423 : vector<4x1xf32> to vector<4x16xf32>
    %1425 = arith.mulf %1424, %22 : vector<4x16xf32>
    %1426 = vector.extract_strided_slice %1410 {offsets = [0, 5], sizes = [4, 1], strides = [1, 1]} : vector<4x8xf32> to vector<4x1xf32>
    %1427 = vector.broadcast %1426 : vector<4x1xf32> to vector<4x16xf32>
    %1428 = arith.mulf %1427, %25 : vector<4x16xf32>
    %1429 = vector.extract_strided_slice %1410 {offsets = [0, 6], sizes = [4, 1], strides = [1, 1]} : vector<4x8xf32> to vector<4x1xf32>
    %1430 = vector.broadcast %1429 : vector<4x1xf32> to vector<4x16xf32>
    %1431 = arith.mulf %1430, %28 : vector<4x16xf32>
    %1432 = vector.extract_strided_slice %1410 {offsets = [0, 7], sizes = [4, 1], strides = [1, 1]} : vector<4x8xf32> to vector<4x1xf32>
    %1433 = vector.broadcast %1432 : vector<4x1xf32> to vector<4x16xf32>
    %1434 = arith.mulf %1433, %31 : vector<4x16xf32>
    %1435 = arith.addf %2, %1413 : vector<4x16xf32>
    %1436 = arith.addf %1416, %1419 : vector<4x16xf32>
    %1437 = arith.addf %1422, %1425 : vector<4x16xf32>
    %1438 = arith.addf %1428, %1431 : vector<4x16xf32>
    %1439 = arith.addf %1435, %1436 : vector<4x16xf32>
    %1440 = arith.addf %1437, %1438 : vector<4x16xf32>
    %1441 = arith.addf %1439, %1440 : vector<4x16xf32>
    %1442 = arith.addf %1441, %1434 : vector<4x16xf32>
    %1443 = math.tanh %1442 : vector<4x16xf32>
    %1444 = vector.extract_strided_slice %1443 {offsets = [0, 0], sizes = [4, 1], strides = [1, 1]} : vector<4x16xf32> to vector<4x1xf32>
    %1445 = vector.broadcast %1444 : vector<4x1xf32> to vector<4x8xf32>
    %1446 = arith.mulf %1445, %34 : vector<4x8xf32>
    %1447 = vector.extract_strided_slice %1443 {offsets = [0, 1], sizes = [4, 1], strides = [1, 1]} : vector<4x16xf32> to vector<4x1xf32>
    %1448 = vector.broadcast %1447 : vector<4x1xf32> to vector<4x8xf32>
    %1449 = arith.mulf %1448, %37 : vector<4x8xf32>
    %1450 = vector.extract_strided_slice %1443 {offsets = [0, 2], sizes = [4, 1], strides = [1, 1]} : vector<4x16xf32> to vector<4x1xf32>
    %1451 = vector.broadcast %1450 : vector<4x1xf32> to vector<4x8xf32>
    %1452 = arith.mulf %1451, %40 : vector<4x8xf32>
    %1453 = vector.extract_strided_slice %1443 {offsets = [0, 3], sizes = [4, 1], strides = [1, 1]} : vector<4x16xf32> to vector<4x1xf32>
    %1454 = vector.broadcast %1453 : vector<4x1xf32> to vector<4x8xf32>
    %1455 = arith.mulf %1454, %43 : vector<4x8xf32>
    %1456 = vector.extract_strided_slice %1443 {offsets = [0, 4], sizes = [4, 1], strides = [1, 1]} : vector<4x16xf32> to vector<4x1xf32>
    %1457 = vector.broadcast %1456 : vector<4x1xf32> to vector<4x8xf32>
    %1458 = arith.mulf %1457, %46 : vector<4x8xf32>
    %1459 = vector.extract_strided_slice %1443 {offsets = [0, 5], sizes = [4, 1], strides = [1, 1]} : vector<4x16xf32> to vector<4x1xf32>
    %1460 = vector.broadcast %1459 : vector<4x1xf32> to vector<4x8xf32>
    %1461 = arith.mulf %1460, %49 : vector<4x8xf32>
    %1462 = vector.extract_strided_slice %1443 {offsets = [0, 6], sizes = [4, 1], strides = [1, 1]} : vector<4x16xf32> to vector<4x1xf32>
    %1463 = vector.broadcast %1462 : vector<4x1xf32> to vector<4x8xf32>
    %1464 = arith.mulf %1463, %52 : vector<4x8xf32>
    %1465 = vector.extract_strided_slice %1443 {offsets = [0, 7], sizes = [4, 1], strides = [1, 1]} : vector<4x16xf32> to vector<4x1xf32>
    %1466 = vector.broadcast %1465 : vector<4x1xf32> to vector<4x8xf32>
    %1467 = arith.mulf %1466, %55 : vector<4x8xf32>
    %1468 = vector.extract_strided_slice %1443 {offsets = [0, 8], sizes = [4, 1], strides = [1, 1]} : vector<4x16xf32> to vector<4x1xf32>
    %1469 = vector.broadcast %1468 : vector<4x1xf32> to vector<4x8xf32>
    %1470 = arith.mulf %1469, %58 : vector<4x8xf32>
    %1471 = vector.extract_strided_slice %1443 {offsets = [0, 9], sizes = [4, 1], strides = [1, 1]} : vector<4x16xf32> to vector<4x1xf32>
    %1472 = vector.broadcast %1471 : vector<4x1xf32> to vector<4x8xf32>
    %1473 = arith.mulf %1472, %61 : vector<4x8xf32>
    %1474 = vector.extract_strided_slice %1443 {offsets = [0, 10], sizes = [4, 1], strides = [1, 1]} : vector<4x16xf32> to vector<4x1xf32>
    %1475 = vector.broadcast %1474 : vector<4x1xf32> to vector<4x8xf32>
    %1476 = arith.mulf %1475, %64 : vector<4x8xf32>
    %1477 = vector.extract_strided_slice %1443 {offsets = [0, 11], sizes = [4, 1], strides = [1, 1]} : vector<4x16xf32> to vector<4x1xf32>
    %1478 = vector.broadcast %1477 : vector<4x1xf32> to vector<4x8xf32>
    %1479 = arith.mulf %1478, %67 : vector<4x8xf32>
    %1480 = vector.extract_strided_slice %1443 {offsets = [0, 12], sizes = [4, 1], strides = [1, 1]} : vector<4x16xf32> to vector<4x1xf32>
    %1481 = vector.broadcast %1480 : vector<4x1xf32> to vector<4x8xf32>
    %1482 = arith.mulf %1481, %70 : vector<4x8xf32>
    %1483 = vector.extract_strided_slice %1443 {offsets = [0, 13], sizes = [4, 1], strides = [1, 1]} : vector<4x16xf32> to vector<4x1xf32>
    %1484 = vector.broadcast %1483 : vector<4x1xf32> to vector<4x8xf32>
    %1485 = arith.mulf %1484, %73 : vector<4x8xf32>
    %1486 = vector.extract_strided_slice %1443 {offsets = [0, 14], sizes = [4, 1], strides = [1, 1]} : vector<4x16xf32> to vector<4x1xf32>
    %1487 = vector.broadcast %1486 : vector<4x1xf32> to vector<4x8xf32>
    %1488 = arith.mulf %1487, %76 : vector<4x8xf32>
    %1489 = vector.extract_strided_slice %1443 {offsets = [0, 15], sizes = [4, 1], strides = [1, 1]} : vector<4x16xf32> to vector<4x1xf32>
    %1490 = vector.broadcast %1489 : vector<4x1xf32> to vector<4x8xf32>
    %1491 = arith.mulf %1490, %79 : vector<4x8xf32>
    %1492 = arith.addf %5, %1446 : vector<4x8xf32>
    %1493 = arith.addf %1449, %1452 : vector<4x8xf32>
    %1494 = arith.addf %1455, %1458 : vector<4x8xf32>
    %1495 = arith.addf %1461, %1464 : vector<4x8xf32>
    %1496 = arith.addf %1467, %1470 : vector<4x8xf32>
    %1497 = arith.addf %1473, %1476 : vector<4x8xf32>
    %1498 = arith.addf %1479, %1482 : vector<4x8xf32>
    %1499 = arith.addf %1485, %1488 : vector<4x8xf32>
    %1500 = arith.addf %1492, %1493 : vector<4x8xf32>
    %1501 = arith.addf %1494, %1495 : vector<4x8xf32>
    %1502 = arith.addf %1496, %1497 : vector<4x8xf32>
    %1503 = arith.addf %1498, %1499 : vector<4x8xf32>
    %1504 = arith.addf %1500, %1501 : vector<4x8xf32>
    %1505 = arith.addf %1502, %1503 : vector<4x8xf32>
    %1506 = arith.addf %1504, %1505 : vector<4x8xf32>
    %1507 = arith.addf %1506, %1491 : vector<4x8xf32>
    %1508 = arith.mulf %1311, %1507 : vector<4x8xf32>
    %1509 = arith.addf %1307, %1508 : vector<4x8xf32>
    %1510 = vector.extract_strided_slice %1509 {offsets = [0, 0], sizes = [4, 1], strides = [1, 1]} : vector<4x8xf32> to vector<4x1xf32>
    %1511 = vector.broadcast %1510 : vector<4x1xf32> to vector<4x16xf32>
    %1512 = arith.mulf %1511, %10 : vector<4x16xf32>
    %1513 = vector.extract_strided_slice %1509 {offsets = [0, 1], sizes = [4, 1], strides = [1, 1]} : vector<4x8xf32> to vector<4x1xf32>
    %1514 = vector.broadcast %1513 : vector<4x1xf32> to vector<4x16xf32>
    %1515 = arith.mulf %1514, %13 : vector<4x16xf32>
    %1516 = vector.extract_strided_slice %1509 {offsets = [0, 2], sizes = [4, 1], strides = [1, 1]} : vector<4x8xf32> to vector<4x1xf32>
    %1517 = vector.broadcast %1516 : vector<4x1xf32> to vector<4x16xf32>
    %1518 = arith.mulf %1517, %16 : vector<4x16xf32>
    %1519 = vector.extract_strided_slice %1509 {offsets = [0, 3], sizes = [4, 1], strides = [1, 1]} : vector<4x8xf32> to vector<4x1xf32>
    %1520 = vector.broadcast %1519 : vector<4x1xf32> to vector<4x16xf32>
    %1521 = arith.mulf %1520, %19 : vector<4x16xf32>
    %1522 = vector.extract_strided_slice %1509 {offsets = [0, 4], sizes = [4, 1], strides = [1, 1]} : vector<4x8xf32> to vector<4x1xf32>
    %1523 = vector.broadcast %1522 : vector<4x1xf32> to vector<4x16xf32>
    %1524 = arith.mulf %1523, %22 : vector<4x16xf32>
    %1525 = vector.extract_strided_slice %1509 {offsets = [0, 5], sizes = [4, 1], strides = [1, 1]} : vector<4x8xf32> to vector<4x1xf32>
    %1526 = vector.broadcast %1525 : vector<4x1xf32> to vector<4x16xf32>
    %1527 = arith.mulf %1526, %25 : vector<4x16xf32>
    %1528 = vector.extract_strided_slice %1509 {offsets = [0, 6], sizes = [4, 1], strides = [1, 1]} : vector<4x8xf32> to vector<4x1xf32>
    %1529 = vector.broadcast %1528 : vector<4x1xf32> to vector<4x16xf32>
    %1530 = arith.mulf %1529, %28 : vector<4x16xf32>
    %1531 = vector.extract_strided_slice %1509 {offsets = [0, 7], sizes = [4, 1], strides = [1, 1]} : vector<4x8xf32> to vector<4x1xf32>
    %1532 = vector.broadcast %1531 : vector<4x1xf32> to vector<4x16xf32>
    %1533 = arith.mulf %1532, %31 : vector<4x16xf32>
    %1534 = arith.addf %2, %1512 : vector<4x16xf32>
    %1535 = arith.addf %1515, %1518 : vector<4x16xf32>
    %1536 = arith.addf %1521, %1524 : vector<4x16xf32>
    %1537 = arith.addf %1527, %1530 : vector<4x16xf32>
    %1538 = arith.addf %1534, %1535 : vector<4x16xf32>
    %1539 = arith.addf %1536, %1537 : vector<4x16xf32>
    %1540 = arith.addf %1538, %1539 : vector<4x16xf32>
    %1541 = arith.addf %1540, %1533 : vector<4x16xf32>
    %1542 = math.tanh %1541 : vector<4x16xf32>
    %1543 = vector.extract_strided_slice %1542 {offsets = [0, 0], sizes = [4, 1], strides = [1, 1]} : vector<4x16xf32> to vector<4x1xf32>
    %1544 = vector.broadcast %1543 : vector<4x1xf32> to vector<4x8xf32>
    %1545 = arith.mulf %1544, %34 : vector<4x8xf32>
    %1546 = vector.extract_strided_slice %1542 {offsets = [0, 1], sizes = [4, 1], strides = [1, 1]} : vector<4x16xf32> to vector<4x1xf32>
    %1547 = vector.broadcast %1546 : vector<4x1xf32> to vector<4x8xf32>
    %1548 = arith.mulf %1547, %37 : vector<4x8xf32>
    %1549 = vector.extract_strided_slice %1542 {offsets = [0, 2], sizes = [4, 1], strides = [1, 1]} : vector<4x16xf32> to vector<4x1xf32>
    %1550 = vector.broadcast %1549 : vector<4x1xf32> to vector<4x8xf32>
    %1551 = arith.mulf %1550, %40 : vector<4x8xf32>
    %1552 = vector.extract_strided_slice %1542 {offsets = [0, 3], sizes = [4, 1], strides = [1, 1]} : vector<4x16xf32> to vector<4x1xf32>
    %1553 = vector.broadcast %1552 : vector<4x1xf32> to vector<4x8xf32>
    %1554 = arith.mulf %1553, %43 : vector<4x8xf32>
    %1555 = vector.extract_strided_slice %1542 {offsets = [0, 4], sizes = [4, 1], strides = [1, 1]} : vector<4x16xf32> to vector<4x1xf32>
    %1556 = vector.broadcast %1555 : vector<4x1xf32> to vector<4x8xf32>
    %1557 = arith.mulf %1556, %46 : vector<4x8xf32>
    %1558 = vector.extract_strided_slice %1542 {offsets = [0, 5], sizes = [4, 1], strides = [1, 1]} : vector<4x16xf32> to vector<4x1xf32>
    %1559 = vector.broadcast %1558 : vector<4x1xf32> to vector<4x8xf32>
    %1560 = arith.mulf %1559, %49 : vector<4x8xf32>
    %1561 = vector.extract_strided_slice %1542 {offsets = [0, 6], sizes = [4, 1], strides = [1, 1]} : vector<4x16xf32> to vector<4x1xf32>
    %1562 = vector.broadcast %1561 : vector<4x1xf32> to vector<4x8xf32>
    %1563 = arith.mulf %1562, %52 : vector<4x8xf32>
    %1564 = vector.extract_strided_slice %1542 {offsets = [0, 7], sizes = [4, 1], strides = [1, 1]} : vector<4x16xf32> to vector<4x1xf32>
    %1565 = vector.broadcast %1564 : vector<4x1xf32> to vector<4x8xf32>
    %1566 = arith.mulf %1565, %55 : vector<4x8xf32>
    %1567 = vector.extract_strided_slice %1542 {offsets = [0, 8], sizes = [4, 1], strides = [1, 1]} : vector<4x16xf32> to vector<4x1xf32>
    %1568 = vector.broadcast %1567 : vector<4x1xf32> to vector<4x8xf32>
    %1569 = arith.mulf %1568, %58 : vector<4x8xf32>
    %1570 = vector.extract_strided_slice %1542 {offsets = [0, 9], sizes = [4, 1], strides = [1, 1]} : vector<4x16xf32> to vector<4x1xf32>
    %1571 = vector.broadcast %1570 : vector<4x1xf32> to vector<4x8xf32>
    %1572 = arith.mulf %1571, %61 : vector<4x8xf32>
    %1573 = vector.extract_strided_slice %1542 {offsets = [0, 10], sizes = [4, 1], strides = [1, 1]} : vector<4x16xf32> to vector<4x1xf32>
    %1574 = vector.broadcast %1573 : vector<4x1xf32> to vector<4x8xf32>
    %1575 = arith.mulf %1574, %64 : vector<4x8xf32>
    %1576 = vector.extract_strided_slice %1542 {offsets = [0, 11], sizes = [4, 1], strides = [1, 1]} : vector<4x16xf32> to vector<4x1xf32>
    %1577 = vector.broadcast %1576 : vector<4x1xf32> to vector<4x8xf32>
    %1578 = arith.mulf %1577, %67 : vector<4x8xf32>
    %1579 = vector.extract_strided_slice %1542 {offsets = [0, 12], sizes = [4, 1], strides = [1, 1]} : vector<4x16xf32> to vector<4x1xf32>
    %1580 = vector.broadcast %1579 : vector<4x1xf32> to vector<4x8xf32>
    %1581 = arith.mulf %1580, %70 : vector<4x8xf32>
    %1582 = vector.extract_strided_slice %1542 {offsets = [0, 13], sizes = [4, 1], strides = [1, 1]} : vector<4x16xf32> to vector<4x1xf32>
    %1583 = vector.broadcast %1582 : vector<4x1xf32> to vector<4x8xf32>
    %1584 = arith.mulf %1583, %73 : vector<4x8xf32>
    %1585 = vector.extract_strided_slice %1542 {offsets = [0, 14], sizes = [4, 1], strides = [1, 1]} : vector<4x16xf32> to vector<4x1xf32>
    %1586 = vector.broadcast %1585 : vector<4x1xf32> to vector<4x8xf32>
    %1587 = arith.mulf %1586, %76 : vector<4x8xf32>
    %1588 = vector.extract_strided_slice %1542 {offsets = [0, 15], sizes = [4, 1], strides = [1, 1]} : vector<4x16xf32> to vector<4x1xf32>
    %1589 = vector.broadcast %1588 : vector<4x1xf32> to vector<4x8xf32>
    %1590 = arith.mulf %1589, %79 : vector<4x8xf32>
    %1591 = arith.addf %5, %1545 : vector<4x8xf32>
    %1592 = arith.addf %1548, %1551 : vector<4x8xf32>
    %1593 = arith.addf %1554, %1557 : vector<4x8xf32>
    %1594 = arith.addf %1560, %1563 : vector<4x8xf32>
    %1595 = arith.addf %1566, %1569 : vector<4x8xf32>
    %1596 = arith.addf %1572, %1575 : vector<4x8xf32>
    %1597 = arith.addf %1578, %1581 : vector<4x8xf32>
    %1598 = arith.addf %1584, %1587 : vector<4x8xf32>
    %1599 = arith.addf %1591, %1592 : vector<4x8xf32>
    %1600 = arith.addf %1593, %1594 : vector<4x8xf32>
    %1601 = arith.addf %1595, %1596 : vector<4x8xf32>
    %1602 = arith.addf %1597, %1598 : vector<4x8xf32>
    %1603 = arith.addf %1599, %1600 : vector<4x8xf32>
    %1604 = arith.addf %1601, %1602 : vector<4x8xf32>
    %1605 = arith.addf %1603, %1604 : vector<4x8xf32>
    %1606 = arith.addf %1605, %1590 : vector<4x8xf32>
    %1607 = vector.broadcast %1308 : f32 to vector<4x8xf32>
    %1608 = arith.mulf %1607, %1606 : vector<4x8xf32>
    %1609 = arith.addf %1307, %1608 : vector<4x8xf32>
    %1610 = vector.extract_strided_slice %1609 {offsets = [0, 0], sizes = [4, 1], strides = [1, 1]} : vector<4x8xf32> to vector<4x1xf32>
    %1611 = vector.broadcast %1610 : vector<4x1xf32> to vector<4x16xf32>
    %1612 = arith.mulf %1611, %10 : vector<4x16xf32>
    %1613 = vector.extract_strided_slice %1609 {offsets = [0, 1], sizes = [4, 1], strides = [1, 1]} : vector<4x8xf32> to vector<4x1xf32>
    %1614 = vector.broadcast %1613 : vector<4x1xf32> to vector<4x16xf32>
    %1615 = arith.mulf %1614, %13 : vector<4x16xf32>
    %1616 = vector.extract_strided_slice %1609 {offsets = [0, 2], sizes = [4, 1], strides = [1, 1]} : vector<4x8xf32> to vector<4x1xf32>
    %1617 = vector.broadcast %1616 : vector<4x1xf32> to vector<4x16xf32>
    %1618 = arith.mulf %1617, %16 : vector<4x16xf32>
    %1619 = vector.extract_strided_slice %1609 {offsets = [0, 3], sizes = [4, 1], strides = [1, 1]} : vector<4x8xf32> to vector<4x1xf32>
    %1620 = vector.broadcast %1619 : vector<4x1xf32> to vector<4x16xf32>
    %1621 = arith.mulf %1620, %19 : vector<4x16xf32>
    %1622 = vector.extract_strided_slice %1609 {offsets = [0, 4], sizes = [4, 1], strides = [1, 1]} : vector<4x8xf32> to vector<4x1xf32>
    %1623 = vector.broadcast %1622 : vector<4x1xf32> to vector<4x16xf32>
    %1624 = arith.mulf %1623, %22 : vector<4x16xf32>
    %1625 = vector.extract_strided_slice %1609 {offsets = [0, 5], sizes = [4, 1], strides = [1, 1]} : vector<4x8xf32> to vector<4x1xf32>
    %1626 = vector.broadcast %1625 : vector<4x1xf32> to vector<4x16xf32>
    %1627 = arith.mulf %1626, %25 : vector<4x16xf32>
    %1628 = vector.extract_strided_slice %1609 {offsets = [0, 6], sizes = [4, 1], strides = [1, 1]} : vector<4x8xf32> to vector<4x1xf32>
    %1629 = vector.broadcast %1628 : vector<4x1xf32> to vector<4x16xf32>
    %1630 = arith.mulf %1629, %28 : vector<4x16xf32>
    %1631 = vector.extract_strided_slice %1609 {offsets = [0, 7], sizes = [4, 1], strides = [1, 1]} : vector<4x8xf32> to vector<4x1xf32>
    %1632 = vector.broadcast %1631 : vector<4x1xf32> to vector<4x16xf32>
    %1633 = arith.mulf %1632, %31 : vector<4x16xf32>
    %1634 = arith.addf %2, %1612 : vector<4x16xf32>
    %1635 = arith.addf %1615, %1618 : vector<4x16xf32>
    %1636 = arith.addf %1621, %1624 : vector<4x16xf32>
    %1637 = arith.addf %1627, %1630 : vector<4x16xf32>
    %1638 = arith.addf %1634, %1635 : vector<4x16xf32>
    %1639 = arith.addf %1636, %1637 : vector<4x16xf32>
    %1640 = arith.addf %1638, %1639 : vector<4x16xf32>
    %1641 = arith.addf %1640, %1633 : vector<4x16xf32>
    %1642 = math.tanh %1641 : vector<4x16xf32>
    %1643 = vector.extract_strided_slice %1642 {offsets = [0, 0], sizes = [4, 1], strides = [1, 1]} : vector<4x16xf32> to vector<4x1xf32>
    %1644 = vector.broadcast %1643 : vector<4x1xf32> to vector<4x8xf32>
    %1645 = arith.mulf %1644, %34 : vector<4x8xf32>
    %1646 = vector.extract_strided_slice %1642 {offsets = [0, 1], sizes = [4, 1], strides = [1, 1]} : vector<4x16xf32> to vector<4x1xf32>
    %1647 = vector.broadcast %1646 : vector<4x1xf32> to vector<4x8xf32>
    %1648 = arith.mulf %1647, %37 : vector<4x8xf32>
    %1649 = vector.extract_strided_slice %1642 {offsets = [0, 2], sizes = [4, 1], strides = [1, 1]} : vector<4x16xf32> to vector<4x1xf32>
    %1650 = vector.broadcast %1649 : vector<4x1xf32> to vector<4x8xf32>
    %1651 = arith.mulf %1650, %40 : vector<4x8xf32>
    %1652 = vector.extract_strided_slice %1642 {offsets = [0, 3], sizes = [4, 1], strides = [1, 1]} : vector<4x16xf32> to vector<4x1xf32>
    %1653 = vector.broadcast %1652 : vector<4x1xf32> to vector<4x8xf32>
    %1654 = arith.mulf %1653, %43 : vector<4x8xf32>
    %1655 = vector.extract_strided_slice %1642 {offsets = [0, 4], sizes = [4, 1], strides = [1, 1]} : vector<4x16xf32> to vector<4x1xf32>
    %1656 = vector.broadcast %1655 : vector<4x1xf32> to vector<4x8xf32>
    %1657 = arith.mulf %1656, %46 : vector<4x8xf32>
    %1658 = vector.extract_strided_slice %1642 {offsets = [0, 5], sizes = [4, 1], strides = [1, 1]} : vector<4x16xf32> to vector<4x1xf32>
    %1659 = vector.broadcast %1658 : vector<4x1xf32> to vector<4x8xf32>
    %1660 = arith.mulf %1659, %49 : vector<4x8xf32>
    %1661 = vector.extract_strided_slice %1642 {offsets = [0, 6], sizes = [4, 1], strides = [1, 1]} : vector<4x16xf32> to vector<4x1xf32>
    %1662 = vector.broadcast %1661 : vector<4x1xf32> to vector<4x8xf32>
    %1663 = arith.mulf %1662, %52 : vector<4x8xf32>
    %1664 = vector.extract_strided_slice %1642 {offsets = [0, 7], sizes = [4, 1], strides = [1, 1]} : vector<4x16xf32> to vector<4x1xf32>
    %1665 = vector.broadcast %1664 : vector<4x1xf32> to vector<4x8xf32>
    %1666 = arith.mulf %1665, %55 : vector<4x8xf32>
    %1667 = vector.extract_strided_slice %1642 {offsets = [0, 8], sizes = [4, 1], strides = [1, 1]} : vector<4x16xf32> to vector<4x1xf32>
    %1668 = vector.broadcast %1667 : vector<4x1xf32> to vector<4x8xf32>
    %1669 = arith.mulf %1668, %58 : vector<4x8xf32>
    %1670 = vector.extract_strided_slice %1642 {offsets = [0, 9], sizes = [4, 1], strides = [1, 1]} : vector<4x16xf32> to vector<4x1xf32>
    %1671 = vector.broadcast %1670 : vector<4x1xf32> to vector<4x8xf32>
    %1672 = arith.mulf %1671, %61 : vector<4x8xf32>
    %1673 = vector.extract_strided_slice %1642 {offsets = [0, 10], sizes = [4, 1], strides = [1, 1]} : vector<4x16xf32> to vector<4x1xf32>
    %1674 = vector.broadcast %1673 : vector<4x1xf32> to vector<4x8xf32>
    %1675 = arith.mulf %1674, %64 : vector<4x8xf32>
    %1676 = vector.extract_strided_slice %1642 {offsets = [0, 11], sizes = [4, 1], strides = [1, 1]} : vector<4x16xf32> to vector<4x1xf32>
    %1677 = vector.broadcast %1676 : vector<4x1xf32> to vector<4x8xf32>
    %1678 = arith.mulf %1677, %67 : vector<4x8xf32>
    %1679 = vector.extract_strided_slice %1642 {offsets = [0, 12], sizes = [4, 1], strides = [1, 1]} : vector<4x16xf32> to vector<4x1xf32>
    %1680 = vector.broadcast %1679 : vector<4x1xf32> to vector<4x8xf32>
    %1681 = arith.mulf %1680, %70 : vector<4x8xf32>
    %1682 = vector.extract_strided_slice %1642 {offsets = [0, 13], sizes = [4, 1], strides = [1, 1]} : vector<4x16xf32> to vector<4x1xf32>
    %1683 = vector.broadcast %1682 : vector<4x1xf32> to vector<4x8xf32>
    %1684 = arith.mulf %1683, %73 : vector<4x8xf32>
    %1685 = vector.extract_strided_slice %1642 {offsets = [0, 14], sizes = [4, 1], strides = [1, 1]} : vector<4x16xf32> to vector<4x1xf32>
    %1686 = vector.broadcast %1685 : vector<4x1xf32> to vector<4x8xf32>
    %1687 = arith.mulf %1686, %76 : vector<4x8xf32>
    %1688 = vector.extract_strided_slice %1642 {offsets = [0, 15], sizes = [4, 1], strides = [1, 1]} : vector<4x16xf32> to vector<4x1xf32>
    %1689 = vector.broadcast %1688 : vector<4x1xf32> to vector<4x8xf32>
    %1690 = arith.mulf %1689, %79 : vector<4x8xf32>
    %1691 = arith.addf %5, %1645 : vector<4x8xf32>
    %1692 = arith.addf %1648, %1651 : vector<4x8xf32>
    %1693 = arith.addf %1654, %1657 : vector<4x8xf32>
    %1694 = arith.addf %1660, %1663 : vector<4x8xf32>
    %1695 = arith.addf %1666, %1669 : vector<4x8xf32>
    %1696 = arith.addf %1672, %1675 : vector<4x8xf32>
    %1697 = arith.addf %1678, %1681 : vector<4x8xf32>
    %1698 = arith.addf %1684, %1687 : vector<4x8xf32>
    %1699 = arith.addf %1691, %1692 : vector<4x8xf32>
    %1700 = arith.addf %1693, %1694 : vector<4x8xf32>
    %1701 = arith.addf %1695, %1696 : vector<4x8xf32>
    %1702 = arith.addf %1697, %1698 : vector<4x8xf32>
    %1703 = arith.addf %1699, %1700 : vector<4x8xf32>
    %1704 = arith.addf %1701, %1702 : vector<4x8xf32>
    %1705 = arith.addf %1703, %1704 : vector<4x8xf32>
    %1706 = arith.addf %1705, %1690 : vector<4x8xf32>
    %cst_23 = arith.constant 2.000000e+00 : f32
    %1707 = vector.broadcast %cst_23 : f32 to vector<4x8xf32>
    %1708 = arith.mulf %1707, %1507 : vector<4x8xf32>
    %1709 = arith.addf %1408, %1708 : vector<4x8xf32>
    %cst_24 = arith.constant 2.000000e+00 : f32
    %1710 = vector.broadcast %cst_24 : f32 to vector<4x8xf32>
    %1711 = arith.mulf %1710, %1606 : vector<4x8xf32>
    %1712 = arith.addf %1709, %1711 : vector<4x8xf32>
    %1713 = arith.addf %1712, %1706 : vector<4x8xf32>
    %1714 = vector.broadcast %1309 : f32 to vector<4x8xf32>
    %1715 = arith.mulf %1714, %1713 : vector<4x8xf32>
    %1716 = arith.addf %1307, %1715 : vector<4x8xf32>
    %1717 = vector.shape_cast %80 : vector<4x8xf32> to vector<1x4x8xf32>
    %1718 = vector.shape_cast %489 : vector<4x8xf32> to vector<1x4x8xf32>
    %1719 = vector.shape_cast %898 : vector<4x8xf32> to vector<1x4x8xf32>
    %1720 = vector.shape_cast %1307 : vector<4x8xf32> to vector<1x4x8xf32>
    %1721 = vector.shape_cast %1716 : vector<4x8xf32> to vector<1x4x8xf32>
    %1722 = tpu.concatenate %1717, %1718, %1719, %1720, %1721 in 0 : vector<1x4x8xf32>, vector<1x4x8xf32>, vector<1x4x8xf32>, vector<1x4x8xf32>, vector<1x4x8xf32> -> vector<5x4x8xf32>
    %c0_25 = arith.constant 0 : index
    %c0_26 = arith.constant 0 : index
    %c0_27 = arith.constant 0 : index
    %1723 = vector.load %arg8[%c0_25, %c0_26, %c0_27] : memref<5x4x8xf32, #tpu.memory_space<vmem>>, vector<5x4x8xf32>
    tpu.vector_store %arg8[%c0_25, %c0_26, %c0_27], %1722 {strides = array<i32>} : memref<5x4x8xf32, #tpu.memory_space<vmem>>, vector<5x4x8xf32>,
    return
  }
}

</mosaic_0001>

<bundles_post_ra>
// kernel: tpu_custom_call.1
= control target key start
LH: loop header
LB: loop body
LE: loop exit
PB: predicated region body
PF: predicated region fallthrough
CT: control target
= control target key end

     0   :  { %13 = vsyncpa [#allocation4], 0  ;;  %s4193_s0 = inlined_call_operand.vmem [shape: f32[4], index: 0, kind: input, shape index: {}]   ;;  %s4194_s1 = inlined_call_operand.vmem [shape: f32[4], index: 1, kind: input, shape index: {}]   ;;  %s4195_s2 = inlined_call_operand.vmem [shape: f32[4], index: 2, kind: input, shape index: {}]   ;;  %s4196_s3 = inlined_call_operand.vmem [shape: f32[4,8], index: 3, kind: input, shape index: {}]   ;;  %s4197_s4 = inlined_call_operand.vmem [shape: f32[8,16], index: 4, kind: input, shape index: {}]   ;;  %s4198_s5 = inlined_call_operand.vmem [shape: f32[1,16], index: 5, kind: input, shape index: {}]   ;;  %s4199_s6 = inlined_call_operand.vmem [shape: f32[16,8], index: 6, kind: input, shape index: {}]   ;;  %s4200_s7 = inlined_call_operand.vmem [shape: f32[1,8], index: 7, kind: input, shape index: {}]   ;;  %s4201_s8 = inlined_call_operand.hbm [shape: f32[5,4,8], index: 8, kind: output, shape index: {}]  }
   0x1   :  { %14 = vsyncpa [#allocation6], 0  ;;  %s30_s29 = sshll.u32 %s4194_s1, 4  ;;  %s31_s29 = int_to_ptr.vmem [resolvable:$true] %s30_s29 }
   0x2   :  { %15 = vsyncpa [#allocation3], 0  ;;  %s21_s10 = sshll.u32 %s4193_s0, 4  ;;  %s3077_s11 = smov [#allocation5]   ;;  %s22_s10 = int_to_ptr.vmem [resolvable:$true] %s21_s10 }
   0x3   :  { %33 = dma.vmem_to_smem %s31_s29, 16, %s3077_s11, [#allocation6]  }
   0x4   :  { %s3078_s12 = smov [#allocation2]   ;;  %s39_s15 = sshll.u32 %s4195_s2, 4  ;;  %s40_s15 = int_to_ptr.vmem [resolvable:$true] %s39_s15 }
   0x5   :  { %24 = dma.vmem_to_smem %s22_s10, 16, %s3078_s12, [#allocation4]  }
   0x6   :  { %s3079_s16 = smov [#allocation7]  }
   0x7   :  { %42 = dma.vmem_to_smem %s40_s15, 16, %s3079_s16, [#allocation6]  }
   0x8   :  { %3071 = dma.done.wait [#allocation4], 16  }
   0x9   :  { %3072 = vsyncadd [#allocation4], 4294967280 }
   0xa   :  { %3073 = dma.done.wait [#allocation6], 32  }
   0xb   :  { %3074 = vsyncadd [#allocation6], 4294967264 }
   0xc   :  { %65 = sfence }
   0xd   :  { %v3156_v0 = vld [vmem:[%s4196_s3] sm:$0xf]  ;;  %v4222_v1 = vmov 2   ;;  %v4218_v2 = vmov 0   ;;  %v4232_v3 = vmov 4   ;;  %v4230_v4 = vmov 3  }
   0xe   :  { %2589 = vset.pattern.permute.xlu1 %v4222_v1  ;;  %2587 = vset.pattern.permute.xlu0 %v4218_v2  ;;  %v4220_v5 = vmov 1   ;;  %v4228_v6 = vmov 5   ;;  %v4224_v7 = vmov 6   ;;  %v4226_v8 = vmov 7   ;;  %v74_v13 = vld [vmem:[%s4197_s4] sm:$0xff]  ;;  %s3283_s23 = sld [smem:[#allocation5]] }
   0xf   :  { %118 = vperm.xlu1 %2589, %v3156_v0   ;;  %108 = vperm.xlu0 %2587, %v3156_v0   ;;  %v3180_v15 = vperm.slane %v74_v13, 0  ;;  %v3182_v16 = vperm.slane %v74_v13, 1  ;;  %v3184_v18 = vperm.slane %v74_v13, 2  ;;  %v3186_v19 = vperm.slane %v74_v13, 3  ;;  %v3195_v22 = vld [vmem:[%s4198_s5] ss:$0 sm:$0xff] }
  0x10   :  { %2591 = vset.pattern.permute.xlu2 %v4232_v3  ;;  %v3188_v20 = vperm.slane %v74_v13, 4  ;;  %v3190_v21 = vperm.slane %v74_v13, 5  ;;  %v3199_v25 = vperm.slane %v74_v13, 6  ;;  %v3207_v34 = vperm.slane %v74_v13, 7  ;;  %v75_v63 = vld [vmem:[%s4199_s6] sm:$0xff]  ;;  %v76_v13 = vld [vmem:[%s4199_s6 + $0x8] sm:$0xff] }
  0x11   :  { %128 = vperm.xlu2 %2591, %v3156_v0   ;;  %v4208_v44 = vmov 10   ;;  %v4216_v45 = vmov 9   ;;  %v4212_v46 = vmov 8   ;;  %v4202_v47 = vmov 15   ;;  %s102_s24 = sld [smem:[#allocation2]]  ;;  %s3096_s4 = smov [#allocation8]  }
  0x12   :  { %v4210_v48 = vmov 12   ;;  %v4214_v49 = vmov 11   ;;  %v4206_v50 = vmov 14   ;;  %v4204_v51 = vmov 13   ;;  %s103_s25 = sld [smem:[#allocation7]]  ;;  %s2540_s19 = sshll.u32 %s3096_s4, 4  ;;  %s2541_s19 = int_to_ptr.vmem [resolvable:$true] %s2540_s19 }
  0x13   :  { %vm2530_vm0 = vcmask 60416   ;;  %s3531_s30 = sld [smem:[#allocation5 + $0x1]]  ;;  %s2542_s6 = sshll.u32 %s4201_s8, 4  ;;  %s2543_s6 = int_to_ptr.hbm [resolvable:$true] %s2542_s6 }
  0x14   :  { %2531 = vst.msk [vmem:[#allocation8] sm:$0xf] %vm2530_vm0, %v3156_v0  ;;  %s2556_s9 = sld [smem:[#allocation2 + $0x1]]  ;;  %s3097_s22 = smov 64  }
  0x15   :  { %s2557_s10 = sld [smem:[#allocation7 + $0x1]] }
  0x16   :  { %s3765_s11 = sld [smem:[#allocation5 + $0x2]] }
  0x17   :  { %2590 = vset.pattern.permute.xlu1 %v4230_v4  ;;  %2588 = vset.pattern.permute.xlu0 %v4220_v5  ;;  %s2559_s16 = sld [smem:[#allocation2 + $0x2]] }
  0x18   :  { %123 = vperm.xlu1 %2590, %v3156_v0   ;;  %113 = vperm.xlu0 %2588, %v3156_v0   ;;  %s2560_s1 = sld [smem:[#allocation7 + $0x2]] }
  0x19   :  { %2592 = vset.pattern.permute.xlu2 %v4228_v6  ;;  %s4009_s17 = sld [smem:[#allocation5 + $0x3]] }
  0x1a   :  { %133 = vperm.xlu2 %2592, %v3156_v0   ;;  %s2562_s18 = sld [smem:[#allocation2 + $0x3]] }
  0x20   :  { %2593 = vset.pattern.permute.xlu1 %v4224_v7  ;;  %2595 = vset.pattern.permute.xlu0 %v4218_v2 }
  0x21   :  { %138 = vperm.xlu1 %2593, %v3156_v0  }
  0x22   :  { %2594 = vset.pattern.permute.xlu2 %v4226_v8 }
  0x23   :  { %143 = vperm.xlu2 %2594, %v3156_v0  }
  0x29   :  { %2596 = vset.pattern.permute.xlu1 %v4220_v5 }
  0x2b   :  { %2597 = vset.pattern.permute.xlu2 %v4222_v1 }
  0x6b   :  { %v129_v10 = vpop.permute.xlu2 %128 }
  0x6c   :  { %v131_v28 = vmul.f32 %v129_v10, %v3188_v20 }
  0x74   :  { %v134_v14 = vpop.permute.xlu2 %133 }
  0x75   :  { %v136_v29 = vmul.f32 %v134_v14, %v3190_v21  ;;  %v3238_v14 = vperm.slane %v75_v63, 3 }
  0x77   :  { %4327 = vst [vmem:[#allocation15_spill] sm:$0xff] %v3238_v14 }
  0x7d   :  { %v144_v35 = vpop.permute.xlu2 %143 }
  0x7e   :  { %v146_v40 = vmul.f32 %v144_v35, %v3207_v34 }
  0x81   :  { %v119_v9 = vpop.permute.xlu1 %118  ;;  %v109_v11 = vpop.permute.xlu0 %108 }
  0x82   :  { %v111_v23 = vmul.f32 %v109_v11, %v3180_v15  ;;  %v121_v26 = vmul.f32 %v119_v9, %v3184_v18  ;;  %v3229_v9 = vperm.slane %v75_v63, 6  ;;  %v3231_v11 = vperm.slane %v75_v63, 1 }
  0x84   :  { %v147_v31 = vadd.f32 %v3195_v22, %v111_v23  ;;  %4324 = vst [vmem:[#allocation12_spill] sm:$0xff] %v3229_v9  ;;  %v3242_v23 = vperm.slane %v76_v13, 0 }
  0x85   :  { %4325 = vst [vmem:[#allocation13_spill] sm:$0xff] %v3231_v11 }
  0x86   :  { %4329 = vst [vmem:[#allocation17_spill] sm:$0xff] %v3242_v23 }
  0x8a   :  { %v124_v12 = vpop.permute.xlu1 %123  ;;  %v114_v17 = vpop.permute.xlu0 %113 }
  0x8b   :  { %v116_v24 = vmul.f32 %v114_v17, %v3182_v16  ;;  %v126_v27 = vmul.f32 %v124_v12, %v3186_v19  ;;  %v3233_v12 = vperm.slane %v75_v63, 0  ;;  %v3240_v17 = vperm.slane %v75_v63, 5 }
  0x8d   :  { %v148_v32 = vadd.f32 %v121_v26, %v116_v24  ;;  %v149_v36 = vadd.f32 %v131_v28, %v126_v27  ;;  %4326 = vst [vmem:[#allocation14_spill] sm:$0xff] %v3233_v12  ;;  %v3244_v24 = vperm.slane %v75_v63, 2  ;;  %v3246_v26 = vperm.slane %v75_v63, 4 }
  0x8e   :  { %4328 = vst [vmem:[#allocation16_spill] sm:$0xff] %v3240_v17  ;;  %v3248_v27 = vperm.slane %v75_v63, 7  ;;  %v3250_v28 = vperm.slane %v76_v13, 1 }
  0x8f   :  { %v151_v38 = vadd.f32 %v148_v32, %v147_v31  ;;  %4330 = vst [vmem:[#allocation18_spill] sm:$0xff] %v3244_v24  ;;  %v3255_v31 = vperm.slane %v76_v13, 3 }
  0x90   :  { %4331 = vst [vmem:[#allocation19_spill] sm:$0xff] %v3246_v26 }
  0x91   :  { %4332 = vst [vmem:[#allocation20_spill] sm:$0xff] %v3248_v27 }
  0x92   :  { %4333 = vst [vmem:[#allocation21_spill] sm:$0xff] %v3250_v28 }
  0x93   :  { %v139_v30 = vpop.permute.xlu1 %138  ;;  %4335 = vst [vmem:[#allocation23_spill] sm:$0xff] %v3255_v31 }
  0x94   :  { %v141_v33 = vmul.f32 %v139_v30, %v3199_v25  ;;  %v3253_v30 = vperm.slane %v76_v13, 2 }
  0x96   :  { %v150_v37 = vadd.f32 %v141_v33, %v136_v29  ;;  %4334 = vst [vmem:[#allocation22_spill] sm:$0xff] %v3253_v30  ;;  %v3261_v33 = vld [vmem:[%s4200_s7] ss:$0 sm:$0xff] }
  0x98   :  { %v152_v39 = vadd.f32 %v150_v37, %v149_v36  ;;  %v3265_v37 = vperm.slane %v76_v13, 4 }
  0x9a   :  { %v153_v41 = vadd.f32 %v152_v39, %v151_v38  ;;  %4336 = vst [vmem:[#allocation24_spill] sm:$0xff] %v3265_v37 }
  0x9c   :  { %v154_v42 = vadd.f32 %v153_v41, %v146_v40  ;;  %v3268_v40 = vperm.slane %v76_v13, 6 }
  0x9e   :  { %2973 = vtanh.f32 %v154_v42  ;;  %4337 = vst [vmem:[#allocation25_spill] sm:$0xff] %v3268_v40  ;;  %v3271_v42 = vperm.slane %v76_v13, 5 }
  0xa0   :  { %4338 = vst [vmem:[#allocation26_spill] sm:$0xff] %v3271_v42 }
  0xa4   :  { %v2974_v43 = vpop.eup %2973 }
  0xa5   :  { %168 = vperm.xlu2 %2597, %v2974_v43   ;;  %163 = vperm.xlu1 %2596, %v2974_v43  }
  0xa6   :  { %158 = vperm.xlu0 %2595, %v2974_v43  }
  0xad   :  { %2599 = vset.pattern.permute.xlu2 %v4232_v3  ;;  %2598 = vset.pattern.permute.xlu1 %v4230_v4 }
  0xae   :  { %2600 = vset.pattern.permute.xlu0 %v4228_v6  ;;  %178 = vperm.xlu2 %2599, %v2974_v43  }
  0xaf   :  { %173 = vperm.xlu1 %2598, %v2974_v43   ;;  %183 = vperm.xlu0 %2600, %v2974_v43  }
  0xb6   :  { %2602 = vset.pattern.permute.xlu2 %v4226_v8 }
  0xb7   :  { %2601 = vset.pattern.permute.xlu1 %v4224_v7  ;;  %2605 = vset.pattern.permute.xlu0 %v4208_v44 }
  0xb8   :  { %193 = vperm.xlu2 %2602, %v2974_v43   ;;  %188 = vperm.xlu1 %2601, %v2974_v43  }
  0xb9   :  { %208 = vperm.xlu0 %2605, %v2974_v43  }
  0xc0   :  { %2604 = vset.pattern.permute.xlu2 %v4216_v45  ;;  %2603 = vset.pattern.permute.xlu1 %v4212_v46 }
  0xc1   :  { %2610 = vset.pattern.permute.xlu0 %v4202_v47  ;;  %203 = vperm.xlu2 %2604, %v2974_v43  }
  0xc2   :  { %198 = vperm.xlu1 %2603, %v2974_v43   ;;  %233 = vperm.xlu0 %2610, %v2974_v43  }
  0xc9   :  { %2607 = vset.pattern.permute.xlu2 %v4210_v48 }
  0xca   :  { %2606 = vset.pattern.permute.xlu1 %v4214_v49  ;;  %218 = vperm.xlu2 %2607, %v2974_v43  }
  0xcb   :  { %213 = vperm.xlu1 %2606, %v2974_v43   ;;  %2615 = vset.pattern.permute.xlu0 %v4232_v3 }
  0xd2   :  { %2609 = vset.pattern.permute.xlu2 %v4206_v50 }
  0xd3   :  { %2608 = vset.pattern.permute.xlu1 %v4204_v51  ;;  %228 = vperm.xlu2 %2609, %v2974_v43  }
  0xd4   :  { %223 = vperm.xlu1 %2608, %v2974_v43  }
  0xdb   :  { %2612 = vset.pattern.permute.xlu2 %v4220_v5 }
  0xdc   :  { %2611 = vset.pattern.permute.xlu1 %v4218_v2 }
  0xff   :  { %v169_v52 = vpop.permute.xlu2 %168 }
 0x100   :  { %v171_v43 = vmul.f32 %v169_v52, %v3244_v24 }
 0x108   :  { %v179_v54 = vpop.permute.xlu2 %178 }
 0x112   :  { %v194_v56 = vpop.permute.xlu2 %193 }
 0x117   :  { %v164_v53 = vpop.permute.xlu1 %163 }
 0x118   :  { %v159_v58 = vpop.permute.xlu0 %158  ;;  %v166_v32 = vmul.f32 %v164_v53, %v3231_v11  ;;  %v181_v53 = vmul.f32 %v179_v54, %v3246_v26 }
 0x119   :  { %v161_v35 = vmul.f32 %v159_v58, %v3233_v12  ;;  %v196_v58 = vmul.f32 %v194_v56, %v3248_v27 }
 0x11a   :  { %v238_v51 = vadd.f32 %v171_v43, %v166_v32 }
 0x11b   :  { %v204_v59 = vpop.permute.xlu2 %203 }
 0x11c   :  { %v206_v50 = vmul.f32 %v204_v59, %v3250_v28  ;;  %v3285_v59 = vperm.slane %v76_v13, 7 }
 0x121   :  { %v174_v55 = vpop.permute.xlu1 %173  ;;  %v184_v61 = vpop.permute.xlu0 %183 }
 0x122   :  { %v176_v36 = vmul.f32 %v174_v55, %v3238_v14  ;;  %v186_v39 = vmul.f32 %v184_v61, %v3240_v17  ;;  %v237_v61 = vadd.f32 %v3261_v33, %v161_v35 }
 0x124   :  { %v219_v62 = vpop.permute.xlu2 %218  ;;  %v245_v35 = vadd.f32 %v238_v51, %v237_v61 }
 0x125   :  { %v221_v48 = vmul.f32 %v219_v62, %v3265_v37 }
 0x12a   :  { %v189_v57 = vpop.permute.xlu1 %188 }
 0x12b   :  { %v191_v29 = vmul.f32 %v189_v57, %v3229_v9  ;;  %v209_v38 = vpop.permute.xlu0 %208 }
 0x12c   :  { %v211_v55 = vmul.f32 %v209_v38, %v3253_v30 }
 0x12d   :  { %v229_v57 = vpop.permute.xlu2 %228  ;;  %v240_v63 = vadd.f32 %v191_v29, %v186_v39 }
 0x12e   :  { %v231_v52 = vmul.f32 %v229_v57, %v3268_v40 }
 0x134   :  { %v199_v60 = vpop.permute.xlu1 %198  ;;  %v234_v39 = vpop.permute.xlu0 %233 }
 0x135   :  { %v201_v41 = vmul.f32 %v199_v60, %v3242_v23  ;;  %v239_v60 = vadd.f32 %v181_v53, %v176_v36 }
 0x137   :  { %v241_v54 = vadd.f32 %v201_v41, %v196_v58  ;;  %v246_v56 = vadd.f32 %v240_v63, %v239_v60  ;;  %v236_v41 = vmul.f32 %v234_v39, %v3285_v59 }
 0x139   :  { %v249_v62 = vadd.f32 %v246_v56, %v245_v35 }
 0x13d   :  { %v214_v10 = vpop.permute.xlu1 %213 }
 0x13e   :  { %v216_v47 = vmul.f32 %v214_v10, %v3255_v31  ;;  %v242_v10 = vadd.f32 %v211_v55, %v206_v50 }
 0x140   :  { %v243_v29 = vadd.f32 %v221_v48, %v216_v47  ;;  %v247_v38 = vadd.f32 %v242_v10, %v241_v54 }
 0x146   :  { %v224_v44 = vpop.permute.xlu1 %223 }
 0x147   :  { %v226_v46 = vmul.f32 %v224_v44, %v3271_v42  ;;  %v105_v44 = vstv %s3283_s23  ;;  %s3098_s23 = smov 4  }
 0x149   :  { %v244_v32 = vadd.f32 %v231_v52, %v226_v46 }
 0x14b   :  { %v248_v36 = vadd.f32 %v244_v32, %v243_v29 }
 0x14d   :  { %v250_v43 = vadd.f32 %v248_v36, %v247_v38 }
 0x14f   :  { %v251_v53 = vadd.f32 %v250_v43, %v249_v62 }
 0x151   :  { %v3289_v57 = vadd.f32 %v251_v53, %v236_v41 }
 0x153   :  { %v253_v58 = vmul.f32 %v3289_v57, %v105_v44 }
 0x155   :  { %v254_v47 = vadd.f32 %v253_v58, %v3156_v0 }
 0x157   :  { %277 = vperm.xlu0 %2615, %v254_v47   ;;  %262 = vperm.xlu2 %2612, %v254_v47  }
 0x158   :  { %257 = vperm.xlu1 %2611, %v254_v47  }
 0x15f   :  { %2614 = vset.pattern.permute.xlu2 %v4230_v4  ;;  %2620 = vset.pattern.permute.xlu0 %v4220_v5 }
 0x160   :  { %2613 = vset.pattern.permute.xlu1 %v4222_v1  ;;  %272 = vperm.xlu2 %2614, %v254_v47  }
 0x161   :  { %267 = vperm.xlu1 %2613, %v254_v47  }
 0x168   :  { %2617 = vset.pattern.permute.xlu2 %v4224_v7 }
 0x169   :  { %2616 = vset.pattern.permute.xlu1 %v4228_v6  ;;  %287 = vperm.xlu2 %2617, %v254_v47  }
 0x16a   :  { %282 = vperm.xlu1 %2616, %v254_v47  }
 0x171   :  { %2619 = vset.pattern.permute.xlu2 %v4218_v2 }
 0x172   :  { %2618 = vset.pattern.permute.xlu1 %v4226_v8 }
 0x173   :  { %292 = vperm.xlu1 %2618, %v254_v47  }
 0x17b   :  { %2621 = vset.pattern.permute.xlu1 %v4222_v1 }
 0x1b1   :  { %v263_v46 = vpop.permute.xlu2 %262 }
 0x1b2   :  { %v265_v56 = vmul.f32 %v263_v46, %v3182_v16  ;;  %v4339_v46 = vmov 8  }
 0x1ba   :  { %v273_v50 = vpop.permute.xlu2 %272 }
 0x1bb   :  { %v275_v10 = vmul.f32 %v273_v50, %v3186_v19  ;;  %v4341_v50 = vmov 10  }
 0x1c3   :  { %v288_v63 = vpop.permute.xlu2 %287 }
 0x1c4   :  { %v290_v52 = vmul.f32 %v288_v63, %v3199_v25  ;;  %v4344_v63 = vmov 15  }
 0x1c9   :  { %v278_v13 = vpop.permute.xlu0 %277 }
 0x1ca   :  { %v258_v48 = vpop.permute.xlu1 %257  ;;  %v280_v55 = vmul.f32 %v278_v13, %v3188_v20  ;;  %v4343_v13 = vmov 13  }
 0x1cb   :  { %v260_v29 = vmul.f32 %v258_v48, %v3180_v15  ;;  %v4340_v48 = vmov 12  }
 0x1cc   :  { %v298_v35 = vadd.f32 %v280_v55, %v275_v10 }
 0x1cd   :  { %v296_v36 = vadd.f32 %v3195_v22, %v260_v29 }
 0x1d3   :  { %v268_v51 = vpop.permute.xlu1 %267 }
 0x1d4   :  { %v270_v61 = vmul.f32 %v268_v51, %v3184_v18  ;;  %v4342_v51 = vmov 14  }
 0x1d6   :  { %v297_v38 = vadd.f32 %v270_v61, %v265_v56 }
 0x1d8   :  { %v300_v62 = vadd.f32 %v297_v38, %v296_v36 }
 0x1dc   :  { %v283_v60 = vpop.permute.xlu1 %282 }
 0x1dd   :  { %v285_v54 = vmul.f32 %v283_v60, %v3190_v21 }
 0x1df   :  { %v299_v32 = vadd.f32 %v290_v52, %v285_v54 }
 0x1e1   :  { %v301_v39 = vadd.f32 %v299_v32, %v298_v35 }
 0x1e3   :  { %v302_v41 = vadd.f32 %v301_v39, %v300_v62 }
 0x1e5   :  { %v293_v43 = vpop.permute.xlu1 %292 }
 0x1e6   :  { %v295_v53 = vmul.f32 %v293_v43, %v3207_v34 }
 0x1e8   :  { %v303_v58 = vadd.f32 %v302_v41, %v295_v53 }
 0x1ea   :  { %2975 = vtanh.f32 %v303_v58 }
 0x1f0   :  { %v2976_v47 = vpop.eup %2975 }
 0x1f1   :  { %317 = vperm.xlu1 %2621, %v2976_v47   ;;  %312 = vperm.xlu0 %2620, %v2976_v47  }
 0x1f2   :  { %307 = vperm.xlu2 %2619, %v2976_v47  }
 0x1f9   :  { %2623 = vset.pattern.permute.xlu1 %v4232_v3  ;;  %2625 = vset.pattern.permute.xlu0 %v4224_v7 }
 0x1fa   :  { %2622 = vset.pattern.permute.xlu2 %v4230_v4  ;;  %327 = vperm.xlu1 %2623, %v2976_v47  }
 0x1fb   :  { %337 = vperm.xlu0 %2625, %v2976_v47   ;;  %322 = vperm.xlu2 %2622, %v2976_v47  }
 0x202   :  { %2626 = vset.pattern.permute.xlu1 %v4226_v8 }
 0x203   :  { %2630 = vset.pattern.permute.xlu0 %v4214_v49  ;;  %2624 = vset.pattern.permute.xlu2 %v4228_v6 }
 0x204   :  { %342 = vperm.xlu1 %2626, %v2976_v47   ;;  %362 = vperm.xlu0 %2630, %v2976_v47  }
 0x205   :  { %332 = vperm.xlu2 %2624, %v2976_v47  }
 0x20c   :  { %2628 = vset.pattern.permute.xlu1 %v4216_v45  ;;  %2635 = vset.pattern.permute.xlu0 %v4218_v2 }
 0x20d   :  { %2627 = vset.pattern.permute.xlu2 %v4339_v46  ;;  %352 = vperm.xlu1 %2628, %v2976_v47  }
 0x20e   :  { %347 = vperm.xlu2 %2627, %v2976_v47  }
 0x215   :  { %2631 = vset.pattern.permute.xlu1 %v4340_v48 }
 0x216   :  { %2629 = vset.pattern.permute.xlu2 %v4341_v50  ;;  %367 = vperm.xlu1 %2631, %v2976_v47  }
 0x217   :  { %357 = vperm.xlu2 %2629, %v2976_v47  }
 0x21e   :  { %2633 = vset.pattern.permute.xlu1 %v4342_v51 }
 0x21f   :  { %2632 = vset.pattern.permute.xlu2 %v4343_v13  ;;  %377 = vperm.xlu1 %2633, %v2976_v47  }
 0x220   :  { %372 = vperm.xlu2 %2632, %v2976_v47  }
 0x227   :  { %2636 = vset.pattern.permute.xlu1 %v4220_v5 }
 0x228   :  { %2634 = vset.pattern.permute.xlu2 %v4344_v63 }
 0x229   :  { %382 = vperm.xlu2 %2634, %v2976_v47  }
 0x231   :  { %2637 = vset.pattern.permute.xlu2 %v4222_v1 }
 0x24c   :  { %v308_v55 = vpop.permute.xlu2 %307 }
 0x24d   :  { %v310_v45 = vmul.f32 %v308_v55, %v3233_v12 }
 0x255   :  { %v323_v60 = vpop.permute.xlu2 %322 }
 0x256   :  { %v325_v43 = vmul.f32 %v323_v60, %v3238_v14 }
 0x25f   :  { %v333_v54 = vpop.permute.xlu2 %332 }
 0x260   :  { %v335_v47 = vmul.f32 %v333_v54, %v3240_v17 }
 0x263   :  { %v318_v61 = vpop.permute.xlu1 %317  ;;  %v313_v29 = vpop.permute.xlu0 %312 }
 0x264   :  { %v320_v41 = vmul.f32 %v318_v61, %v3244_v24  ;;  %v315_v53 = vmul.f32 %v313_v29, %v3231_v11 }
 0x266   :  { %v387_v7 = vadd.f32 %v320_v41, %v315_v53 }
 0x268   :  { %v348_v10 = vpop.permute.xlu2 %347 }
 0x269   :  { %v350_v61 = vmul.f32 %v348_v10, %v3242_v23 }
 0x26c   :  { %v328_v52 = vpop.permute.xlu1 %327 }
 0x26d   :  { %v338_v38 = vpop.permute.xlu0 %337  ;;  %v330_v39 = vmul.f32 %v328_v52, %v3246_v26 }
 0x26e   :  { %v340_v62 = vmul.f32 %v338_v38, %v3229_v9 }
 0x26f   :  { %v388_v2 = vadd.f32 %v330_v39, %v325_v43  ;;  %v386_v39 = vadd.f32 %v3261_v33, %v310_v45 }
 0x270   :  { %v389_v1 = vadd.f32 %v340_v62, %v335_v47 }
 0x271   :  { %v358_v35 = vpop.permute.xlu2 %357  ;;  %v394_v47 = vadd.f32 %v387_v7, %v386_v39  ;;  %v4349_v7 = vmov 2  }
 0x272   :  { %v360_v52 = vmul.f32 %v358_v35, %v3253_v30  ;;  %v395_v62 = vadd.f32 %v389_v1, %v388_v2  ;;  %v4345_v1 = vmov 3   ;;  %v4346_v2 = vmov 5  }
 0x274   :  { %v398_v10 = vadd.f32 %v395_v62, %v394_v47 }
 0x276   :  { %v343_v56 = vpop.permute.xlu1 %342  ;;  %v363_v5 = vpop.permute.xlu0 %362 }
 0x277   :  { %v345_v38 = vmul.f32 %v343_v56, %v3248_v27  ;;  %v365_v8 = vmul.f32 %v363_v5, %v3255_v31 }
 0x279   :  { %v390_v35 = vadd.f32 %v350_v61, %v345_v38 }
 0x27a   :  { %v373_v58 = vpop.permute.xlu2 %372 }
 0x27b   :  { %v375_v54 = vmul.f32 %v373_v58, %v3271_v42 }
 0x27f   :  { %v353_v32 = vpop.permute.xlu1 %352 }
 0x280   :  { %v355_v49 = vmul.f32 %v353_v32, %v3250_v28 }
 0x282   :  { %v391_v32 = vadd.f32 %v360_v52, %v355_v49 }
 0x283   :  { %v383_v53 = vpop.permute.xlu2 %382 }
 0x284   :  { %v385_v5 = vmul.f32 %v383_v53, %v3285_v59 }
 0x288   :  { %v368_v36 = vpop.permute.xlu1 %367 }
 0x289   :  { %v370_v60 = vmul.f32 %v368_v36, %v3265_v37  ;;  %v396_v36 = vadd.f32 %v391_v32, %v390_v35 }
 0x28b   :  { %v392_v43 = vadd.f32 %v370_v60, %v365_v8  ;;  %v4350_v8 = vmov 1  }
 0x291   :  { %v378_v29 = vpop.permute.xlu1 %377 }
 0x292   :  { %v380_v55 = vmul.f32 %v378_v29, %v3268_v40 }
 0x294   :  { %v393_v56 = vadd.f32 %v380_v55, %v375_v54 }
 0x296   :  { %v397_v41 = vadd.f32 %v393_v56, %v392_v43 }
 0x298   :  { %v399_v6 = vadd.f32 %v397_v41, %v396_v36 }
 0x29a   :  { %v400_v4 = vadd.f32 %v399_v6, %v398_v10  ;;  %v4347_v6 = vmov 7  }
 0x29c   :  { %v3345_v58 = vadd.f32 %v400_v4, %v385_v5  ;;  %v4348_v4 = vmov 6  }
 0x29e   :  { %v402_v49 = vmul.f32 %v3345_v58, %v105_v44  ;;  %v4351_v44 = vmov 0  }
 0x2a0   :  { %v403_v45 = vadd.f32 %v402_v49, %v3156_v0 }
 0x2a2   :  { %416 = vperm.xlu2 %2637, %v403_v45   ;;  %411 = vperm.xlu1 %2636, %v403_v45  }
 0x2a3   :  { %406 = vperm.xlu0 %2635, %v403_v45  }
 0x2aa   :  { %2639 = vset.pattern.permute.xlu2 %v4232_v3  ;;  %2638 = vset.pattern.permute.xlu1 %v4345_v1 }
 0x2ab   :  { %2640 = vset.pattern.permute.xlu0 %v4346_v2  ;;  %426 = vperm.xlu2 %2639, %v403_v45  }
 0x2ac   :  { %421 = vperm.xlu1 %2638, %v403_v45   ;;  %431 = vperm.xlu0 %2640, %v403_v45  }
 0x2b3   :  { %2642 = vset.pattern.permute.xlu2 %v4347_v6 }
 0x2b4   :  { %2641 = vset.pattern.permute.xlu1 %v4348_v4  ;;  %441 = vperm.xlu2 %2642, %v403_v45  }
 0x2b5   :  { %436 = vperm.xlu1 %2641, %v403_v45   ;;  %2645 = vset.pattern.permute.xlu0 %v4349_v7 }
 0x2bc   :  { %2644 = vset.pattern.permute.xlu2 %v4350_v8 }
 0x2bd   :  { %2643 = vset.pattern.permute.xlu1 %v4351_v44 }
 0x2fc   :  { %v417_v38 = vpop.permute.xlu2 %416 }
 0x2fd   :  { %v419_v39 = vmul.f32 %v417_v38, %v3184_v18 }
 0x305   :  { %v427_v29 = vpop.permute.xlu2 %426 }
 0x306   :  { %v429_v35 = vmul.f32 %v427_v29, %v3188_v20  ;;  %v4352_v29 = vmov 9  }
 0x30e   :  { %v442_v5 = vpop.permute.xlu2 %441 }
 0x314   :  { %v412_v52 = vpop.permute.xlu1 %411 }
 0x315   :  { %v407_v60 = vpop.permute.xlu0 %406  ;;  %v414_v54 = vmul.f32 %v412_v52, %v3182_v16  ;;  %v444_v52 = vmul.f32 %v442_v5, %v3207_v34 }
 0x316   :  { %v409_v32 = vmul.f32 %v407_v60, %v3180_v15 }
 0x317   :  { %v446_v56 = vadd.f32 %v419_v39, %v414_v54  ;;  %v4353_v54 = vmov 11  }
 0x318   :  { %v445_v47 = vadd.f32 %v3195_v22, %v409_v32 }
 0x31a   :  { %v449_v49 = vadd.f32 %v446_v56, %v445_v47 }
 0x31e   :  { %v422_v61 = vpop.permute.xlu1 %421  ;;  %v432_v55 = vpop.permute.xlu0 %431 }
 0x31f   :  { %v424_v62 = vmul.f32 %v422_v61, %v3186_v19  ;;  %v434_v36 = vmul.f32 %v432_v55, %v3190_v21 }
 0x321   :  { %v447_v53 = vadd.f32 %v429_v35, %v424_v62 }
 0x327   :  { %v437_v43 = vpop.permute.xlu1 %436 }
 0x328   :  { %v439_v41 = vmul.f32 %v437_v43, %v3199_v25 }
 0x32a   :  { %v448_v10 = vadd.f32 %v439_v41, %v434_v36 }
 0x32c   :  { %v450_v45 = vadd.f32 %v448_v10, %v447_v53 }
 0x32e   :  { %v451_v38 = vadd.f32 %v450_v45, %v449_v49 }
 0x330   :  { %v452_v60 = vadd.f32 %v451_v38, %v444_v52 }
 0x332   :  { %2977 = vtanh.f32 %v452_v60 }
 0x338   :  { %v2978_v61 = vpop.eup %2977 }
 0x339   :  { %466 = vperm.xlu0 %2645, %v2978_v61   ;;  %461 = vperm.xlu2 %2644, %v2978_v61  }
 0x33a   :  { %456 = vperm.xlu1 %2643, %v2978_v61  }
 0x341   :  { %2650 = vset.pattern.permute.xlu0 %v4347_v6  ;;  %2647 = vset.pattern.permute.xlu2 %v4232_v3 }
 0x342   :  { %2646 = vset.pattern.permute.xlu1 %v4345_v1  ;;  %491 = vperm.xlu0 %2650, %v2978_v61  }
 0x343   :  { %476 = vperm.xlu2 %2647, %v2978_v61   ;;  %471 = vperm.xlu1 %2646, %v2978_v61  }
 0x34a   :  { %2655 = vset.pattern.permute.xlu0 %v4340_v48 }
 0x34b   :  { %2649 = vset.pattern.permute.xlu2 %v4348_v4  ;;  %2648 = vset.pattern.permute.xlu1 %v4346_v2 }
 0x34c   :  { %516 = vperm.xlu0 %2655, %v2978_v61   ;;  %486 = vperm.xlu2 %2649, %v2978_v61  }
 0x34d   :  { %481 = vperm.xlu1 %2648, %v2978_v61  }
 0x354   :  { %2652 = vset.pattern.permute.xlu2 %v4352_v29  ;;  %2660 = vset.pattern.permute.xlu0 %v4350_v8 }
 0x355   :  { %2651 = vset.pattern.permute.xlu1 %v4339_v46  ;;  %501 = vperm.xlu2 %2652, %v2978_v61  }
 0x356   :  { %496 = vperm.xlu1 %2651, %v2978_v61  }
 0x35d   :  { %2654 = vset.pattern.permute.xlu2 %v4353_v54 }
 0x35e   :  { %2653 = vset.pattern.permute.xlu1 %v4341_v50  ;;  %511 = vperm.xlu2 %2654, %v2978_v61  }
 0x35f   :  { %506 = vperm.xlu1 %2653, %v2978_v61  }
 0x366   :  { %2657 = vset.pattern.permute.xlu2 %v4342_v51 }
 0x367   :  { %2656 = vset.pattern.permute.xlu1 %v4343_v13  ;;  %526 = vperm.xlu2 %2657, %v2978_v61  }
 0x368   :  { %521 = vperm.xlu1 %2656, %v2978_v61  }
 0x36f   :  { %2659 = vset.pattern.permute.xlu2 %v4351_v44 }
 0x370   :  { %2658 = vset.pattern.permute.xlu1 %v4344_v63 }
 0x371   :  { %531 = vperm.xlu1 %2658, %v2978_v61  }
 0x379   :  { %2661 = vset.pattern.permute.xlu1 %v4349_v7 }
 0x393   :  { %v462_v32 = vpop.permute.xlu2 %461 }
 0x394   :  { %v464_v3 = vmul.f32 %v462_v32, %v3231_v11 }
 0x39d   :  { %v477_v39 = vpop.permute.xlu2 %476 }
 0x39e   :  { %v479_v63 = vmul.f32 %v477_v39, %v3246_v26 }
 0x3a6   :  { %v487_v35 = vpop.permute.xlu2 %486 }
 0x3a7   :  { %v489_v60 = vmul.f32 %v487_v35, %v3229_v9 }
 0x3ab   :  { %v467_v56 = vpop.permute.xlu0 %466 }
 0x3ac   :  { %v457_v55 = vpop.permute.xlu1 %456  ;;  %v469_v49 = vmul.f32 %v467_v56, %v3244_v24 }
 0x3ad   :  { %v459_v45 = vmul.f32 %v457_v55, %v3233_v12 }
 0x3ae   :  { %v536_v55 = vadd.f32 %v469_v49, %v464_v3 }
 0x3af   :  { %v502_v47 = vpop.permute.xlu2 %501 }
 0x3b0   :  { %v504_v51 = vmul.f32 %v502_v47, %v3250_v28 }
 0x3b4   :  { %v492_v41 = vpop.permute.xlu0 %491 }
 0x3b5   :  { %v472_v62 = vpop.permute.xlu1 %471 }
 0x3b6   :  { %v474_v52 = vmul.f32 %v472_v62, %v3238_v14  ;;  %v535_v62 = vadd.f32 %v3261_v33, %v459_v45  ;;  %v494_v14 = vmul.f32 %v492_v41, %v3248_v27 }
 0x3b8   :  { %v512_v53 = vpop.permute.xlu2 %511  ;;  %v537_v35 = vadd.f32 %v479_v63, %v474_v52  ;;  %v701_v52 = vmul.f32 2.0, %v3345_v58 }
 0x3be   :  { %v517_v38 = vpop.permute.xlu0 %516 }
 0x3bf   :  { %v482_v43 = vpop.permute.xlu1 %481 }
 0x3c0   :  { %v484_v5 = vmul.f32 %v482_v43, %v3240_v17  ;;  %v519_v43 = vmul.f32 %v517_v38, %v3265_v37 }
 0x3c1   :  { %v527_v48 = vpop.permute.xlu2 %526 }
 0x3c2   :  { %v538_v17 = vadd.f32 %v489_v60, %v484_v5  ;;  %v529_v32 = vmul.f32 %v527_v48, %v3268_v40  ;;  %v551_v48 = vstv %s102_s24 }
 0x3c4   :  { %v544_v12 = vadd.f32 %v538_v17, %v537_v35 }
 0x3c8   :  { %v497_v36 = vpop.permute.xlu1 %496 }
 0x3c9   :  { %v499_v56 = vmul.f32 %v497_v36, %v3242_v23  ;;  %v543_v36 = vadd.f32 %v536_v55, %v535_v62 }
 0x3cb   :  { %v539_v38 = vadd.f32 %v499_v56, %v494_v14  ;;  %v547_v45 = vadd.f32 %v544_v12, %v543_v36  ;;  %v4354_v12 = vmov 4  }
 0x3d1   :  { %v507_v10 = vpop.permute.xlu1 %506 }
 0x3d2   :  { %v509_v61 = vmul.f32 %v507_v10, %v3253_v30  ;;  %v514_v10 = vmul.f32 %v512_v53, %v3255_v31 }
 0x3d4   :  { %v540_v39 = vadd.f32 %v509_v61, %v504_v51  ;;  %v541_v47 = vadd.f32 %v519_v43, %v514_v10 }
 0x3d6   :  { %v545_v3 = vadd.f32 %v540_v39, %v539_v38 }
 0x3da   :  { %v522_v24 = vpop.permute.xlu1 %521 }
 0x3db   :  { %v524_v30 = vmul.f32 %v522_v24, %v3271_v42  ;;  %v702_v24 = vadd.f32 %v701_v52, %v3289_v57 }
 0x3dd   :  { %v542_v5 = vadd.f32 %v529_v32, %v524_v30 }
 0x3df   :  { %v546_v49 = vadd.f32 %v542_v5, %v541_v47 }
 0x3e1   :  { %v548_v60 = vadd.f32 %v546_v49, %v545_v3 }
 0x3e3   :  { %v549_v41 = vadd.f32 %v548_v60, %v547_v45  ;;  %v532_v63 = vpop.permute.xlu1 %531 }
 0x3e4   :  { %v534_v53 = vmul.f32 %v532_v63, %v3285_v59 }
 0x3e6   :  { %v550_v51 = vadd.f32 %v549_v41, %v534_v53 }
 0x3e8   :  { %v552_v61 = vmul.f32 %v551_v48, %v550_v51  ;;  %v703_v17 = vmul.f32 2.0, %v550_v51 }
 0x3ea   :  { %v553_v14 = vadd.f32 %v552_v61, %v3156_v0  ;;  %v3404_v30 = vadd.f32 %v703_v17, %v702_v24  ;;  %v4356_v61 = vmov 12   ;;  %v4357_v17 = vmov 15  }
 0x3ec   :  { %566 = vperm.xlu1 %2661, %v553_v14   ;;  %561 = vperm.xlu0 %2660, %v553_v14  }
 0x3ed   :  { %556 = vperm.xlu2 %2659, %v553_v14  }
 0x3f4   :  { %2663 = vset.pattern.permute.xlu1 %v4354_v12  ;;  %2665 = vset.pattern.permute.xlu0 %v4348_v4 }
 0x3f5   :  { %2662 = vset.pattern.permute.xlu2 %v4345_v1  ;;  %576 = vperm.xlu1 %2663, %v553_v14  }
 0x3f6   :  { %586 = vperm.xlu0 %2665, %v553_v14   ;;  %571 = vperm.xlu2 %2662, %v553_v14  }
 0x3fd   :  { %2666 = vset.pattern.permute.xlu1 %v4347_v6 }
 0x3fe   :  { %2664 = vset.pattern.permute.xlu2 %v4346_v2  ;;  %591 = vperm.xlu1 %2666, %v553_v14  }
 0x3ff   :  { %581 = vperm.xlu2 %2664, %v553_v14   ;;  %2670 = vset.pattern.permute.xlu0 %v4345_v1 }
 0x406   :  { %2668 = vset.pattern.permute.xlu1 %v4350_v8 }
 0x407   :  { %2667 = vset.pattern.permute.xlu2 %v4351_v44 }
 0x447   :  { %v557_v57 = vpop.permute.xlu2 %556 }
 0x448   :  { %v559_v38 = vmul.f32 %v557_v57, %v3180_v15 }
 0x44a   :  { %v595_v60 = vadd.f32 %v3195_v22, %v559_v38  ;;  %v4355_v22 = vmov 14  }
 0x450   :  { %v572_v58 = vpop.permute.xlu2 %571 }
 0x451   :  { %v574_v32 = vmul.f32 %v572_v58, %v3186_v19 }
 0x459   :  { %v582_v55 = vpop.permute.xlu2 %581 }
 0x45a   :  { %v584_v5 = vmul.f32 %v582_v55, %v3190_v21 }
 0x45e   :  { %v567_v43 = vpop.permute.xlu1 %566  ;;  %v562_v56 = vpop.permute.xlu0 %561 }
 0x45f   :  { %v569_v62 = vmul.f32 %v567_v43, %v3184_v18  ;;  %v564_v35 = vmul.f32 %v562_v56, %v3182_v16 }
 0x461   :  { %v596_v49 = vadd.f32 %v569_v62, %v564_v35 }
 0x463   :  { %v599_v63 = vadd.f32 %v596_v49, %v595_v60  ;;  %v4358_v49 = vld [vmem:[#allocation16_spill] sm:$0xff] }
 0x467   :  { %v577_v10 = vpop.permute.xlu1 %576 }
 0x468   :  { %v579_v39 = vmul.f32 %v577_v10, %v3188_v20  ;;  %v587_v47 = vpop.permute.xlu0 %586 }
 0x469   :  { %v589_v36 = vmul.f32 %v587_v47, %v3199_v25 }
 0x46a   :  { %v597_v3 = vadd.f32 %v579_v39, %v574_v32 }
 0x46b   :  { %v598_v45 = vadd.f32 %v589_v36, %v584_v5 }
 0x46d   :  { %v600_v41 = vadd.f32 %v598_v45, %v597_v3 }
 0x46f   :  { %v601_v48 = vadd.f32 %v600_v41, %v599_v63  ;;  %v4359_v41 = vld [vmem:[#allocation14_spill] sm:$0xff] }
 0x470   :  { %v592_v52 = vpop.permute.xlu1 %591 }
 0x471   :  { %v594_v53 = vmul.f32 %v592_v52, %v3207_v34  ;;  %v4360_v52 = vld [vmem:[#allocation18_spill] sm:$0xff] }
 0x473   :  { %v602_v51 = vadd.f32 %v601_v48, %v594_v53  ;;  %v4361_v48 = vld [vmem:[#allocation15_spill] sm:$0xff] }
 0x475   :  { %2979 = vtanh.f32 %v602_v51 }
 0x47b   :  { %v2980_v24 = vpop.eup %2979 }
 0x47c   :  { %621 = vperm.xlu0 %2670, %v2980_v24   ;;  %611 = vperm.xlu1 %2668, %v2980_v24  }
 0x47d   :  { %606 = vperm.xlu2 %2667, %v2980_v24  }
 0x484   :  { %2675 = vset.pattern.permute.xlu0 %v4339_v46  ;;  %2671 = vset.pattern.permute.xlu1 %v4354_v12 }
 0x485   :  { %2669 = vset.pattern.permute.xlu2 %v4349_v7  ;;  %646 = vperm.xlu0 %2675, %v2980_v24  }
 0x486   :  { %626 = vperm.xlu1 %2671, %v2980_v24   ;;  %616 = vperm.xlu2 %2669, %v2980_v24  }
 0x48d   :  { %2680 = vset.pattern.permute.xlu0 %v4343_v13 }
 0x48e   :  { %2673 = vset.pattern.permute.xlu1 %v4348_v4  ;;  %2672 = vset.pattern.permute.xlu2 %v4346_v2 }
 0x48f   :  { %671 = vperm.xlu0 %2680, %v2980_v24   ;;  %636 = vperm.xlu1 %2673, %v2980_v24  }
 0x490   :  { %631 = vperm.xlu2 %2672, %v2980_v24  }
 0x497   :  { %2676 = vset.pattern.permute.xlu1 %v4352_v29  ;;  %2685 = vset.pattern.permute.xlu0 %v4349_v7 }
 0x498   :  { %2674 = vset.pattern.permute.xlu2 %v4347_v6  ;;  %651 = vperm.xlu1 %2676, %v2980_v24  }
 0x499   :  { %641 = vperm.xlu2 %2674, %v2980_v24  }
 0x4a0   :  { %2678 = vset.pattern.permute.xlu1 %v4353_v54 }
 0x4a1   :  { %2677 = vset.pattern.permute.xlu2 %v4341_v50  ;;  %661 = vperm.xlu1 %2678, %v2980_v24  }
 0x4a2   :  { %656 = vperm.xlu2 %2677, %v2980_v24  }
 0x4a9   :  { %2681 = vset.pattern.permute.xlu1 %v4355_v22 }
 0x4aa   :  { %2679 = vset.pattern.permute.xlu2 %v4356_v61  ;;  %676 = vperm.xlu1 %2681, %v2980_v24   ;;  %v4362_v61 = vld [vmem:[#allocation22_spill] sm:$0xff] }
 0x4ab   :  { %666 = vperm.xlu2 %2679, %v2980_v24  }
 0x4b2   :  { %2683 = vset.pattern.permute.xlu1 %v4351_v44 }
 0x4b3   :  { %2682 = vset.pattern.permute.xlu2 %v4357_v17 }
 0x4b4   :  { %681 = vperm.xlu2 %2682, %v2980_v24  }
 0x4bc   :  { %2684 = vset.pattern.permute.xlu2 %v4350_v8 }
 0x4d7   :  { %v607_v14 = vpop.permute.xlu2 %606 }
 0x4d8   :  { %v609_v63 = vmul.f32 %v607_v14, %v4359_v41 }
 0x4e0   :  { %v617_v58 = vpop.permute.xlu2 %616 }
 0x4e1   :  { %v619_v53 = vmul.f32 %v617_v58, %v4360_v52 }
 0x4ea   :  { %v632_v56 = vpop.permute.xlu2 %631 }
 0x4eb   :  { %v634_v45 = vmul.f32 %v632_v56, %v4358_v49 }
 0x4ee   :  { %v612_v57 = vpop.permute.xlu1 %611  ;;  %v622_v35 = vpop.permute.xlu0 %621 }
 0x4ef   :  { %v614_v5 = vmul.f32 %v612_v57, %v3231_v11  ;;  %v624_v51 = vmul.f32 %v622_v35, %v4361_v48 }
 0x4f3   :  { %v642_v62 = vpop.permute.xlu2 %641 }
 0x4f4   :  { %v644_v11 = vmul.f32 %v642_v62, %v3248_v27 }
 0x4f7   :  { %v647_v39 = vpop.permute.xlu0 %646 }
 0x4f8   :  { %v627_v43 = vpop.permute.xlu1 %626  ;;  %v649_v17 = vmul.f32 %v647_v39, %v3242_v23 }
 0x4f9   :  { %v629_v36 = vmul.f32 %v627_v43, %v3246_v26  ;;  %v686_v43 = vadd.f32 %v619_v53, %v614_v5 }
 0x4fa   :  { %v689_v39 = vadd.f32 %v649_v17, %v644_v11 }
 0x4fb   :  { %v687_v56 = vadd.f32 %v629_v36, %v624_v51 }
 0x4fc   :  { %v657_v32 = vpop.permute.xlu2 %656 }
 0x501   :  { %v637_v55 = vpop.permute.xlu1 %636  ;;  %v672_v24 = vpop.permute.xlu0 %671 }
 0x502   :  { %v639_v38 = vmul.f32 %v637_v55, %v3229_v9  ;;  %v659_v55 = vmul.f32 %v657_v32, %v4362_v61 }
 0x504   :  { %v688_v9 = vadd.f32 %v639_v38, %v634_v45 }
 0x505   :  { %v667_v3 = vpop.permute.xlu2 %666 }
 0x506   :  { %v669_v14 = vmul.f32 %v667_v3, %v3265_v37  ;;  %v694_v23 = vadd.f32 %v688_v9, %v687_v56 }
 0x50a   :  { %v652_v10 = vpop.permute.xlu1 %651 }
 0x50b   :  { %v654_v60 = vmul.f32 %v652_v10, %v3250_v28  ;;  %v674_v10 = vmul.f32 %v672_v24, %v3271_v42  ;;  %v685_v28 = vadd.f32 %v3261_v33, %v609_v63 }
 0x50d   :  { %v690_v58 = vadd.f32 %v659_v55, %v654_v60  ;;  %v706_v60 = vstv %s103_s25 }
 0x50e   :  { %v682_v62 = vpop.permute.xlu2 %681 }
 0x50f   :  { %v695_v5 = vadd.f32 %v690_v58, %v689_v39  ;;  %v684_v51 = vmul.f32 %v682_v62, %v3285_v59 }
 0x513   :  { %v662_v47 = vpop.permute.xlu1 %661 }
 0x514   :  { %v664_v57 = vmul.f32 %v662_v47, %v3255_v31  ;;  %v693_v47 = vadd.f32 %v686_v43, %v685_v28 }
 0x516   :  { %v691_v32 = vadd.f32 %v669_v14, %v664_v57  ;;  %v697_v36 = vadd.f32 %v694_v23, %v693_v47 }
 0x51c   :  { %v677_v26 = vpop.permute.xlu1 %676 }
 0x51d   :  { %v679_v35 = vmul.f32 %v677_v26, %v3268_v40 }
 0x51f   :  { %v692_v38 = vadd.f32 %v679_v35, %v674_v10  ;;  %v3489_v35 = vld [vmem:[%s4198_s5] ss:$0 sm:$0xff] }
 0x521   :  { %v696_v45 = vadd.f32 %v692_v38, %v691_v32 }
 0x523   :  { %v698_v53 = vadd.f32 %v696_v45, %v695_v5 }
 0x525   :  { %v699_v24 = vadd.f32 %v698_v53, %v697_v36 }
 0x527   :  { %v700_v3 = vadd.f32 %v699_v24, %v684_v51 }
 0x529   :  { %v705_v26 = vadd.f32 %v3404_v30, %v700_v3  ;;  %v4363_v3 = vmov 12  }
 0x52b   :  { %v707_v9 = vmul.f32 %v706_v60, %v705_v26  ;;  %v4364_v60 = vmov 15  }
 0x52d   :  { %v3460_v11 = vadd.f32 %v707_v9, %v3156_v0 }
 0x52f   :  { %725 = vperm.xlu0 %2685, %v3460_v11   ;;  %720 = vperm.xlu2 %2684, %v3460_v11   ;;  %2532 = vst.msk [vmem:[#allocation8 + $0x4] sm:$0xf] %vm2530_vm0, %v3460_v11 }
 0x530   :  { %715 = vperm.xlu1 %2683, %v3460_v11  }
 0x537   :  { %2690 = vset.pattern.permute.xlu0 %v4347_v6  ;;  %2687 = vset.pattern.permute.xlu2 %v4354_v12 }
 0x538   :  { %2686 = vset.pattern.permute.xlu1 %v4345_v1  ;;  %750 = vperm.xlu0 %2690, %v3460_v11  }
 0x539   :  { %735 = vperm.xlu2 %2687, %v3460_v11   ;;  %730 = vperm.xlu1 %2686, %v3460_v11  }
 0x540   :  { %2695 = vset.pattern.permute.xlu0 %v4354_v12 }
 0x541   :  { %2689 = vset.pattern.permute.xlu2 %v4348_v4  ;;  %2688 = vset.pattern.permute.xlu1 %v4346_v2 }
 0x542   :  { %745 = vperm.xlu2 %2689, %v3460_v11   ;;  %740 = vperm.xlu1 %2688, %v3460_v11  }
 0x54a   :  { %2692 = vset.pattern.permute.xlu2 %v4350_v8  ;;  %2691 = vset.pattern.permute.xlu1 %v4351_v44 }
 0x589   :  { %v721_v0 = vpop.permute.xlu2 %720 }
 0x58a   :  { %v723_v57 = vmul.f32 %v721_v0, %v3182_v16 }
 0x593   :  { %v736_v28 = vpop.permute.xlu2 %735 }
 0x594   :  { %v738_v56 = vmul.f32 %v736_v28, %v3188_v20 }
 0x59c   :  { %v746_v55 = vpop.permute.xlu2 %745 }
 0x59d   :  { %v748_v14 = vmul.f32 %v746_v55, %v3199_v25 }
 0x5a1   :  { %v726_v30 = vpop.permute.xlu0 %725 }
 0x5a2   :  { %v716_v23 = vpop.permute.xlu1 %715  ;;  %v728_v17 = vmul.f32 %v726_v30, %v3184_v18 }
 0x5a3   :  { %v718_v63 = vmul.f32 %v716_v23, %v3180_v15 }
 0x5a4   :  { %v755_v58 = vadd.f32 %v728_v17, %v723_v57 }
 0x5a5   :  { %v754_v39 = vadd.f32 %v3489_v35, %v718_v63 }
 0x5a7   :  { %v758_v45 = vadd.f32 %v755_v58, %v754_v39 }
 0x5aa   :  { %v751_v5 = vpop.permute.xlu0 %750 }
 0x5ab   :  { %v731_v33 = vpop.permute.xlu1 %730  ;;  %v753_v36 = vmul.f32 %v751_v5, %v3207_v34  ;;  %v4367_v5 = vld [vmem:[#allocation13_spill] sm:$0xff] }
 0x5ac   :  { %v733_v43 = vmul.f32 %v731_v33, %v3186_v19 }
 0x5ae   :  { %v756_v38 = vadd.f32 %v738_v56, %v733_v43 }
 0x5b4   :  { %v741_v10 = vpop.permute.xlu1 %740 }
 0x5b5   :  { %v743_v32 = vmul.f32 %v741_v10, %v3190_v21  ;;  %v4365_v10 = vld [vmem:[#allocation19_spill] sm:$0xff] }
 0x5b7   :  { %v757_v47 = vadd.f32 %v748_v14, %v743_v32  ;;  %v4366_v32 = vld [vmem:[#allocation12_spill] sm:$0xff] }
 0x5b9   :  { %v759_v62 = vadd.f32 %v757_v47, %v756_v38 }
 0x5bb   :  { %v760_v53 = vadd.f32 %v759_v62, %v758_v45 }
 0x5bd   :  { %v761_v51 = vadd.f32 %v760_v53, %v753_v36 }
 0x5bf   :  { %2981 = vtanh.f32 %v761_v51  ;;  %v4368_v51 = vld [vmem:[#allocation21_spill] sm:$0xff] }
 0x5c5   :  { %v2982_v24 = vpop.eup %2981 }
 0x5c6   :  { %785 = vperm.xlu0 %2695, %v2982_v24   ;;  %770 = vperm.xlu2 %2692, %v2982_v24  }
 0x5c7   :  { %765 = vperm.xlu1 %2691, %v2982_v24  }
 0x5ce   :  { %2700 = vset.pattern.permute.xlu0 %v4352_v29  ;;  %2694 = vset.pattern.permute.xlu2 %v4345_v1 }
 0x5cf   :  { %2693 = vset.pattern.permute.xlu1 %v4349_v7  ;;  %810 = vperm.xlu0 %2700, %v2982_v24  }
 0x5d0   :  { %780 = vperm.xlu2 %2694, %v2982_v24   ;;  %775 = vperm.xlu1 %2693, %v2982_v24  }
 0x5d7   :  { %2705 = vset.pattern.permute.xlu0 %v4355_v22 }
 0x5d8   :  { %2697 = vset.pattern.permute.xlu2 %v4348_v4  ;;  %2696 = vset.pattern.permute.xlu1 %v4346_v2 }
 0x5d9   :  { %835 = vperm.xlu0 %2705, %v2982_v24   ;;  %795 = vperm.xlu2 %2697, %v2982_v24  }
 0x5da   :  { %790 = vperm.xlu1 %2696, %v2982_v24  }
 0x5e1   :  { %2699 = vset.pattern.permute.xlu2 %v4339_v46  ;;  %2710 = vset.pattern.permute.xlu0 %v4345_v1 }
 0x5e2   :  { %2698 = vset.pattern.permute.xlu1 %v4347_v6  ;;  %805 = vperm.xlu2 %2699, %v2982_v24  }
 0x5e3   :  { %800 = vperm.xlu1 %2698, %v2982_v24  }
 0x5ea   :  { %2702 = vset.pattern.permute.xlu2 %v4353_v54 }
 0x5eb   :  { %2701 = vset.pattern.permute.xlu1 %v4341_v50  ;;  %820 = vperm.xlu2 %2702, %v2982_v24  }
 0x5ec   :  { %815 = vperm.xlu1 %2701, %v2982_v24  }
 0x5f3   :  { %2704 = vset.pattern.permute.xlu2 %v4343_v13 }
 0x5f4   :  { %2703 = vset.pattern.permute.xlu1 %v4363_v3  ;;  %830 = vperm.xlu2 %2704, %v2982_v24  }
 0x5f5   :  { %825 = vperm.xlu1 %2703, %v2982_v24  }
 0x5fc   :  { %2707 = vset.pattern.permute.xlu2 %v4351_v44 }
 0x5fd   :  { %2706 = vset.pattern.permute.xlu1 %v4364_v60 }
 0x5fe   :  { %840 = vperm.xlu1 %2706, %v2982_v24  }
 0x606   :  { %2708 = vset.pattern.permute.xlu1 %v4350_v8 }
 0x620   :  { %v771_v26 = vpop.permute.xlu2 %770 }
 0x621   :  { %v773_v45 = vmul.f32 %v771_v26, %v4367_v5 }
 0x62a   :  { %v781_v0 = vpop.permute.xlu2 %780 }
 0x62b   :  { %v783_v62 = vmul.f32 %v781_v0, %v4361_v48 }
 0x633   :  { %v796_v28 = vpop.permute.xlu2 %795 }
 0x634   :  { %v798_v38 = vmul.f32 %v796_v28, %v4366_v32 }
 0x638   :  { %v786_v17 = vpop.permute.xlu0 %785 }
 0x639   :  { %v766_v9 = vpop.permute.xlu1 %765  ;;  %v788_v14 = vmul.f32 %v786_v17, %v4365_v10  ;;  %v4369_v10 = vld [vmem:[#allocation17_spill] sm:$0xff] }
 0x63a   :  { %v768_v36 = vmul.f32 %v766_v9, %v4359_v41 }
 0x63c   :  { %v806_v30 = vpop.permute.xlu2 %805 }
 0x641   :  { %v811_v57 = vpop.permute.xlu0 %810 }
 0x642   :  { %v776_v23 = vpop.permute.xlu1 %775  ;;  %v813_v24 = vmul.f32 %v811_v57, %v4368_v51  ;;  %v3528_v57 = vld [vmem:[%s4200_s7] ss:$0 sm:$0xff] }
 0x643   :  { %v778_v58 = vmul.f32 %v776_v23, %v4360_v52  ;;  %v846_v23 = vadd.f32 %v788_v14, %v783_v62  ;;  %v808_v52 = vmul.f32 %v806_v30, %v4369_v10  ;;  %4370 = vst [vmem:[#allocation27_spill] sm:$0xff] %v3528_v57 }
 0x645   :  { %v821_v55 = vpop.permute.xlu2 %820  ;;  %v845_v28 = vadd.f32 %v778_v58, %v773_v45 }
 0x64b   :  { %v836_v53 = vpop.permute.xlu0 %835 }
 0x64c   :  { %v791_v33 = vpop.permute.xlu1 %790  ;;  %v838_v26 = vmul.f32 %v836_v53, %v3268_v40 }
 0x64d   :  { %v793_v56 = vmul.f32 %v791_v33, %v4358_v49 }
 0x64e   :  { %v831_v39 = vpop.permute.xlu2 %830 }
 0x64f   :  { %v847_v13 = vadd.f32 %v798_v38, %v793_v56  ;;  %v833_v33 = vmul.f32 %v831_v39, %v3271_v42  ;;  %v844_v56 = vadd.f32 %v3528_v57, %v768_v36 }
 0x651   :  { %v851_v14 = vadd.f32 %v838_v26, %v833_v33 }
 0x655   :  { %v801_v63 = vpop.permute.xlu1 %800 }
 0x656   :  { %v803_v17 = vmul.f32 %v801_v63, %v3248_v27  ;;  %v853_v63 = vadd.f32 %v847_v13, %v846_v23 }
 0x658   :  { %v848_v39 = vadd.f32 %v808_v52, %v803_v17 }
 0x65e   :  { %v816_v43 = vpop.permute.xlu1 %815 }
 0x65f   :  { %v818_v47 = vmul.f32 %v816_v43, %v4362_v61  ;;  %v823_v43 = vmul.f32 %v821_v55, %v3255_v31  ;;  %v852_v55 = vadd.f32 %v845_v28, %v844_v56 }
 0x661   :  { %v849_v0 = vadd.f32 %v818_v47, %v813_v24  ;;  %v856_v47 = vadd.f32 %v853_v63, %v852_v55  ;;  %v4262_v24 = vstv %s3531_s30 }
 0x663   :  { %v854_v58 = vadd.f32 %v849_v0, %v848_v39 }
 0x667   :  { %v826_v49 = vpop.permute.xlu1 %825 }
 0x668   :  { %v828_v9 = vmul.f32 %v826_v49, %v3265_v37 }
 0x66a   :  { %v850_v30 = vadd.f32 %v828_v9, %v823_v43 }
 0x66c   :  { %v855_v38 = vadd.f32 %v851_v14, %v850_v30 }
 0x66e   :  { %v857_v49 = vadd.f32 %v855_v38, %v854_v58 }
 0x670   :  { %v858_v45 = vadd.f32 %v857_v49, %v856_v47  ;;  %v841_v62 = vpop.permute.xlu1 %840 }
 0x671   :  { %v843_v53 = vmul.f32 %v841_v62, %v3285_v59 }
 0x673   :  { %v3535_v42 = vadd.f32 %v858_v45, %v843_v53 }
 0x675   :  { %4371 = vst [vmem:[#allocation28_spill] sm:$0xff] %v3535_v42  ;;  %v860_v13 = vmul.f32 %v3535_v42, %v4262_v24 }
 0x677   :  { %v861_v52 = vadd.f32 %v860_v13, %v3460_v11 }
 0x679   :  { %879 = vperm.xlu0 %2710, %v861_v52   ;;  %869 = vperm.xlu1 %2708, %v861_v52  }
 0x67a   :  { %864 = vperm.xlu2 %2707, %v861_v52  }
 0x681   :  { %2711 = vset.pattern.permute.xlu1 %v4354_v12  ;;  %2715 = vset.pattern.permute.xlu0 %v4351_v44 }
 0x682   :  { %2709 = vset.pattern.permute.xlu2 %v4349_v7  ;;  %884 = vperm.xlu1 %2711, %v861_v52  }
 0x683   :  { %874 = vperm.xlu2 %2709, %v861_v52  }
 0x68a   :  { %2713 = vset.pattern.permute.xlu1 %v4348_v4 }
 0x68b   :  { %2712 = vset.pattern.permute.xlu2 %v4346_v2  ;;  %894 = vperm.xlu1 %2713, %v861_v52  }
 0x68c   :  { %889 = vperm.xlu2 %2712, %v861_v52  }
 0x693   :  { %2716 = vset.pattern.permute.xlu1 %v4350_v8 }
 0x694   :  { %2714 = vset.pattern.permute.xlu2 %v4347_v6 }
 0x695   :  { %899 = vperm.xlu2 %2714, %v861_v52  }
 0x69d   :  { %2717 = vset.pattern.permute.xlu2 %v4349_v7 }
 0x6d4   :  { %v865_v36 = vpop.permute.xlu2 %864 }
 0x6d5   :  { %v867_v0 = vmul.f32 %v865_v36, %v3180_v15 }
 0x6d7   :  { %v903_v58 = vadd.f32 %v3489_v35, %v867_v0 }
 0x6dd   :  { %v875_v17 = vpop.permute.xlu2 %874 }
 0x6de   :  { %v877_v9 = vmul.f32 %v875_v17, %v3184_v18 }
 0x6e6   :  { %v890_v28 = vpop.permute.xlu2 %889 }
 0x6e7   :  { %v892_v14 = vmul.f32 %v890_v28, %v3190_v21 }
 0x6eb   :  { %v870_v33 = vpop.permute.xlu1 %869  ;;  %v880_v26 = vpop.permute.xlu0 %879 }
 0x6ec   :  { %v872_v43 = vmul.f32 %v870_v33, %v3182_v16  ;;  %v882_v39 = vmul.f32 %v880_v26, %v3186_v19  ;;  %v4372_v33 = vmov 13  }
 0x6ee   :  { %v904_v30 = vadd.f32 %v877_v9, %v872_v43 }
 0x6ef   :  { %v900_v49 = vpop.permute.xlu2 %899 }
 0x6f0   :  { %v907_v45 = vadd.f32 %v904_v30, %v903_v58  ;;  %v902_v53 = vmul.f32 %v900_v49, %v3207_v34 }
 0x6f4   :  { %v885_v23 = vpop.permute.xlu1 %884 }
 0x6f5   :  { %v887_v56 = vmul.f32 %v885_v23, %v3188_v20 }
 0x6f7   :  { %v905_v38 = vadd.f32 %v887_v56, %v882_v39 }
 0x6fd   :  { %v895_v63 = vpop.permute.xlu1 %894 }
 0x6fe   :  { %v897_v55 = vmul.f32 %v895_v63, %v3199_v25 }
 0x700   :  { %v906_v47 = vadd.f32 %v897_v55, %v892_v14 }
 0x702   :  { %v908_v62 = vadd.f32 %v906_v47, %v905_v38 }
 0x704   :  { %v909_v13 = vadd.f32 %v908_v62, %v907_v45  ;;  %v4373_v45 = vld [vmem:[#allocation16_spill] sm:$0xff] }
 0x706   :  { %v910_v52 = vadd.f32 %v909_v13, %v902_v53  ;;  %v4374_v13 = vld [vmem:[#allocation18_spill] sm:$0xff] }
 0x708   :  { %2983 = vtanh.f32 %v910_v52 }
 0x70e   :  { %v2984_v36 = vpop.eup %2983 }
 0x70f   :  { %924 = vperm.xlu2 %2717, %v2984_v36   ;;  %919 = vperm.xlu1 %2716, %v2984_v36  }
 0x710   :  { %914 = vperm.xlu0 %2715, %v2984_v36  }
 0x717   :  { %2719 = vset.pattern.permute.xlu2 %v4354_v12  ;;  %2718 = vset.pattern.permute.xlu1 %v4345_v1 }
 0x718   :  { %2720 = vset.pattern.permute.xlu0 %v4346_v2  ;;  %934 = vperm.xlu2 %2719, %v2984_v36  }
 0x719   :  { %929 = vperm.xlu1 %2718, %v2984_v36   ;;  %939 = vperm.xlu0 %2720, %v2984_v36  }
 0x720   :  { %2722 = vset.pattern.permute.xlu2 %v4347_v6 }
 0x721   :  { %2721 = vset.pattern.permute.xlu1 %v4348_v4  ;;  %2725 = vset.pattern.permute.xlu0 %v4341_v50 }
 0x722   :  { %949 = vperm.xlu2 %2722, %v2984_v36   ;;  %944 = vperm.xlu1 %2721, %v2984_v36  }
 0x723   :  { %964 = vperm.xlu0 %2725, %v2984_v36  }
 0x72a   :  { %2724 = vset.pattern.permute.xlu2 %v4352_v29  ;;  %2723 = vset.pattern.permute.xlu1 %v4339_v46 }
 0x72b   :  { %2730 = vset.pattern.permute.xlu0 %v4364_v60  ;;  %959 = vperm.xlu2 %2724, %v2984_v36  }
 0x72c   :  { %954 = vperm.xlu1 %2723, %v2984_v36   ;;  %989 = vperm.xlu0 %2730, %v2984_v36  }
 0x733   :  { %2727 = vset.pattern.permute.xlu2 %v4363_v3 }
 0x734   :  { %2726 = vset.pattern.permute.xlu1 %v4353_v54  ;;  %974 = vperm.xlu2 %2727, %v2984_v36  }
 0x735   :  { %969 = vperm.xlu1 %2726, %v2984_v36   ;;  %2735 = vset.pattern.permute.xlu0 %v4354_v12 }
 0x73c   :  { %2729 = vset.pattern.permute.xlu2 %v4355_v22 }
 0x73d   :  { %2728 = vset.pattern.permute.xlu1 %v4372_v33  ;;  %984 = vperm.xlu2 %2729, %v2984_v36  }
 0x73e   :  { %979 = vperm.xlu1 %2728, %v2984_v36   ;;  %v4375_v36 = vld [vmem:[#allocation19_spill] sm:$0xff] }
 0x745   :  { %2732 = vset.pattern.permute.xlu2 %v4350_v8 }
 0x746   :  { %2731 = vset.pattern.permute.xlu1 %v4351_v44 }
 0x769   :  { %v925_v17 = vpop.permute.xlu2 %924 }
 0x76a   :  { %v927_v52 = vmul.f32 %v925_v17, %v4374_v13 }
 0x772   :  { %v935_v28 = vpop.permute.xlu2 %934 }
 0x773   :  { %v937_v24 = vmul.f32 %v935_v28, %v4375_v36 }
 0x77c   :  { %v950_v26 = vpop.permute.xlu2 %949 }
 0x77d   :  { %v952_v60 = vmul.f32 %v950_v26, %v3248_v27 }
 0x781   :  { %v920_v23 = vpop.permute.xlu1 %919 }
 0x782   :  { %v915_v9 = vpop.permute.xlu0 %914  ;;  %v922_v58 = vmul.f32 %v920_v23, %v4367_v5 }
 0x783   :  { %v917_v38 = vmul.f32 %v915_v9, %v4359_v41 }
 0x784   :  { %v994_v9 = vadd.f32 %v927_v52, %v922_v58 }
 0x785   :  { %v960_v56 = vpop.permute.xlu2 %959 }
 0x786   :  { %v962_v41 = vmul.f32 %v960_v56, %v4368_v51 }
 0x78b   :  { %v930_v43 = vpop.permute.xlu1 %929  ;;  %v940_v14 = vpop.permute.xlu0 %939 }
 0x78c   :  { %v932_v47 = vmul.f32 %v930_v43, %v4361_v48  ;;  %v942_v62 = vmul.f32 %v940_v14, %v4373_v45  ;;  %v993_v43 = vadd.f32 %v3528_v57, %v917_v38 }
 0x78e   :  { %v975_v39 = vpop.permute.xlu2 %974  ;;  %v995_v14 = vadd.f32 %v937_v24, %v932_v47 }
 0x794   :  { %v945_v0 = vpop.permute.xlu1 %944 }
 0x795   :  { %v947_v55 = vmul.f32 %v945_v0, %v4366_v32  ;;  %v965_v49 = vpop.permute.xlu0 %964 }
 0x796   :  { %v967_v0 = vmul.f32 %v965_v49, %v4362_v61 }
 0x797   :  { %v985_v42 = vpop.permute.xlu2 %984  ;;  %v996_v33 = vadd.f32 %v947_v55, %v942_v62 }
 0x798   :  { %v987_v17 = vmul.f32 %v985_v42, %v3268_v40  ;;  %v998_v62 = vadd.f32 %v967_v0, %v962_v41  ;;  %v4377_v42 = vstv %s3531_s30 }
 0x799   :  { %v1002_v55 = vadd.f32 %v996_v33, %v995_v14 }
 0x79e   :  { %v955_v63 = vpop.permute.xlu1 %954  ;;  %v990_v38 = vpop.permute.xlu0 %989 }
 0x79f   :  { %v957_v53 = vmul.f32 %v955_v63, %v4369_v10  ;;  %v977_v63 = vmul.f32 %v975_v39, %v3265_v37  ;;  %v4376_v10 = vld [vmem:[#allocation26_spill] sm:$0xff]  ;;  %v992_v24 = vmul.f32 %v990_v38, %v3285_v59 }
 0x7a1   :  { %v997_v28 = vadd.f32 %v957_v53, %v952_v60 }
 0x7a3   :  { %v1003_v58 = vadd.f32 %v998_v62, %v997_v28 }
 0x7a7   :  { %v970_v30 = vpop.permute.xlu1 %969 }
 0x7a8   :  { %v972_v23 = vmul.f32 %v970_v30, %v3255_v31  ;;  %v1001_v30 = vadd.f32 %v994_v9, %v993_v43 }
 0x7aa   :  { %v999_v49 = vadd.f32 %v977_v63, %v972_v23  ;;  %v1005_v57 = vadd.f32 %v1002_v55, %v1001_v30 }
 0x7b0   :  { %v980_v45 = vpop.permute.xlu1 %979 }
 0x7b1   :  { %v982_v26 = vmul.f32 %v980_v45, %v4376_v10 }
 0x7b3   :  { %v1000_v27 = vadd.f32 %v987_v17, %v982_v26 }
 0x7b5   :  { %v1004_v52 = vadd.f32 %v1000_v27, %v999_v49 }
 0x7b7   :  { %v1006_v56 = vadd.f32 %v1004_v52, %v1003_v58 }
 0x7b9   :  { %v1007_v47 = vadd.f32 %v1006_v56, %v1005_v57 }
 0x7bb   :  { %v3591_v39 = vadd.f32 %v1007_v47, %v992_v24 }
 0x7bd   :  { %v1009_v60 = vmul.f32 %v3591_v39, %v4377_v42 }
 0x7bf   :  { %v1010_v45 = vadd.f32 %v1009_v60, %v3460_v11  ;;  %v4378_v60 = vmov 13  }
 0x7c1   :  { %1033 = vperm.xlu0 %2735, %v1010_v45   ;;  %1018 = vperm.xlu2 %2732, %v1010_v45  }
 0x7c2   :  { %1013 = vperm.xlu1 %2731, %v1010_v45  }
 0x7c9   :  { %2734 = vset.pattern.permute.xlu2 %v4345_v1  ;;  %2740 = vset.pattern.permute.xlu0 %v4350_v8 }
 0x7ca   :  { %2733 = vset.pattern.permute.xlu1 %v4349_v7  ;;  %1028 = vperm.xlu2 %2734, %v1010_v45  }
 0x7cb   :  { %1023 = vperm.xlu1 %2733, %v1010_v45  }
 0x7d2   :  { %2737 = vset.pattern.permute.xlu2 %v4348_v4 }
 0x7d3   :  { %2736 = vset.pattern.permute.xlu1 %v4346_v2  ;;  %1043 = vperm.xlu2 %2737, %v1010_v45  }
 0x7d4   :  { %1038 = vperm.xlu1 %2736, %v1010_v45  }
 0x7db   :  { %2739 = vset.pattern.permute.xlu2 %v4351_v44 }
 0x7dc   :  { %2738 = vset.pattern.permute.xlu1 %v4347_v6 }
 0x7dd   :  { %1048 = vperm.xlu1 %2738, %v1010_v45   ;;  %v4379_v45 = vmov 15  }
 0x7e5   :  { %2741 = vset.pattern.permute.xlu1 %v4349_v7 }
 0x81b   :  { %v1019_v27 = vpop.permute.xlu2 %1018 }
 0x81c   :  { %v1021_v17 = vmul.f32 %v1019_v27, %v3182_v16 }
 0x824   :  { %v1029_v57 = vpop.permute.xlu2 %1028 }
 0x825   :  { %v1031_v28 = vmul.f32 %v1029_v57, %v3186_v19 }
 0x82d   :  { %v1044_v0 = vpop.permute.xlu2 %1043 }
 0x82e   :  { %v1046_v14 = vmul.f32 %v1044_v0, %v3199_v25 }
 0x833   :  { %v1034_v53 = vpop.permute.xlu0 %1033 }
 0x834   :  { %v1014_v41 = vpop.permute.xlu1 %1013  ;;  %v1036_v23 = vmul.f32 %v1034_v53, %v3188_v20 }
 0x835   :  { %v1016_v26 = vmul.f32 %v1014_v41, %v3180_v15 }
 0x836   :  { %v1054_v62 = vadd.f32 %v1036_v23, %v1031_v28 }
 0x837   :  { %v1052_v30 = vadd.f32 %v3489_v35, %v1016_v26 }
 0x83d   :  { %v1024_v33 = vpop.permute.xlu1 %1023 }
 0x83e   :  { %v1026_v9 = vmul.f32 %v1024_v33, %v3184_v18 }
 0x840   :  { %v1053_v49 = vadd.f32 %v1026_v9, %v1021_v17 }
 0x842   :  { %v1056_v52 = vadd.f32 %v1053_v49, %v1052_v30 }
 0x846   :  { %v1039_v43 = vpop.permute.xlu1 %1038 }
 0x847   :  { %v1041_v63 = vmul.f32 %v1039_v43, %v3190_v21 }
 0x849   :  { %v1055_v55 = vadd.f32 %v1046_v14, %v1041_v63 }
 0x84b   :  { %v1057_v58 = vadd.f32 %v1055_v55, %v1054_v62 }
 0x84d   :  { %v1058_v56 = vadd.f32 %v1057_v58, %v1056_v52  ;;  %v4380_v58 = vld [vmem:[#allocation16_spill] sm:$0xff] }
 0x84f   :  { %v1049_v38 = vpop.permute.xlu1 %1048 }
 0x850   :  { %v1051_v24 = vmul.f32 %v1049_v38, %v3207_v34 }
 0x852   :  { %v1059_v47 = vadd.f32 %v1058_v56, %v1051_v24  ;;  %v4381_v56 = vld [vmem:[#allocation14_spill] sm:$0xff] }
 0x854   :  { %2985 = vtanh.f32 %v1059_v47 }
 0x85a   :  { %v2986_v42 = vpop.eup %2985 }
 0x85b   :  { %1073 = vperm.xlu1 %2741, %v2986_v42   ;;  %1068 = vperm.xlu0 %2740, %v2986_v42  }
 0x85c   :  { %1063 = vperm.xlu2 %2739, %v2986_v42  }
 0x863   :  { %2743 = vset.pattern.permute.xlu1 %v4354_v12  ;;  %2745 = vset.pattern.permute.xlu0 %v4348_v4 }
 0x864   :  { %2742 = vset.pattern.permute.xlu2 %v4345_v1  ;;  %1083 = vperm.xlu1 %2743, %v2986_v42  }
 0x865   :  { %1093 = vperm.xlu0 %2745, %v2986_v42   ;;  %1078 = vperm.xlu2 %2742, %v2986_v42  }
 0x86c   :  { %2746 = vset.pattern.permute.xlu1 %v4347_v6 }
 0x86d   :  { %2750 = vset.pattern.permute.xlu0 %v4353_v54  ;;  %2744 = vset.pattern.permute.xlu2 %v4346_v2 }
 0x86e   :  { %1098 = vperm.xlu1 %2746, %v2986_v42   ;;  %1118 = vperm.xlu0 %2750, %v2986_v42  }
 0x86f   :  { %1088 = vperm.xlu2 %2744, %v2986_v42  }
 0x876   :  { %2748 = vset.pattern.permute.xlu1 %v4352_v29  ;;  %2755 = vset.pattern.permute.xlu0 %v4351_v44 }
 0x877   :  { %2747 = vset.pattern.permute.xlu2 %v4339_v46  ;;  %1108 = vperm.xlu1 %2748, %v2986_v42  }
 0x878   :  { %1103 = vperm.xlu2 %2747, %v2986_v42  }
 0x87f   :  { %2751 = vset.pattern.permute.xlu1 %v4363_v3 }
 0x880   :  { %2749 = vset.pattern.permute.xlu2 %v4341_v50  ;;  %1123 = vperm.xlu1 %2751, %v2986_v42  }
 0x881   :  { %1113 = vperm.xlu2 %2749, %v2986_v42  }
 0x888   :  { %2753 = vset.pattern.permute.xlu1 %v4355_v22 }
 0x889   :  { %2752 = vset.pattern.permute.xlu2 %v4378_v60  ;;  %1133 = vperm.xlu1 %2753, %v2986_v42  }
 0x88a   :  { %1128 = vperm.xlu2 %2752, %v2986_v42  }
 0x891   :  { %2756 = vset.pattern.permute.xlu1 %v4350_v8 }
 0x892   :  { %2754 = vset.pattern.permute.xlu2 %v4379_v45 }
 0x893   :  { %1138 = vperm.xlu2 %2754, %v2986_v42  }
 0x89b   :  { %2757 = vset.pattern.permute.xlu2 %v4349_v7 }
 0x8b6   :  { %v1064_v27 = vpop.permute.xlu2 %1063 }
 0x8b7   :  { %v1066_v24 = vmul.f32 %v1064_v27, %v4381_v56 }
 0x8bf   :  { %v1079_v57 = vpop.permute.xlu2 %1078 }
 0x8c0   :  { %v1081_v55 = vmul.f32 %v1079_v57, %v4361_v48 }
 0x8c9   :  { %v1089_v53 = vpop.permute.xlu2 %1088 }
 0x8ca   :  { %v1091_v52 = vmul.f32 %v1089_v53, %v4380_v58 }
 0x8cd   :  { %v1074_v41 = vpop.permute.xlu1 %1073  ;;  %v1069_v9 = vpop.permute.xlu0 %1068 }
 0x8ce   :  { %v1076_v62 = vmul.f32 %v1074_v41, %v4374_v13  ;;  %v1071_v49 = vmul.f32 %v1069_v9, %v4367_v5  ;;  %v4383_v41 = vld [vmem:[#allocation17_spill] sm:$0xff] }
 0x8d2   :  { %v1104_v23 = vpop.permute.xlu2 %1103 }
 0x8d3   :  { %v1106_v48 = vmul.f32 %v1104_v23, %v4383_v41 }
 0x8d6   :  { %v1084_v33 = vpop.permute.xlu1 %1083 }
 0x8d7   :  { %v1094_v63 = vpop.permute.xlu0 %1093  ;;  %v1086_v28 = vmul.f32 %v1084_v33, %v4375_v36  ;;  %v4382_v36 = vld [vmem:[#allocation20_spill] sm:$0xff] }
 0x8d8   :  { %v1096_v26 = vmul.f32 %v1094_v63, %v4366_v32  ;;  %v1143_v32 = vadd.f32 %v1076_v62, %v1071_v49 }
 0x8d9   :  { %v1144_v47 = vadd.f32 %v1086_v28, %v1081_v55  ;;  %v4384_v28 = vld [vmem:[#allocation27_spill] sm:$0xff] }
 0x8da   :  { %v1145_v45 = vadd.f32 %v1096_v26, %v1091_v52  ;;  %v1142_v55 = vadd.f32 %v4384_v28, %v1066_v24  ;;  %v4385_v24 = vld [vmem:[#allocation28_spill] sm:$0xff] }
 0x8db   :  { %v1114_v14 = vpop.permute.xlu2 %1113 }
 0x8dc   :  { %v1116_v33 = vmul.f32 %v1114_v14, %v4362_v61  ;;  %v1151_v26 = vadd.f32 %v1145_v45, %v1144_v47 }
 0x8e0   :  { %v1099_v0 = vpop.permute.xlu1 %1098  ;;  %v1119_v42 = vpop.permute.xlu0 %1118 }
 0x8e1   :  { %v1101_v63 = vmul.f32 %v1099_v0, %v4382_v36  ;;  %v1121_v5 = vmul.f32 %v1119_v42, %v3255_v31  ;;  %v1150_v36 = vadd.f32 %v1143_v32, %v1142_v55 }
 0x8e3   :  { %v1146_v14 = vadd.f32 %v1106_v48, %v1101_v63  ;;  %v1154_v23 = vadd.f32 %v1151_v26, %v1150_v36 }
 0x8e4   :  { %v1129_v30 = vpop.permute.xlu2 %1128 }
 0x8e5   :  { %v1131_v53 = vmul.f32 %v1129_v30, %v4376_v10  ;;  %v1308_v30 = vmul.f32 2.0, %v3591_v39 }
 0x8e7   :  { %v1309_v10 = vadd.f32 %v1308_v30, %v4385_v24 }
 0x8e9   :  { %v1109_v43 = vpop.permute.xlu1 %1108 }
 0x8ea   :  { %v1111_v38 = vmul.f32 %v1109_v43, %v4368_v51 }
 0x8ec   :  { %v1147_v43 = vadd.f32 %v1116_v33, %v1111_v38  ;;  %v1158_v38 = vstv %s2556_s9 }
 0x8ed   :  { %v1139_v49 = vpop.permute.xlu2 %1138 }
 0x8ee   :  { %v1141_v42 = vmul.f32 %v1139_v49, %v3285_v59 }
 0x8f2   :  { %v1124_v17 = vpop.permute.xlu1 %1123 }
 0x8f3   :  { %v1126_v57 = vmul.f32 %v1124_v17, %v3265_v37  ;;  %v1152_v17 = vadd.f32 %v1147_v43, %v1146_v14 }
 0x8f5   :  { %v1148_v52 = vadd.f32 %v1126_v57, %v1121_v5 }
 0x8fb   :  { %v1134_v9 = vpop.permute.xlu1 %1133 }
 0x8fc   :  { %v1136_v27 = vmul.f32 %v1134_v9, %v3268_v40 }
 0x8fe   :  { %v1149_v0 = vadd.f32 %v1136_v27, %v1131_v53 }
 0x900   :  { %v1153_v62 = vadd.f32 %v1149_v0, %v1148_v52 }
 0x902   :  { %v1155_v41 = vadd.f32 %v1153_v62, %v1152_v17 }
 0x904   :  { %v1156_v31 = vadd.f32 %v1155_v41, %v1154_v23 }
 0x906   :  { %v1157_v33 = vadd.f32 %v1156_v31, %v1141_v42 }
 0x908   :  { %v1159_v9 = vmul.f32 %v1158_v38, %v1157_v33  ;;  %v1310_v45 = vmul.f32 2.0, %v1157_v33 }
 0x90a   :  { %v1160_v48 = vadd.f32 %v1159_v9, %v3460_v11  ;;  %v3650_v5 = vadd.f32 %v1310_v45, %v1309_v10  ;;  %v4386_v9 = vmov 15  }
 0x90c   :  { %1173 = vperm.xlu2 %2757, %v1160_v48   ;;  %1168 = vperm.xlu1 %2756, %v1160_v48  }
 0x90d   :  { %1163 = vperm.xlu0 %2755, %v1160_v48  }
 0x914   :  { %2759 = vset.pattern.permute.xlu2 %v4354_v12  ;;  %2758 = vset.pattern.permute.xlu1 %v4345_v1 }
 0x915   :  { %2760 = vset.pattern.permute.xlu0 %v4346_v2  ;;  %1183 = vperm.xlu2 %2759, %v1160_v48  }
 0x916   :  { %1178 = vperm.xlu1 %2758, %v1160_v48   ;;  %1188 = vperm.xlu0 %2760, %v1160_v48  }
 0x91d   :  { %2762 = vset.pattern.permute.xlu2 %v4347_v6 }
 0x91e   :  { %2761 = vset.pattern.permute.xlu1 %v4348_v4  ;;  %1198 = vperm.xlu2 %2762, %v1160_v48  }
 0x91f   :  { %1193 = vperm.xlu1 %2761, %v1160_v48   ;;  %2765 = vset.pattern.permute.xlu0 %v4349_v7 }
 0x926   :  { %2764 = vset.pattern.permute.xlu2 %v4350_v8 }
 0x927   :  { %2763 = vset.pattern.permute.xlu1 %v4351_v44 }
 0x966   :  { %v1174_v10 = vpop.permute.xlu2 %1173 }
 0x967   :  { %v1176_v41 = vmul.f32 %v1174_v10, %v3184_v18 }
 0x96f   :  { %v1184_v39 = vpop.permute.xlu2 %1183 }
 0x970   :  { %v1186_v43 = vmul.f32 %v1184_v39, %v3188_v20 }
 0x978   :  { %v1199_v62 = vpop.permute.xlu2 %1198 }
 0x979   :  { %v1201_v42 = vmul.f32 %v1199_v62, %v3207_v34  ;;  %v4389_v62 = vld [vmem:[#allocation13_spill] sm:$0xff] }
 0x97e   :  { %v1169_v31 = vpop.permute.xlu1 %1168 }
 0x97f   :  { %v1164_v32 = vpop.permute.xlu0 %1163  ;;  %v1171_v47 = vmul.f32 %v1169_v31, %v3182_v16 }
 0x980   :  { %v1166_v63 = vmul.f32 %v1164_v32, %v3180_v15 }
 0x981   :  { %v1203_v55 = vadd.f32 %v1176_v41, %v1171_v47 }
 0x982   :  { %v1202_v26 = vadd.f32 %v3489_v35, %v1166_v63 }
 0x984   :  { %v1206_v49 = vadd.f32 %v1203_v55, %v1202_v26  ;;  %v4387_v55 = vld [vmem:[#allocation15_spill] sm:$0xff] }
 0x988   :  { %v1179_v36 = vpop.permute.xlu1 %1178  ;;  %v1189_v57 = vpop.permute.xlu0 %1188 }
 0x989   :  { %v1181_v53 = vmul.f32 %v1179_v36, %v3186_v19  ;;  %v1191_v14 = vmul.f32 %v1189_v57, %v3190_v21 }
 0x98b   :  { %v1204_v0 = vadd.f32 %v1186_v43, %v1181_v53 }
 0x991   :  { %v1194_v27 = vpop.permute.xlu1 %1193 }
 0x992   :  { %v1196_v52 = vmul.f32 %v1194_v27, %v3199_v25 }
 0x994   :  { %v1205_v17 = vadd.f32 %v1196_v52, %v1191_v14  ;;  %v4388_v52 = vld [vmem:[#allocation12_spill] sm:$0xff] }
 0x996   :  { %v1207_v23 = vadd.f32 %v1205_v17, %v1204_v0 }
 0x998   :  { %v1208_v30 = vadd.f32 %v1207_v23, %v1206_v49  ;;  %v4390_v23 = vld [vmem:[#allocation19_spill] sm:$0xff] }
 0x99a   :  { %v1209_v38 = vadd.f32 %v1208_v30, %v1201_v42 }
 0x99c   :  { %2987 = vtanh.f32 %v1209_v38 }
 0x9a2   :  { %v2988_v33 = vpop.eup %2987 }
 0x9a3   :  { %1223 = vperm.xlu0 %2765, %v2988_v33   ;;  %1218 = vperm.xlu2 %2764, %v2988_v33  }
 0x9a4   :  { %1213 = vperm.xlu1 %2763, %v2988_v33  }
 0x9ab   :  { %2770 = vset.pattern.permute.xlu0 %v4347_v6  ;;  %2767 = vset.pattern.permute.xlu2 %v4354_v12 }
 0x9ac   :  { %2766 = vset.pattern.permute.xlu1 %v4345_v1  ;;  %1248 = vperm.xlu0 %2770, %v2988_v33  }
 0x9ad   :  { %1233 = vperm.xlu2 %2767, %v2988_v33   ;;  %1228 = vperm.xlu1 %2766, %v2988_v33  }
 0x9b4   :  { %2775 = vset.pattern.permute.xlu0 %v4363_v3 }
 0x9b5   :  { %2769 = vset.pattern.permute.xlu2 %v4348_v4  ;;  %2768 = vset.pattern.permute.xlu1 %v4346_v2 }
 0x9b6   :  { %1273 = vperm.xlu0 %2775, %v2988_v33   ;;  %1243 = vperm.xlu2 %2769, %v2988_v33  }
 0x9b7   :  { %1238 = vperm.xlu1 %2768, %v2988_v33  }
 0x9be   :  { %2772 = vset.pattern.permute.xlu2 %v4352_v29  ;;  %2780 = vset.pattern.permute.xlu0 %v4350_v8 }
 0x9bf   :  { %2771 = vset.pattern.permute.xlu1 %v4339_v46  ;;  %1258 = vperm.xlu2 %2772, %v2988_v33  }
 0x9c0   :  { %1253 = vperm.xlu1 %2771, %v2988_v33  }
 0x9c7   :  { %2774 = vset.pattern.permute.xlu2 %v4353_v54 }
 0x9c8   :  { %2773 = vset.pattern.permute.xlu1 %v4341_v50  ;;  %1268 = vperm.xlu2 %2774, %v2988_v33  }
 0x9c9   :  { %1263 = vperm.xlu1 %2773, %v2988_v33  }
 0x9d0   :  { %2777 = vset.pattern.permute.xlu2 %v4355_v22 }
 0x9d1   :  { %2776 = vset.pattern.permute.xlu1 %v4378_v60  ;;  %1283 = vperm.xlu2 %2777, %v2988_v33  }
 0x9d2   :  { %1278 = vperm.xlu1 %2776, %v2988_v33  }
 0x9d9   :  { %2779 = vset.pattern.permute.xlu2 %v4351_v44 }
 0x9da   :  { %2778 = vset.pattern.permute.xlu1 %v4386_v9 }
 0x9db   :  { %1288 = vperm.xlu1 %2778, %v2988_v33  }
 0x9e3   :  { %2781 = vset.pattern.permute.xlu1 %v4349_v7 }
 0x9fd   :  { %v1219_v24 = vpop.permute.xlu2 %1218 }
 0x9fe   :  { %v1221_v49 = vmul.f32 %v1219_v24, %v4389_v62 }
 0xa07   :  { %v1234_v48 = vpop.permute.xlu2 %1233 }
 0xa08   :  { %v1236_v42 = vmul.f32 %v1234_v48, %v4390_v23  ;;  %v4394_v23 = vld [vmem:[#allocation26_spill] sm:$0xff] }
 0xa10   :  { %v1244_v10 = vpop.permute.xlu2 %1243 }
 0xa11   :  { %v1246_v0 = vmul.f32 %v1244_v10, %v4388_v52 }
 0xa15   :  { %v1224_v36 = vpop.permute.xlu0 %1223 }
 0xa16   :  { %v1214_v45 = vpop.permute.xlu1 %1213  ;;  %v1226_v43 = vmul.f32 %v1224_v36, %v4374_v13  ;;  %v4391_v36 = vld [vmem:[#allocation17_spill] sm:$0xff] }
 0xa17   :  { %v1216_v27 = vmul.f32 %v1214_v45, %v4381_v56 }
 0xa18   :  { %v1293_v45 = vadd.f32 %v1226_v43, %v1221_v49 }
 0xa19   :  { %v1259_v39 = vpop.permute.xlu2 %1258 }
 0xa1a   :  { %v1261_v38 = vmul.f32 %v1259_v39, %v4368_v51 }
 0xa1e   :  { %v1249_v63 = vpop.permute.xlu0 %1248 }
 0xa1f   :  { %v1229_v31 = vpop.permute.xlu1 %1228 }
 0xa20   :  { %v1231_v26 = vmul.f32 %v1229_v31, %v4387_v55  ;;  %v1292_v31 = vadd.f32 %v4384_v28, %v1216_v27  ;;  %v4392_v55 = vld [vmem:[#allocation20_spill] sm:$0xff]  ;;  %v1313_v28 = vstv %s2557_s10 }
 0xa21   :  { %v1251_v56 = vmul.f32 %v1249_v63, %v4392_v55 }
 0xa22   :  { %v1269_v57 = vpop.permute.xlu2 %1268  ;;  %v1294_v10 = vadd.f32 %v1236_v42, %v1231_v26 }
 0xa28   :  { %v1274_v14 = vpop.permute.xlu0 %1273 }
 0xa29   :  { %v1239_v32 = vpop.permute.xlu1 %1238  ;;  %v1276_v33 = vmul.f32 %v1274_v14, %v3265_v37 }
 0xa2a   :  { %v1241_v53 = vmul.f32 %v1239_v32, %v4380_v58 }
 0xa2b   :  { %v1284_v30 = vpop.permute.xlu2 %1283 }
 0xa2c   :  { %v1295_v32 = vadd.f32 %v1246_v0, %v1241_v53  ;;  %v1286_v24 = vmul.f32 %v1284_v30, %v3268_v40  ;;  %v1300_v0 = vadd.f32 %v1293_v45, %v1292_v31 }
 0xa2e   :  { %v1301_v51 = vadd.f32 %v1295_v32, %v1294_v10 }
 0xa30   :  { %v1304_v27 = vadd.f32 %v1301_v51, %v1300_v0 }
 0xa32   :  { %v1254_v47 = vpop.permute.xlu1 %1253 }
 0xa33   :  { %v1256_v13 = vmul.f32 %v1254_v47, %v4391_v36 }
 0xa35   :  { %v1296_v14 = vadd.f32 %v1256_v13, %v1251_v56 }
 0xa3b   :  { %v1264_v41 = vpop.permute.xlu1 %1263 }
 0xa3c   :  { %v1266_v17 = vmul.f32 %v1264_v41, %v4362_v61  ;;  %v4393_v41 = vld [vmem:[#allocation23_spill] sm:$0xff] }
 0xa3d   :  { %v1271_v61 = vmul.f32 %v1269_v57, %v4393_v41 }
 0xa3e   :  { %v1297_v48 = vadd.f32 %v1266_v17, %v1261_v38 }
 0xa3f   :  { %v1298_v39 = vadd.f32 %v1276_v33, %v1271_v61 }
 0xa40   :  { %v1302_v47 = vadd.f32 %v1297_v48, %v1296_v14 }
 0xa44   :  { %v1279_v58 = vpop.permute.xlu1 %1278 }
 0xa45   :  { %v1281_v62 = vmul.f32 %v1279_v58, %v4394_v23 }
 0xa47   :  { %v1299_v53 = vadd.f32 %v1286_v24, %v1281_v62 }
 0xa49   :  { %v1303_v43 = vadd.f32 %v1299_v53, %v1298_v39 }
 0xa4b   :  { %v1305_v49 = vadd.f32 %v1303_v43, %v1302_v47 }
 0xa4d   :  { %v1306_v63 = vadd.f32 %v1305_v49, %v1304_v27  ;;  %v1289_v26 = vpop.permute.xlu1 %1288 }
 0xa4e   :  { %v1291_v42 = vmul.f32 %v1289_v26, %v3285_v59 }
 0xa50   :  { %v1307_v57 = vadd.f32 %v1306_v63, %v1291_v42 }
 0xa52   :  { %v1312_v17 = vadd.f32 %v3650_v5, %v1307_v57 }
 0xa54   :  { %v1314_v30 = vmul.f32 %v1313_v28, %v1312_v17 }
 0xa56   :  { %v3704_v61 = vadd.f32 %v1314_v30, %v3460_v11 }
 0xa58   :  { %1332 = vperm.xlu1 %2781, %v3704_v61   ;;  %1327 = vperm.xlu0 %2780, %v3704_v61   ;;  %2533 = vst.msk [vmem:[#allocation8 + $0x8] sm:$0xf] %vm2530_vm0, %v3704_v61 }
 0xa59   :  { %1322 = vperm.xlu2 %2779, %v3704_v61  }
 0xa60   :  { %2783 = vset.pattern.permute.xlu1 %v4354_v12  ;;  %2785 = vset.pattern.permute.xlu0 %v4348_v4 }
 0xa61   :  { %2782 = vset.pattern.permute.xlu2 %v4345_v1  ;;  %1342 = vperm.xlu1 %2783, %v3704_v61  }
 0xa62   :  { %1352 = vperm.xlu0 %2785, %v3704_v61   ;;  %1337 = vperm.xlu2 %2782, %v3704_v61  }
 0xa69   :  { %2786 = vset.pattern.permute.xlu1 %v4347_v6 }
 0xa6a   :  { %2784 = vset.pattern.permute.xlu2 %v4346_v2  ;;  %1357 = vperm.xlu1 %2786, %v3704_v61  }
 0xa6b   :  { %1347 = vperm.xlu2 %2784, %v3704_v61   ;;  %2790 = vset.pattern.permute.xlu0 %v4345_v1 }
 0xa72   :  { %2788 = vset.pattern.permute.xlu1 %v4350_v8 }
 0xa73   :  { %2787 = vset.pattern.permute.xlu2 %v4351_v44 }
 0xab3   :  { %v1323_v11 = vpop.permute.xlu2 %1322 }
 0xab4   :  { %v1325_v45 = vmul.f32 %v1323_v11, %v3180_v15 }
 0xab6   :  { %v1361_v14 = vadd.f32 %v3489_v35, %v1325_v45 }
 0xabc   :  { %v1338_v51 = vpop.permute.xlu2 %1337 }
 0xabd   :  { %v1340_v38 = vmul.f32 %v1338_v51, %v3186_v19 }
 0xac5   :  { %v1348_v56 = vpop.permute.xlu2 %1347 }
 0xac6   :  { %v1350_v31 = vmul.f32 %v1348_v56, %v3190_v21 }
 0xaca   :  { %v1333_v13 = vpop.permute.xlu1 %1332  ;;  %v1328_v58 = vpop.permute.xlu0 %1327 }
 0xacb   :  { %v1335_v28 = vmul.f32 %v1333_v13, %v3184_v18  ;;  %v1330_v5 = vmul.f32 %v1328_v58, %v3182_v16 }
 0xacd   :  { %v1362_v48 = vadd.f32 %v1335_v28, %v1330_v5 }
 0xacf   :  { %v1365_v0 = vadd.f32 %v1362_v48, %v1361_v14 }
 0xad3   :  { %v1343_v62 = vpop.permute.xlu1 %1342 }
 0xad4   :  { %v1345_v33 = vmul.f32 %v1343_v62, %v3188_v20  ;;  %v1353_v32 = vpop.permute.xlu0 %1352  ;;  %v4395_v62 = vld [vmem:[#allocation13_spill] sm:$0xff] }
 0xad5   :  { %v1355_v10 = vmul.f32 %v1353_v32, %v3199_v25 }
 0xad6   :  { %v1363_v24 = vadd.f32 %v1345_v33, %v1340_v38  ;;  %v4396_v33 = vld [vmem:[#allocation19_spill] sm:$0xff] }
 0xad7   :  { %v1364_v39 = vadd.f32 %v1355_v10, %v1350_v31  ;;  %v4397_v31 = vld [vmem:[#allocation16_spill] sm:$0xff] }
 0xad9   :  { %v1366_v53 = vadd.f32 %v1364_v39, %v1363_v24  ;;  %v4398_v24 = vld [vmem:[#allocation21_spill] sm:$0xff]  ;;  %v4399_v39 = vld [vmem:[#allocation14_spill] sm:$0xff] }
 0xadb   :  { %v1367_v27 = vadd.f32 %v1366_v53, %v1365_v0  ;;  %v4400_v53 = vld [vmem:[#allocation18_spill] sm:$0xff] }
 0xadc   :  { %v1358_v47 = vpop.permute.xlu1 %1357 }
 0xadd   :  { %v1360_v43 = vmul.f32 %v1358_v47, %v3207_v34  ;;  %v4401_v47 = vld [vmem:[#allocation15_spill] sm:$0xff] }
 0xadf   :  { %v1368_v49 = vadd.f32 %v1367_v27, %v1360_v43 }
 0xae1   :  { %2989 = vtanh.f32 %v1368_v49 }
 0xae7   :  { %v2990_v63 = vpop.eup %2989 }
 0xae8   :  { %1387 = vperm.xlu0 %2790, %v2990_v63   ;;  %1377 = vperm.xlu1 %2788, %v2990_v63  }
 0xae9   :  { %1372 = vperm.xlu2 %2787, %v2990_v63  }
 0xaf0   :  { %2795 = vset.pattern.permute.xlu0 %v4339_v46  ;;  %2791 = vset.pattern.permute.xlu1 %v4354_v12 }
 0xaf1   :  { %2789 = vset.pattern.permute.xlu2 %v4349_v7  ;;  %1412 = vperm.xlu0 %2795, %v2990_v63  }
 0xaf2   :  { %1392 = vperm.xlu1 %2791, %v2990_v63   ;;  %1382 = vperm.xlu2 %2789, %v2990_v63  }
 0xaf9   :  { %2800 = vset.pattern.permute.xlu0 %v4378_v60 }
 0xafa   :  { %2793 = vset.pattern.permute.xlu1 %v4348_v4  ;;  %2792 = vset.pattern.permute.xlu2 %v4346_v2 }
 0xafb   :  { %1437 = vperm.xlu0 %2800, %v2990_v63   ;;  %1402 = vperm.xlu1 %2793, %v2990_v63  }
 0xafc   :  { %1397 = vperm.xlu2 %2792, %v2990_v63  }
 0xb03   :  { %2796 = vset.pattern.permute.xlu1 %v4352_v29  ;;  %2805 = vset.pattern.permute.xlu0 %v4349_v7 }
 0xb04   :  { %2794 = vset.pattern.permute.xlu2 %v4347_v6  ;;  %1417 = vperm.xlu1 %2796, %v2990_v63  }
 0xb05   :  { %1407 = vperm.xlu2 %2794, %v2990_v63  }
 0xb0c   :  { %2798 = vset.pattern.permute.xlu1 %v4353_v54 }
 0xb0d   :  { %2797 = vset.pattern.permute.xlu2 %v4341_v50  ;;  %1427 = vperm.xlu1 %2798, %v2990_v63  }
 0xb0e   :  { %1422 = vperm.xlu2 %2797, %v2990_v63  }
 0xb15   :  { %2801 = vset.pattern.permute.xlu1 %v4355_v22 }
 0xb16   :  { %2799 = vset.pattern.permute.xlu2 %v4363_v3  ;;  %1442 = vperm.xlu1 %2801, %v2990_v63  }
 0xb17   :  { %1432 = vperm.xlu2 %2799, %v2990_v63  }
 0xb1e   :  { %2803 = vset.pattern.permute.xlu1 %v4351_v44 }
 0xb1f   :  { %2802 = vset.pattern.permute.xlu2 %v4386_v9 }
 0xb20   :  { %1447 = vperm.xlu2 %2802, %v2990_v63   ;;  %v4402_v63 = vld [vmem:[#allocation22_spill] sm:$0xff] }
 0xb28   :  { %2804 = vset.pattern.permute.xlu2 %v4350_v8 }
 0xb43   :  { %v1373_v35 = vpop.permute.xlu2 %1372 }
 0xb44   :  { %v1375_v14 = vmul.f32 %v1373_v35, %v4399_v39 }
 0xb4c   :  { %v1383_v42 = vpop.permute.xlu2 %1382 }
 0xb4d   :  { %v1385_v0 = vmul.f32 %v1383_v42, %v4400_v53 }
 0xb56   :  { %v1398_v17 = vpop.permute.xlu2 %1397 }
 0xb57   :  { %v1400_v10 = vmul.f32 %v1398_v17, %v4397_v31 }
 0xb5a   :  { %v1378_v26 = vpop.permute.xlu1 %1377  ;;  %v1388_v51 = vpop.permute.xlu0 %1387 }
 0xb5b   :  { %v1380_v38 = vmul.f32 %v1378_v26, %v4395_v62  ;;  %v1390_v43 = vmul.f32 %v1388_v51, %v4401_v47 }
 0xb5f   :  { %v1408_v11 = vpop.permute.xlu2 %1407 }
 0xb60   :  { %v1410_v62 = vmul.f32 %v1408_v11, %v4392_v55 }
 0xb63   :  { %v1413_v56 = vpop.permute.xlu0 %1412 }
 0xb64   :  { %v1393_v57 = vpop.permute.xlu1 %1392  ;;  %v1415_v49 = vmul.f32 %v1413_v56, %v4391_v36 }
 0xb65   :  { %v1395_v32 = vmul.f32 %v1393_v57, %v4396_v33  ;;  %v1452_v57 = vadd.f32 %v1385_v0, %v1380_v38 }
 0xb67   :  { %v1453_v17 = vadd.f32 %v1395_v32, %v1390_v43 }
 0xb68   :  { %v1423_v58 = vpop.permute.xlu2 %1422 }
 0xb6d   :  { %v1403_v30 = vpop.permute.xlu1 %1402  ;;  %v1438_v27 = vpop.permute.xlu0 %1437 }
 0xb6e   :  { %v1405_v5 = vmul.f32 %v1403_v30, %v4388_v52  ;;  %v1425_v30 = vmul.f32 %v1423_v58, %v4402_v63  ;;  %v1455_v58 = vadd.f32 %v1415_v49, %v1410_v62 }
 0xb70   :  { %v1454_v52 = vadd.f32 %v1405_v5, %v1400_v10 }
 0xb71   :  { %v1433_v45 = vpop.permute.xlu2 %1432 }
 0xb72   :  { %v1435_v35 = vmul.f32 %v1433_v45, %v3265_v37  ;;  %v1460_v56 = vadd.f32 %v1454_v52, %v1453_v17 }
 0xb76   :  { %v1418_v13 = vpop.permute.xlu1 %1417 }
 0xb77   :  { %v1420_v48 = vmul.f32 %v1418_v13, %v4398_v24  ;;  %v1440_v13 = vmul.f32 %v1438_v27, %v4394_v23  ;;  %v4403_v24 = vld [vmem:[#allocation27_spill] sm:$0xff] }
 0xb78   :  { %v1451_v39 = vadd.f32 %v4403_v24, %v1375_v14 }
 0xb79   :  { %v1456_v42 = vadd.f32 %v1425_v30, %v1420_v48 }
 0xb7a   :  { %v1459_v11 = vadd.f32 %v1452_v57, %v1451_v39  ;;  %v1448_v10 = vpop.permute.xlu2 %1447 }
 0xb7b   :  { %v1461_v38 = vadd.f32 %v1456_v42, %v1455_v58  ;;  %v1450_v45 = vmul.f32 %v1448_v10, %v3285_v59 }
 0xb7c   :  { %v1463_v0 = vadd.f32 %v1460_v56, %v1459_v11 }
 0xb7f   :  { %v1428_v28 = vpop.permute.xlu1 %1427 }
 0xb80   :  { %v1430_v26 = vmul.f32 %v1428_v28, %v4393_v41 }
 0xb82   :  { %v1457_v28 = vadd.f32 %v1435_v35, %v1430_v26 }
 0xb88   :  { %v1443_v33 = vpop.permute.xlu1 %1442 }
 0xb89   :  { %v1445_v51 = vmul.f32 %v1443_v33, %v3268_v40  ;;  %v4285_v33 = vstv %s3765_s11 }
 0xb8b   :  { %v1458_v5 = vadd.f32 %v1445_v51, %v1440_v13 }
 0xb8d   :  { %v1462_v32 = vadd.f32 %v1458_v5, %v1457_v28  ;;  %v3792_v28 = vld [vmem:[%s4198_s5] ss:$0 sm:$0xff] }
 0xb8f   :  { %v1464_v43 = vadd.f32 %v1462_v32, %v1461_v38 }
 0xb91   :  { %v1465_v48 = vadd.f32 %v1464_v43, %v1463_v0 }
 0xb93   :  { %v3769_v27 = vadd.f32 %v1465_v48, %v1450_v45 }
 0xb95   :  { %4404 = vst [vmem:[#allocation28_spill] sm:$0xff] %v3769_v27  ;;  %v1467_v24 = vmul.f32 %v3769_v27, %v4285_v33  ;;  %v4409_v27 = vld [vmem:[#allocation21_spill] sm:$0xff] }
 0xb97   :  { %v1468_v62 = vadd.f32 %v1467_v24, %v3704_v61 }
 0xb99   :  { %1481 = vperm.xlu0 %2805, %v1468_v62   ;;  %1476 = vperm.xlu2 %2804, %v1468_v62  }
 0xb9a   :  { %1471 = vperm.xlu1 %2803, %v1468_v62  }
 0xba1   :  { %2810 = vset.pattern.permute.xlu0 %v4347_v6  ;;  %2807 = vset.pattern.permute.xlu2 %v4354_v12 }
 0xba2   :  { %2806 = vset.pattern.permute.xlu1 %v4345_v1  ;;  %1506 = vperm.xlu0 %2810, %v1468_v62  }
 0xba3   :  { %1491 = vperm.xlu2 %2807, %v1468_v62   ;;  %1486 = vperm.xlu1 %2806, %v1468_v62  }
 0xbaa   :  { %2815 = vset.pattern.permute.xlu0 %v4354_v12 }
 0xbab   :  { %2809 = vset.pattern.permute.xlu2 %v4348_v4  ;;  %2808 = vset.pattern.permute.xlu1 %v4346_v2 }
 0xbac   :  { %1501 = vperm.xlu2 %2809, %v1468_v62   ;;  %1496 = vperm.xlu1 %2808, %v1468_v62  }
 0xbb4   :  { %2812 = vset.pattern.permute.xlu2 %v4350_v8  ;;  %2811 = vset.pattern.permute.xlu1 %v4351_v44 }
 0xbf3   :  { %v1477_v52 = vpop.permute.xlu2 %1476 }
 0xbf4   :  { %v1479_v13 = vmul.f32 %v1477_v52, %v3182_v16 }
 0xbfd   :  { %v1492_v14 = vpop.permute.xlu2 %1491 }
 0xbfe   :  { %v1494_v42 = vmul.f32 %v1492_v14, %v3188_v20 }
 0xc06   :  { %v1502_v17 = vpop.permute.xlu2 %1501 }
 0xc07   :  { %v1504_v58 = vmul.f32 %v1502_v17, %v3199_v25 }
 0xc0b   :  { %v1482_v30 = vpop.permute.xlu0 %1481 }
 0xc0c   :  { %v1472_v39 = vpop.permute.xlu1 %1471  ;;  %v1484_v26 = vmul.f32 %v1482_v30, %v3184_v18 }
 0xc0d   :  { %v1474_v57 = vmul.f32 %v1472_v39, %v3180_v15 }
 0xc0e   :  { %v1511_v56 = vadd.f32 %v1484_v26, %v1479_v13 }
 0xc0f   :  { %v1510_v5 = vadd.f32 %v3792_v28, %v1474_v57 }
 0xc11   :  { %v1514_v0 = vadd.f32 %v1511_v56, %v1510_v5  ;;  %v4405_v56 = vld [vmem:[#allocation19_spill] sm:$0xff] }
 0xc14   :  { %v1507_v10 = vpop.permute.xlu0 %1506 }
 0xc15   :  { %v1487_v49 = vpop.permute.xlu1 %1486  ;;  %v1509_v45 = vmul.f32 %v1507_v10, %v3207_v34 }
 0xc16   :  { %v1489_v35 = vmul.f32 %v1487_v49, %v3186_v19 }
 0xc18   :  { %v1512_v38 = vadd.f32 %v1494_v42, %v1489_v35 }
 0xc1e   :  { %v1497_v51 = vpop.permute.xlu1 %1496 }
 0xc1f   :  { %v1499_v11 = vmul.f32 %v1497_v51, %v3190_v21 }
 0xc21   :  { %v1513_v32 = vadd.f32 %v1504_v58, %v1499_v11 }
 0xc23   :  { %v1515_v43 = vadd.f32 %v1513_v32, %v1512_v38  ;;  %v4406_v32 = vld [vmem:[#allocation12_spill] sm:$0xff] }
 0xc25   :  { %v1516_v48 = vadd.f32 %v1515_v43, %v1514_v0  ;;  %v4407_v43 = vld [vmem:[#allocation13_spill] sm:$0xff] }
 0xc27   :  { %v1517_v24 = vadd.f32 %v1516_v48, %v1509_v45 }
 0xc29   :  { %2991 = vtanh.f32 %v1517_v24  ;;  %v4408_v24 = vld [vmem:[#allocation14_spill] sm:$0xff] }
 0xc2f   :  { %v2992_v62 = vpop.eup %2991 }
 0xc30   :  { %1541 = vperm.xlu0 %2815, %v2992_v62   ;;  %1526 = vperm.xlu2 %2812, %v2992_v62  }
 0xc31   :  { %1521 = vperm.xlu1 %2811, %v2992_v62  }
 0xc38   :  { %2820 = vset.pattern.permute.xlu0 %v4352_v29  ;;  %2814 = vset.pattern.permute.xlu2 %v4345_v1 }
 0xc39   :  { %2813 = vset.pattern.permute.xlu1 %v4349_v7  ;;  %1566 = vperm.xlu0 %2820, %v2992_v62  }
 0xc3a   :  { %1536 = vperm.xlu2 %2814, %v2992_v62   ;;  %1531 = vperm.xlu1 %2813, %v2992_v62  }
 0xc41   :  { %2825 = vset.pattern.permute.xlu0 %v4355_v22 }
 0xc42   :  { %2817 = vset.pattern.permute.xlu2 %v4348_v4  ;;  %2816 = vset.pattern.permute.xlu1 %v4346_v2 }
 0xc43   :  { %1591 = vperm.xlu0 %2825, %v2992_v62   ;;  %1551 = vperm.xlu2 %2817, %v2992_v62  }
 0xc44   :  { %1546 = vperm.xlu1 %2816, %v2992_v62  }
 0xc4b   :  { %2819 = vset.pattern.permute.xlu2 %v4339_v46  ;;  %2830 = vset.pattern.permute.xlu0 %v4345_v1 }
 0xc4c   :  { %2818 = vset.pattern.permute.xlu1 %v4347_v6  ;;  %1561 = vperm.xlu2 %2819, %v2992_v62  }
 0xc4d   :  { %1556 = vperm.xlu1 %2818, %v2992_v62  }
 0xc54   :  { %2822 = vset.pattern.permute.xlu2 %v4353_v54 }
 0xc55   :  { %2821 = vset.pattern.permute.xlu1 %v4341_v50  ;;  %1576 = vperm.xlu2 %2822, %v2992_v62  }
 0xc56   :  { %1571 = vperm.xlu1 %2821, %v2992_v62  }
 0xc5d   :  { %2824 = vset.pattern.permute.xlu2 %v4378_v60 }
 0xc5e   :  { %2823 = vset.pattern.permute.xlu1 %v4363_v3  ;;  %1586 = vperm.xlu2 %2824, %v2992_v62  }
 0xc5f   :  { %1581 = vperm.xlu1 %2823, %v2992_v62  }
 0xc66   :  { %2827 = vset.pattern.permute.xlu2 %v4351_v44 }
 0xc67   :  { %2826 = vset.pattern.permute.xlu1 %v4386_v9 }
 0xc68   :  { %1596 = vperm.xlu1 %2826, %v2992_v62  }
 0xc70   :  { %2828 = vset.pattern.permute.xlu1 %v4350_v8 }
 0xc8a   :  { %v1527_v52 = vpop.permute.xlu2 %1526 }
 0xc8b   :  { %v1529_v45 = vmul.f32 %v1527_v52, %v4407_v43 }
 0xc94   :  { %v1537_v14 = vpop.permute.xlu2 %1536 }
 0xc95   :  { %v1539_v48 = vmul.f32 %v1537_v14, %v4401_v47 }
 0xc9d   :  { %v1552_v30 = vpop.permute.xlu2 %1551 }
 0xc9e   :  { %v1554_v10 = vmul.f32 %v1552_v30, %v4406_v32 }
 0xca2   :  { %v1542_v17 = vpop.permute.xlu0 %1541 }
 0xca3   :  { %v1522_v39 = vpop.permute.xlu1 %1521  ;;  %v1544_v5 = vmul.f32 %v1542_v17, %v4405_v56 }
 0xca4   :  { %v1524_v62 = vmul.f32 %v1522_v39, %v4408_v24 }
 0xca6   :  { %v1562_v57 = vpop.permute.xlu2 %1561 }
 0xca7   :  { %v1564_v56 = vmul.f32 %v1562_v57, %v4391_v36 }
 0xcab   :  { %v1567_v42 = vpop.permute.xlu0 %1566 }
 0xcac   :  { %v1532_v49 = vpop.permute.xlu1 %1531  ;;  %v1569_v60 = vmul.f32 %v1567_v42, %v4409_v27  ;;  %v3831_v42 = vld [vmem:[%s4200_s7] ss:$0 sm:$0xff] }
 0xcad   :  { %v1534_v11 = vmul.f32 %v1532_v49, %v4400_v53  ;;  %v1602_v49 = vadd.f32 %v1544_v5, %v1539_v48  ;;  %4410 = vst [vmem:[#allocation27_spill] sm:$0xff] %v3831_v42 }
 0xcaf   :  { %v1577_v35 = vpop.permute.xlu2 %1576  ;;  %v1601_v30 = vadd.f32 %v1534_v11, %v1529_v45 }
 0xcb5   :  { %v1592_v33 = vpop.permute.xlu0 %1591 }
 0xcb6   :  { %v1547_v26 = vpop.permute.xlu1 %1546  ;;  %v1594_v52 = vmul.f32 %v1592_v33, %v3268_v40 }
 0xcb7   :  { %v1549_v58 = vmul.f32 %v1547_v26, %v4397_v31 }
 0xcb8   :  { %v1587_v38 = vpop.permute.xlu2 %1586 }
 0xcb9   :  { %v1603_v22 = vadd.f32 %v1554_v10, %v1549_v58  ;;  %v1589_v26 = vmul.f32 %v1587_v38, %v4394_v23  ;;  %v4411_v23 = vstv %s3765_s11 }
 0xcbb   :  { %v1609_v58 = vadd.f32 %v1603_v22, %v1602_v49  ;;  %v1607_v5 = vadd.f32 %v1594_v52, %v1589_v26 }
 0xcbf   :  { %v1557_v13 = vpop.permute.xlu1 %1556 }
 0xcc0   :  { %v1559_v17 = vmul.f32 %v1557_v13, %v4392_v55  ;;  %v1600_v13 = vadd.f32 %v3831_v42, %v1524_v62 }
 0xcc2   :  { %v1604_v57 = vadd.f32 %v1564_v56, %v1559_v17  ;;  %v1608_v38 = vadd.f32 %v1601_v30, %v1600_v13 }
 0xcc4   :  { %v1612_v45 = vadd.f32 %v1609_v58, %v1608_v38 }
 0xcc8   :  { %v1572_v51 = vpop.permute.xlu1 %1571 }
 0xcc9   :  { %v1574_v0 = vmul.f32 %v1572_v51, %v4402_v63  ;;  %v1579_v51 = vmul.f32 %v1577_v35, %v4393_v41 }
 0xccb   :  { %v1605_v14 = vadd.f32 %v1574_v0, %v1569_v60 }
 0xccd   :  { %v1610_v10 = vadd.f32 %v1605_v14, %v1604_v57 }
 0xcd1   :  { %v1582_v53 = vpop.permute.xlu1 %1581 }
 0xcd2   :  { %v1584_v39 = vmul.f32 %v1582_v53, %v3265_v37 }
 0xcd4   :  { %v1606_v11 = vadd.f32 %v1584_v39, %v1579_v51 }
 0xcd6   :  { %v1611_v35 = vadd.f32 %v1607_v5, %v1606_v11 }
 0xcd8   :  { %v1613_v33 = vadd.f32 %v1611_v35, %v1610_v10 }
 0xcda   :  { %v1614_v60 = vadd.f32 %v1613_v33, %v1612_v45  ;;  %v1597_v0 = vpop.permute.xlu1 %1596 }
 0xcdb   :  { %v1599_v53 = vmul.f32 %v1597_v0, %v3285_v59 }
 0xcdd   :  { %v3835_v48 = vadd.f32 %v1614_v60, %v1599_v53 }
 0xcdf   :  { %v1616_v40 = vmul.f32 %v3835_v48, %v4411_v23 }
 0xce1   :  { %v1617_v62 = vadd.f32 %v1616_v40, %v3704_v61 }
 0xce3   :  { %1635 = vperm.xlu0 %2830, %v1617_v62   ;;  %1625 = vperm.xlu1 %2828, %v1617_v62  }
 0xce4   :  { %1620 = vperm.xlu2 %2827, %v1617_v62  }
 0xceb   :  { %2831 = vset.pattern.permute.xlu1 %v4354_v12  ;;  %2835 = vset.pattern.permute.xlu0 %v4351_v44 }
 0xcec   :  { %2829 = vset.pattern.permute.xlu2 %v4349_v7  ;;  %1640 = vperm.xlu1 %2831, %v1617_v62  }
 0xced   :  { %1630 = vperm.xlu2 %2829, %v1617_v62  }
 0xcf4   :  { %2833 = vset.pattern.permute.xlu1 %v4348_v4 }
 0xcf5   :  { %2832 = vset.pattern.permute.xlu2 %v4346_v2  ;;  %1650 = vperm.xlu1 %2833, %v1617_v62  }
 0xcf6   :  { %1645 = vperm.xlu2 %2832, %v1617_v62  }
 0xcfd   :  { %2836 = vset.pattern.permute.xlu1 %v4350_v8 }
 0xcfe   :  { %2834 = vset.pattern.permute.xlu2 %v4347_v6 }
 0xcff   :  { %1655 = vperm.xlu2 %2834, %v1617_v62   ;;  %v4412_v62 = vmov 14  }
 0xd07   :  { %2837 = vset.pattern.permute.xlu2 %v4349_v7 }
 0xd3e   :  { %v1621_v40 = vpop.permute.xlu2 %1620 }
 0xd3f   :  { %v1623_v30 = vmul.f32 %v1621_v40, %v3180_v15  ;;  %v4413_v40 = vmov 13  }
 0xd41   :  { %v1659_v57 = vadd.f32 %v3792_v28, %v1623_v30 }
 0xd47   :  { %v1631_v23 = vpop.permute.xlu2 %1630 }
 0xd48   :  { %v1633_v51 = vmul.f32 %v1631_v23, %v3184_v18 }
 0xd50   :  { %v1646_v26 = vpop.permute.xlu2 %1645 }
 0xd51   :  { %v1648_v39 = vmul.f32 %v1646_v26, %v3190_v21 }
 0xd55   :  { %v1626_v22 = vpop.permute.xlu1 %1625  ;;  %v1636_v49 = vpop.permute.xlu0 %1635 }
 0xd56   :  { %v1628_v17 = vmul.f32 %v1626_v22, %v3182_v16  ;;  %v1638_v13 = vmul.f32 %v1636_v49, %v3186_v19 }
 0xd58   :  { %v1660_v58 = vadd.f32 %v1633_v51, %v1628_v17 }
 0xd59   :  { %v1656_v10 = vpop.permute.xlu2 %1655 }
 0xd5a   :  { %v1663_v35 = vadd.f32 %v1660_v58, %v1659_v57  ;;  %v1658_v33 = vmul.f32 %v1656_v10, %v3207_v34 }
 0xd5e   :  { %v1641_v56 = vpop.permute.xlu1 %1640 }
 0xd5f   :  { %v1643_v52 = vmul.f32 %v1641_v56, %v3188_v20 }
 0xd61   :  { %v1661_v11 = vadd.f32 %v1643_v52, %v1638_v13 }
 0xd67   :  { %v1651_v14 = vpop.permute.xlu1 %1650 }
 0xd68   :  { %v1653_v5 = vmul.f32 %v1651_v14, %v3199_v25 }
 0xd6a   :  { %v1662_v38 = vadd.f32 %v1653_v5, %v1648_v39 }
 0xd6c   :  { %v1664_v45 = vadd.f32 %v1662_v38, %v1661_v11 }
 0xd6e   :  { %v1665_v60 = vadd.f32 %v1664_v45, %v1663_v35  ;;  %v4414_v45 = vld [vmem:[#allocation18_spill] sm:$0xff] }
 0xd70   :  { %v1666_v0 = vadd.f32 %v1665_v60, %v1658_v33  ;;  %v4415_v60 = vld [vmem:[#allocation19_spill] sm:$0xff] }
 0xd72   :  { %2993 = vtanh.f32 %v1666_v0 }
 0xd78   :  { %v2994_v53 = vpop.eup %2993 }
 0xd79   :  { %1680 = vperm.xlu2 %2837, %v2994_v53   ;;  %1675 = vperm.xlu1 %2836, %v2994_v53  }
 0xd7a   :  { %1670 = vperm.xlu0 %2835, %v2994_v53  }
 0xd81   :  { %2839 = vset.pattern.permute.xlu2 %v4354_v12  ;;  %2838 = vset.pattern.permute.xlu1 %v4345_v1 }
 0xd82   :  { %2840 = vset.pattern.permute.xlu0 %v4346_v2  ;;  %1690 = vperm.xlu2 %2839, %v2994_v53  }
 0xd83   :  { %1685 = vperm.xlu1 %2838, %v2994_v53   ;;  %1695 = vperm.xlu0 %2840, %v2994_v53  }
 0xd8a   :  { %2842 = vset.pattern.permute.xlu2 %v4347_v6 }
 0xd8b   :  { %2841 = vset.pattern.permute.xlu1 %v4348_v4  ;;  %2845 = vset.pattern.permute.xlu0 %v4341_v50 }
 0xd8c   :  { %1705 = vperm.xlu2 %2842, %v2994_v53   ;;  %1700 = vperm.xlu1 %2841, %v2994_v53  }
 0xd8d   :  { %1720 = vperm.xlu0 %2845, %v2994_v53  }
 0xd94   :  { %2844 = vset.pattern.permute.xlu2 %v4352_v29  ;;  %2843 = vset.pattern.permute.xlu1 %v4339_v46 }
 0xd95   :  { %2850 = vset.pattern.permute.xlu0 %v4386_v9  ;;  %1715 = vperm.xlu2 %2844, %v2994_v53  }
 0xd96   :  { %1710 = vperm.xlu1 %2843, %v2994_v53   ;;  %1745 = vperm.xlu0 %2850, %v2994_v53  }
 0xd9d   :  { %2847 = vset.pattern.permute.xlu2 %v4363_v3 }
 0xd9e   :  { %2846 = vset.pattern.permute.xlu1 %v4353_v54  ;;  %1730 = vperm.xlu2 %2847, %v2994_v53  }
 0xd9f   :  { %1725 = vperm.xlu1 %2846, %v2994_v53   ;;  %2855 = vset.pattern.permute.xlu0 %v4354_v12 }
 0xda6   :  { %2849 = vset.pattern.permute.xlu2 %v4412_v62 }
 0xda7   :  { %2848 = vset.pattern.permute.xlu1 %v4413_v40  ;;  %1740 = vperm.xlu2 %2849, %v2994_v53  }
 0xda8   :  { %1735 = vperm.xlu1 %2848, %v2994_v53  }
 0xdaf   :  { %2852 = vset.pattern.permute.xlu2 %v4350_v8 }
 0xdb0   :  { %2851 = vset.pattern.permute.xlu1 %v4351_v44 }
 0xdd3   :  { %v1681_v22 = vpop.permute.xlu2 %1680 }
 0xdd4   :  { %v1683_v33 = vmul.f32 %v1681_v22, %v4414_v45  ;;  %v4416_v22 = vld [vmem:[#allocation25_spill] sm:$0xff] }
 0xddc   :  { %v1691_v56 = vpop.permute.xlu2 %1690 }
 0xddd   :  { %v1693_v0 = vmul.f32 %v1691_v56, %v4415_v60 }
 0xde6   :  { %v1706_v17 = vpop.permute.xlu2 %1705 }
 0xde7   :  { %v1708_v9 = vmul.f32 %v1706_v17, %v4392_v55 }
 0xdeb   :  { %v1676_v23 = vpop.permute.xlu1 %1675 }
 0xdec   :  { %v1671_v30 = vpop.permute.xlu0 %1670  ;;  %v1678_v5 = vmul.f32 %v1676_v23, %v4407_v43  ;;  %v4417_v43 = vld [vmem:[#allocation26_spill] sm:$0xff] }
 0xded   :  { %v1673_v57 = vmul.f32 %v1671_v30, %v4408_v24 }
 0xdee   :  { %v1750_v30 = vadd.f32 %v1683_v33, %v1678_v5 }
 0xdef   :  { %v1716_v51 = vpop.permute.xlu2 %1715 }
 0xdf0   :  { %v1718_v24 = vmul.f32 %v1716_v51, %v4409_v27 }
 0xdf5   :  { %v1686_v26 = vpop.permute.xlu1 %1685  ;;  %v1696_v14 = vpop.permute.xlu0 %1695 }
 0xdf6   :  { %v1688_v11 = vmul.f32 %v1686_v26, %v4401_v47  ;;  %v1698_v10 = vmul.f32 %v1696_v14, %v4397_v31  ;;  %v1749_v26 = vadd.f32 %v3831_v42, %v1673_v57 }
 0xdf8   :  { %v1731_v39 = vpop.permute.xlu2 %1730  ;;  %v1751_v14 = vadd.f32 %v1693_v0, %v1688_v11  ;;  %v1915_v11 = vmul.f32 2.0, %v3835_v48 }
 0xdfe   :  { %v1701_v49 = vpop.permute.xlu1 %1700 }
 0xdff   :  { %v1703_v58 = vmul.f32 %v1701_v49, %v4406_v32  ;;  %v1721_v38 = vpop.permute.xlu0 %1720 }
 0xe00   :  { %v1723_v49 = vmul.f32 %v1721_v38, %v4402_v63 }
 0xe01   :  { %v1741_v53 = vpop.permute.xlu2 %1740  ;;  %v1752_v40 = vadd.f32 %v1703_v58, %v1698_v10 }
 0xe02   :  { %v1754_v58 = vadd.f32 %v1723_v49, %v1718_v24 }
 0xe03   :  { %v1758_v17 = vadd.f32 %v1752_v40, %v1751_v14 }
 0xe08   :  { %v1711_v52 = vpop.permute.xlu1 %1710  ;;  %v1746_v57 = vpop.permute.xlu0 %1745 }
 0xe09   :  { %v1713_v35 = vmul.f32 %v1711_v52, %v4391_v36  ;;  %v1733_v52 = vmul.f32 %v1731_v39, %v3265_v37  ;;  %v1743_v36 = vmul.f32 %v1741_v53, %v4416_v22  ;;  %v1748_v39 = vmul.f32 %v1746_v57, %v3285_v59 }
 0xe0a   :  { %v1765_v53 = vstv %s2559_s16 }
 0xe0b   :  { %v1753_v56 = vadd.f32 %v1713_v35, %v1708_v9  ;;  %v4418_v35 = vld [vmem:[#allocation28_spill] sm:$0xff] }
 0xe0d   :  { %v1759_v5 = vadd.f32 %v1754_v58, %v1753_v56 }
 0xe11   :  { %v1726_v13 = vpop.permute.xlu1 %1725 }
 0xe12   :  { %v1728_v23 = vmul.f32 %v1726_v13, %v4393_v41  ;;  %v1757_v13 = vadd.f32 %v1750_v30, %v1749_v26 }
 0xe14   :  { %v1755_v38 = vadd.f32 %v1733_v52, %v1728_v23  ;;  %v1761_v42 = vadd.f32 %v1758_v17, %v1757_v13 }
 0xe1a   :  { %v1736_v31 = vpop.permute.xlu1 %1735 }
 0xe1b   :  { %v1738_v45 = vmul.f32 %v1736_v31, %v4417_v43  ;;  %v1916_v31 = vadd.f32 %v1915_v11, %v4418_v35  ;;  %v4419_v35 = vmov 13  }
 0xe1d   :  { %v1756_v10 = vadd.f32 %v1743_v36, %v1738_v45 }
 0xe1f   :  { %v1760_v33 = vadd.f32 %v1756_v10, %v1755_v38 }
 0xe21   :  { %v1762_v51 = vadd.f32 %v1760_v33, %v1759_v5 }
 0xe23   :  { %v1763_v0 = vadd.f32 %v1762_v51, %v1761_v42 }
 0xe25   :  { %v1764_v9 = vadd.f32 %v1763_v0, %v1748_v39 }
 0xe27   :  { %v1766_v22 = vmul.f32 %v1765_v53, %v1764_v9  ;;  %v1917_v40 = vmul.f32 2.0, %v1764_v9 }
 0xe29   :  { %v1767_v24 = vadd.f32 %v1766_v22, %v3704_v61  ;;  %v3894_v36 = vadd.f32 %v1917_v40, %v1916_v31  ;;  %v4420_v31 = vmov 15  }
 0xe2b   :  { %1790 = vperm.xlu0 %2855, %v1767_v24   ;;  %1775 = vperm.xlu2 %2852, %v1767_v24  }
 0xe2c   :  { %1770 = vperm.xlu1 %2851, %v1767_v24  }
 0xe33   :  { %2854 = vset.pattern.permute.xlu2 %v4345_v1  ;;  %2860 = vset.pattern.permute.xlu0 %v4350_v8 }
 0xe34   :  { %2853 = vset.pattern.permute.xlu1 %v4349_v7  ;;  %1785 = vperm.xlu2 %2854, %v1767_v24  }
 0xe35   :  { %1780 = vperm.xlu1 %2853, %v1767_v24  }
 0xe3c   :  { %2857 = vset.pattern.permute.xlu2 %v4348_v4 }
 0xe3d   :  { %2856 = vset.pattern.permute.xlu1 %v4346_v2  ;;  %1800 = vperm.xlu2 %2857, %v1767_v24  }
 0xe3e   :  { %1795 = vperm.xlu1 %2856, %v1767_v24  }
 0xe45   :  { %2859 = vset.pattern.permute.xlu2 %v4351_v44 }
 0xe46   :  { %2858 = vset.pattern.permute.xlu1 %v4347_v6 }
 0xe47   :  { %1805 = vperm.xlu1 %2858, %v1767_v24  }
 0xe4f   :  { %2861 = vset.pattern.permute.xlu1 %v4349_v7 }
 0xe85   :  { %v1776_v42 = vpop.permute.xlu2 %1775 }
 0xe86   :  { %v1778_v17 = vmul.f32 %v1776_v42, %v3182_v16 }
 0xe8e   :  { %v1786_v45 = vpop.permute.xlu2 %1785 }
 0xe8f   :  { %v1788_v58 = vmul.f32 %v1786_v45, %v3186_v19 }
 0xe97   :  { %v1801_v30 = vpop.permute.xlu2 %1800 }
 0xe98   :  { %v1803_v22 = vmul.f32 %v1801_v30, %v3199_v25 }
 0xe9d   :  { %v1791_v23 = vpop.permute.xlu0 %1790 }
 0xe9e   :  { %v1771_v48 = vpop.permute.xlu1 %1770  ;;  %v1793_v26 = vmul.f32 %v1791_v23, %v3188_v20 }
 0xe9f   :  { %v1773_v38 = vmul.f32 %v1771_v48, %v3180_v15 }
 0xea0   :  { %v1811_v13 = vadd.f32 %v1793_v26, %v1788_v58 }
 0xea1   :  { %v1809_v33 = vadd.f32 %v3792_v28, %v1773_v38  ;;  %v4421_v38 = vld [vmem:[#allocation18_spill] sm:$0xff] }
 0xea7   :  { %v1781_v49 = vpop.permute.xlu1 %1780 }
 0xea8   :  { %v1783_v14 = vmul.f32 %v1781_v49, %v3184_v18 }
 0xeaa   :  { %v1810_v5 = vadd.f32 %v1783_v14, %v1778_v17 }
 0xeac   :  { %v1813_v51 = vadd.f32 %v1810_v5, %v1809_v33 }
 0xeb0   :  { %v1796_v52 = vpop.permute.xlu1 %1795 }
 0xeb1   :  { %v1798_v56 = vmul.f32 %v1796_v52, %v3190_v21 }
 0xeb3   :  { %v1812_v10 = vadd.f32 %v1803_v22, %v1798_v56 }
 0xeb5   :  { %v1814_v57 = vadd.f32 %v1812_v10, %v1811_v13  ;;  %v4422_v13 = vld [vmem:[#allocation13_spill] sm:$0xff] }
 0xeb7   :  { %v1815_v39 = vadd.f32 %v1814_v57, %v1813_v51  ;;  %v4423_v57 = vld [vmem:[#allocation16_spill] sm:$0xff] }
 0xeb9   :  { %v1806_v11 = vpop.permute.xlu1 %1805 }
 0xeba   :  { %v1808_v0 = vmul.f32 %v1806_v11, %v3207_v34 }
 0xebc   :  { %v1816_v53 = vadd.f32 %v1815_v39, %v1808_v0  ;;  %v4424_v39 = vld [vmem:[#allocation14_spill] sm:$0xff] }
 0xebe   :  { %2995 = vtanh.f32 %v1816_v53 }
 0xec4   :  { %v2996_v9 = vpop.eup %2995 }
 0xec5   :  { %1830 = vperm.xlu1 %2861, %v2996_v9   ;;  %1825 = vperm.xlu0 %2860, %v2996_v9  }
 0xec6   :  { %1820 = vperm.xlu2 %2859, %v2996_v9  }
 0xecd   :  { %2863 = vset.pattern.permute.xlu1 %v4354_v12  ;;  %2865 = vset.pattern.permute.xlu0 %v4348_v4 }
 0xece   :  { %2862 = vset.pattern.permute.xlu2 %v4345_v1  ;;  %1840 = vperm.xlu1 %2863, %v2996_v9  }
 0xecf   :  { %1850 = vperm.xlu0 %2865, %v2996_v9   ;;  %1835 = vperm.xlu2 %2862, %v2996_v9  }
 0xed6   :  { %2866 = vset.pattern.permute.xlu1 %v4347_v6 }
 0xed7   :  { %2870 = vset.pattern.permute.xlu0 %v4353_v54  ;;  %2864 = vset.pattern.permute.xlu2 %v4346_v2 }
 0xed8   :  { %1855 = vperm.xlu1 %2866, %v2996_v9   ;;  %1875 = vperm.xlu0 %2870, %v2996_v9  }
 0xed9   :  { %1845 = vperm.xlu2 %2864, %v2996_v9  }
 0xee0   :  { %2868 = vset.pattern.permute.xlu1 %v4352_v29  ;;  %2875 = vset.pattern.permute.xlu0 %v4351_v44 }
 0xee1   :  { %2867 = vset.pattern.permute.xlu2 %v4339_v46  ;;  %1865 = vperm.xlu1 %2868, %v2996_v9  }
 0xee2   :  { %1860 = vperm.xlu2 %2867, %v2996_v9  }
 0xee9   :  { %2871 = vset.pattern.permute.xlu1 %v4363_v3 }
 0xeea   :  { %2869 = vset.pattern.permute.xlu2 %v4341_v50  ;;  %1880 = vperm.xlu1 %2871, %v2996_v9  }
 0xeeb   :  { %1870 = vperm.xlu2 %2869, %v2996_v9  }
 0xef2   :  { %2873 = vset.pattern.permute.xlu1 %v4412_v62 }
 0xef3   :  { %2872 = vset.pattern.permute.xlu2 %v4419_v35  ;;  %1890 = vperm.xlu1 %2873, %v2996_v9  }
 0xef4   :  { %1885 = vperm.xlu2 %2872, %v2996_v9  }
 0xefb   :  { %2876 = vset.pattern.permute.xlu1 %v4350_v8 }
 0xefc   :  { %2874 = vset.pattern.permute.xlu2 %v4420_v31 }
 0xefd   :  { %1895 = vperm.xlu2 %2874, %v2996_v9  }
 0xf05   :  { %2877 = vset.pattern.permute.xlu2 %v4349_v7 }
 0xf20   :  { %v1821_v40 = vpop.permute.xlu2 %1820 }
 0xf21   :  { %v1823_v0 = vmul.f32 %v1821_v40, %v4424_v39 }
 0xf29   :  { %v1836_v42 = vpop.permute.xlu2 %1835 }
 0xf2a   :  { %v1838_v58 = vmul.f32 %v1836_v42, %v4401_v47 }
 0xf33   :  { %v1846_v45 = vpop.permute.xlu2 %1845 }
 0xf34   :  { %v1848_v51 = vmul.f32 %v1846_v45, %v4423_v57 }
 0xf37   :  { %v1831_v24 = vpop.permute.xlu1 %1830  ;;  %v1826_v30 = vpop.permute.xlu0 %1825 }
 0xf38   :  { %v1833_v10 = vmul.f32 %v1831_v24, %v4421_v38  ;;  %v1828_v5 = vmul.f32 %v1826_v30, %v4422_v13  ;;  %v4425_v24 = vld [vmem:[#allocation17_spill] sm:$0xff] }
 0xf3c   :  { %v1861_v23 = vpop.permute.xlu2 %1860 }
 0xf40   :  { %v1841_v48 = vpop.permute.xlu1 %1840 }
 0xf41   :  { %v1851_v52 = vpop.permute.xlu0 %1850  ;;  %v1843_v56 = vmul.f32 %v1841_v48, %v4415_v60  ;;  %v1900_v60 = vadd.f32 %v1833_v10, %v1828_v5 }
 0xf42   :  { %v1853_v17 = vmul.f32 %v1851_v52, %v4406_v32  ;;  %v1863_v32 = vmul.f32 %v1861_v23, %v4425_v24 }
 0xf43   :  { %v1901_v53 = vadd.f32 %v1843_v56, %v1838_v58  ;;  %v4427_v56 = vld [vmem:[#allocation27_spill] sm:$0xff] }
 0xf44   :  { %v1902_v31 = vadd.f32 %v1853_v17, %v1848_v51  ;;  %v1899_v58 = vadd.f32 %v4427_v56, %v1823_v0 }
 0xf45   :  { %v1871_v14 = vpop.permute.xlu2 %1870 }
 0xf46   :  { %v1873_v48 = vmul.f32 %v1871_v14, %v4402_v63  ;;  %v1908_v17 = vadd.f32 %v1902_v31, %v1901_v53 }
 0xf4a   :  { %v1856_v49 = vpop.permute.xlu1 %1855  ;;  %v1876_v9 = vpop.permute.xlu0 %1875 }
 0xf4b   :  { %v1858_v52 = vmul.f32 %v1856_v49, %v4392_v55  ;;  %v1878_v13 = vmul.f32 %v1876_v9, %v4393_v41  ;;  %v1907_v49 = vadd.f32 %v1900_v60, %v1899_v58 }
 0xf4d   :  { %v1903_v51 = vadd.f32 %v1863_v32, %v1858_v52  ;;  %v1911_v23 = vadd.f32 %v1908_v17, %v1907_v49 }
 0xf4e   :  { %v1886_v33 = vpop.permute.xlu2 %1885 }
 0xf4f   :  { %v1888_v45 = vmul.f32 %v1886_v33, %v4417_v43 }
 0xf53   :  { %v1866_v26 = vpop.permute.xlu1 %1865 }
 0xf54   :  { %v1868_v11 = vmul.f32 %v1866_v26, %v4409_v27  ;;  %v4426_v27 = vld [vmem:[#allocation25_spill] sm:$0xff] }
 0xf56   :  { %v1904_v26 = vadd.f32 %v1873_v48, %v1868_v11  ;;  %v1920_v11 = vstv %s2560_s1 }
 0xf57   :  { %v1896_v5 = vpop.permute.xlu2 %1895 }
 0xf58   :  { %v1898_v9 = vmul.f32 %v1896_v5, %v3285_v59 }
 0xf5c   :  { %v1881_v22 = vpop.permute.xlu1 %1880 }
 0xf5d   :  { %v1883_v42 = vmul.f32 %v1881_v22, %v3265_v37  ;;  %v1909_v22 = vadd.f32 %v1904_v26, %v1903_v51 }
 0xf5f   :  { %v1905_v14 = vadd.f32 %v1883_v42, %v1878_v13 }
 0xf65   :  { %v1891_v30 = vpop.permute.xlu1 %1890 }
 0xf66   :  { %v1893_v40 = vmul.f32 %v1891_v30, %v4426_v27 }
 0xf68   :  { %v1906_v63 = vadd.f32 %v1893_v40, %v1888_v45 }
 0xf6a   :  { %v1910_v10 = vadd.f32 %v1906_v63, %v1905_v14 }
 0xf6c   :  { %v1912_v55 = vadd.f32 %v1910_v10, %v1909_v22 }
 0xf6e   :  { %v1913_v41 = vadd.f32 %v1912_v55, %v1911_v23 }
 0xf70   :  { %v1914_v33 = vadd.f32 %v1913_v41, %v1898_v9 }
 0xf72   :  { %v1919_v48 = vadd.f32 %v3894_v36, %v1914_v33  ;;  %v4428_v33 = vmov 15  }
 0xf74   :  { %v1921_v30 = vmul.f32 %v1920_v11, %v1919_v48 }
 0xf76   :  { %v3948_v31 = vadd.f32 %v1921_v30, %v3704_v61 }
 0xf78   :  { %1939 = vperm.xlu2 %2877, %v3948_v31   ;;  %1934 = vperm.xlu1 %2876, %v3948_v31   ;;  %2534 = vst.msk [vmem:[#allocation8 + $0xc] sm:$0xf] %vm2530_vm0, %v3948_v31 }
 0xf79   :  { %1929 = vperm.xlu0 %2875, %v3948_v31  }
 0xf80   :  { %2879 = vset.pattern.permute.xlu2 %v4354_v12  ;;  %2878 = vset.pattern.permute.xlu1 %v4345_v1 }
 0xf81   :  { %2880 = vset.pattern.permute.xlu0 %v4346_v2  ;;  %1949 = vperm.xlu2 %2879, %v3948_v31  }
 0xf82   :  { %1944 = vperm.xlu1 %2878, %v3948_v31   ;;  %1954 = vperm.xlu0 %2880, %v3948_v31  }
 0xf89   :  { %2882 = vset.pattern.permute.xlu2 %v4347_v6 }
 0xf8a   :  { %2881 = vset.pattern.permute.xlu1 %v4348_v4  ;;  %1964 = vperm.xlu2 %2882, %v3948_v31  }
 0xf8b   :  { %1959 = vperm.xlu1 %2881, %v3948_v31   ;;  %2885 = vset.pattern.permute.xlu0 %v4349_v7 }
 0xf92   :  { %2884 = vset.pattern.permute.xlu2 %v4350_v8 }
 0xf93   :  { %2883 = vset.pattern.permute.xlu1 %v4351_v44 }
 0xfd2   :  { %v1940_v41 = vpop.permute.xlu2 %1939 }
 0xfd3   :  { %v1942_v0 = vmul.f32 %v1940_v41, %v3184_v18 }
 0xfdb   :  { %v1950_v32 = vpop.permute.xlu2 %1949 }
 0xfdc   :  { %v1952_v52 = vmul.f32 %v1950_v32, %v3188_v20 }
 0xfe4   :  { %v1965_v14 = vpop.permute.xlu2 %1964 }
 0xfe5   :  { %v1967_v10 = vmul.f32 %v1965_v14, %v3207_v34  ;;  %v4431_v14 = vld [vmem:[#allocation13_spill] sm:$0xff] }
 0xfea   :  { %v1935_v55 = vpop.permute.xlu1 %1934 }
 0xfeb   :  { %v1930_v61 = vpop.permute.xlu0 %1929  ;;  %v1937_v60 = vmul.f32 %v1935_v55, %v3182_v16 }
 0xfec   :  { %v1932_v36 = vmul.f32 %v1930_v61, %v3180_v15 }
 0xfed   :  { %v1969_v45 = vadd.f32 %v1942_v0, %v1937_v60 }
 0xfee   :  { %v1968_v26 = vadd.f32 %v3792_v28, %v1932_v36 }
 0xff0   :  { %v1972_v49 = vadd.f32 %v1969_v45, %v1968_v26 }
 0xff4   :  { %v1945_v63 = vpop.permute.xlu1 %1944  ;;  %v1955_v13 = vpop.permute.xlu0 %1954 }
 0xff5   :  { %v1947_v53 = vmul.f32 %v1945_v63, %v3186_v19  ;;  %v1957_v40 = vmul.f32 %v1955_v13, %v3190_v21 }
 0xff7   :  { %v1970_v17 = vadd.f32 %v1952_v52, %v1947_v53 }
 0xffd   :  { %v1960_v42 = vpop.permute.xlu1 %1959 }
 0xffe   :  { %v1962_v58 = vmul.f32 %v1960_v42, %v3199_v25 }
0x1000   :  { %v1971_v51 = vadd.f32 %v1962_v58, %v1957_v40  ;;  %v4429_v40 = vld [vmem:[#allocation12_spill] sm:$0xff] }
0x1002   :  { %v1973_v22 = vadd.f32 %v1971_v51, %v1970_v17  ;;  %v4430_v17 = vld [vmem:[#allocation22_spill] sm:$0xff] }
0x1004   :  { %v1974_v5 = vadd.f32 %v1973_v22, %v1972_v49  ;;  %v4432_v22 = vld [vmem:[#allocation19_spill] sm:$0xff] }
0x1006   :  { %v1975_v23 = vadd.f32 %v1974_v5, %v1967_v10 }
0x1008   :  { %2997 = vtanh.f32 %v1975_v23  ;;  %v4433_v23 = vld [vmem:[#allocation21_spill] sm:$0xff] }
0x100e   :  { %v2998_v9 = vpop.eup %2997 }
0x100f   :  { %1989 = vperm.xlu0 %2885, %v2998_v9   ;;  %1984 = vperm.xlu2 %2884, %v2998_v9  }
0x1010   :  { %1979 = vperm.xlu1 %2883, %v2998_v9  }
0x1017   :  { %2890 = vset.pattern.permute.xlu0 %v4347_v6  ;;  %2887 = vset.pattern.permute.xlu2 %v4354_v12 }
0x1018   :  { %2886 = vset.pattern.permute.xlu1 %v4345_v1  ;;  %2014 = vperm.xlu0 %2890, %v2998_v9  }
0x1019   :  { %1999 = vperm.xlu2 %2887, %v2998_v9   ;;  %1994 = vperm.xlu1 %2886, %v2998_v9  }
0x1020   :  { %2895 = vset.pattern.permute.xlu0 %v4363_v3 }
0x1021   :  { %2889 = vset.pattern.permute.xlu2 %v4348_v4  ;;  %2888 = vset.pattern.permute.xlu1 %v4346_v2 }
0x1022   :  { %2039 = vperm.xlu0 %2895, %v2998_v9   ;;  %2009 = vperm.xlu2 %2889, %v2998_v9  }
0x1023   :  { %2004 = vperm.xlu1 %2888, %v2998_v9  }
0x102a   :  { %2892 = vset.pattern.permute.xlu2 %v4352_v29  ;;  %2900 = vset.pattern.permute.xlu0 %v4350_v8 }
0x102b   :  { %2891 = vset.pattern.permute.xlu1 %v4339_v46  ;;  %2024 = vperm.xlu2 %2892, %v2998_v9  }
0x102c   :  { %2019 = vperm.xlu1 %2891, %v2998_v9  }
0x1033   :  { %2894 = vset.pattern.permute.xlu2 %v4353_v54 }
0x1034   :  { %2893 = vset.pattern.permute.xlu1 %v4341_v50  ;;  %2034 = vperm.xlu2 %2894, %v2998_v9  }
0x1035   :  { %2029 = vperm.xlu1 %2893, %v2998_v9  }
0x103c   :  { %2897 = vset.pattern.permute.xlu2 %v4412_v62 }
0x103d   :  { %2896 = vset.pattern.permute.xlu1 %v4419_v35  ;;  %2049 = vperm.xlu2 %2897, %v2998_v9  }
0x103e   :  { %2044 = vperm.xlu1 %2896, %v2998_v9  }
0x1045   :  { %2899 = vset.pattern.permute.xlu2 %v4351_v44 }
0x1046   :  { %2898 = vset.pattern.permute.xlu1 %v4428_v33 }
0x1047   :  { %2054 = vperm.xlu1 %2898, %v2998_v9  }
0x104f   :  { %2901 = vset.pattern.permute.xlu1 %v4349_v7 }
0x1069   :  { %v1985_v11 = vpop.permute.xlu2 %1984 }
0x106a   :  { %v1987_v49 = vmul.f32 %v1985_v11, %v4431_v14 }
0x1073   :  { %v2000_v30 = vpop.permute.xlu2 %1999 }
0x1074   :  { %v2002_v10 = vmul.f32 %v2000_v30, %v4432_v22 }
0x107c   :  { %v2010_v41 = vpop.permute.xlu2 %2009 }
0x107d   :  { %v2012_v58 = vmul.f32 %v2010_v41, %v4429_v40 }
0x1081   :  { %v1990_v63 = vpop.permute.xlu0 %1989 }
0x1082   :  { %v1980_v48 = vpop.permute.xlu1 %1979  ;;  %v1992_v52 = vmul.f32 %v1990_v63, %v4421_v38 }
0x1083   :  { %v1982_v42 = vmul.f32 %v1980_v48, %v4424_v39 }
0x1084   :  { %v2059_v48 = vadd.f32 %v1992_v52, %v1987_v49 }
0x1085   :  { %v2025_v32 = vpop.permute.xlu2 %2024 }
0x1086   :  { %v2027_v9 = vmul.f32 %v2025_v32, %v4433_v23 }
0x108a   :  { %v2015_v36 = vpop.permute.xlu0 %2014 }
0x108b   :  { %v1995_v55 = vpop.permute.xlu1 %1994 }
0x108c   :  { %v1997_v45 = vmul.f32 %v1995_v55, %v4401_v47  ;;  %v2058_v55 = vadd.f32 %v4427_v56, %v1982_v42  ;;  %v4434_v47 = vld [vmem:[#allocation20_spill] sm:$0xff] }
0x108d   :  { %v2017_v38 = vmul.f32 %v2015_v36, %v4434_v47 }
0x108e   :  { %v2035_v13 = vpop.permute.xlu2 %2034  ;;  %v2060_v41 = vadd.f32 %v2002_v10, %v1997_v45 }
0x1094   :  { %v2040_v26 = vpop.permute.xlu0 %2039 }
0x1095   :  { %v2005_v61 = vpop.permute.xlu1 %2004 }
0x1096   :  { %v2007_v53 = vmul.f32 %v2005_v61, %v4423_v57  ;;  %v2042_v61 = vmul.f32 %v2040_v26, %v3265_v37 }
0x1097   :  { %v2050_v5 = vpop.permute.xlu2 %2049 }
0x1098   :  { %v2061_v57 = vadd.f32 %v2012_v58, %v2007_v53  ;;  %v2052_v11 = vmul.f32 %v2050_v5, %v4426_v27 }
0x109a   :  { %v2067_v23 = vadd.f32 %v2061_v57, %v2060_v41 }
0x109e   :  { %v2020_v60 = vpop.permute.xlu1 %2019 }
0x109f   :  { %v2022_v63 = vmul.f32 %v2020_v60, %v4425_v24  ;;  %v2066_v60 = vadd.f32 %v2059_v48, %v2058_v55 }
0x10a1   :  { %v2062_v26 = vadd.f32 %v2022_v63, %v2017_v38  ;;  %v2070_v42 = vadd.f32 %v2067_v23, %v2066_v60 }
0x10a7   :  { %v2030_v0 = vpop.permute.xlu1 %2029 }
0x10a8   :  { %v2032_v51 = vmul.f32 %v2030_v0, %v4430_v17  ;;  %v4435_v0 = vld [vmem:[#allocation23_spill] sm:$0xff] }
0x10a9   :  { %v2037_v17 = vmul.f32 %v2035_v13, %v4435_v0 }
0x10aa   :  { %v2063_v30 = vadd.f32 %v2032_v51, %v2027_v9  ;;  %v4310_v51 = vstv %s4009_s17 }
0x10ab   :  { %v2064_v32 = vadd.f32 %v2042_v61, %v2037_v17 }
0x10ac   :  { %v2068_v52 = vadd.f32 %v2063_v30, %v2062_v26 }
0x10b0   :  { %v2045_v39 = vpop.permute.xlu1 %2044 }
0x10b1   :  { %v2047_v22 = vmul.f32 %v2045_v39, %v4417_v43 }
0x10b3   :  { %v2065_v53 = vadd.f32 %v2052_v11, %v2047_v22 }
0x10b5   :  { %v2069_v36 = vadd.f32 %v2065_v53, %v2064_v32 }
0x10b7   :  { %v2071_v45 = vadd.f32 %v2069_v36, %v2068_v52 }
0x10b9   :  { %v2072_v58 = vadd.f32 %v2071_v45, %v2070_v42  ;;  %v2055_v13 = vpop.permute.xlu1 %2054 }
0x10ba   :  { %v2057_v49 = vmul.f32 %v2055_v13, %v3285_v59 }
0x10bc   :  { %v4013_v10 = vadd.f32 %v2072_v58, %v2057_v49 }
0x10be   :  { %4436 = vst [vmem:[#allocation28_spill] sm:$0xff] %v4013_v10  ;;  %v2074_v38 = vmul.f32 %v4013_v10, %v4310_v51 }
0x10c0   :  { %v2075_v57 = vadd.f32 %v2074_v38, %v3948_v31 }
0x10c2   :  { %2088 = vperm.xlu1 %2901, %v2075_v57   ;;  %2083 = vperm.xlu0 %2900, %v2075_v57  }
0x10c3   :  { %2078 = vperm.xlu2 %2899, %v2075_v57  }
0x10ca   :  { %2903 = vset.pattern.permute.xlu1 %v4354_v12  ;;  %2905 = vset.pattern.permute.xlu0 %v4348_v4 }
0x10cb   :  { %2902 = vset.pattern.permute.xlu2 %v4345_v1  ;;  %2098 = vperm.xlu1 %2903, %v2075_v57  }
0x10cc   :  { %2108 = vperm.xlu0 %2905, %v2075_v57   ;;  %2093 = vperm.xlu2 %2902, %v2075_v57  }
0x10d3   :  { %2906 = vset.pattern.permute.xlu1 %v4347_v6 }
0x10d4   :  { %2904 = vset.pattern.permute.xlu2 %v4346_v2  ;;  %2113 = vperm.xlu1 %2906, %v2075_v57  }
0x10d5   :  { %2103 = vperm.xlu2 %2904, %v2075_v57   ;;  %2910 = vset.pattern.permute.xlu0 %v4345_v1 }
0x10dc   :  { %2908 = vset.pattern.permute.xlu1 %v4350_v8 }
0x10dd   :  { %2907 = vset.pattern.permute.xlu2 %v4351_v44 }
0x111d   :  { %v2079_v39 = vpop.permute.xlu2 %2078 }
0x111e   :  { %v2081_v11 = vmul.f32 %v2079_v39, %v3180_v15 }
0x1120   :  { %v2117_v52 = vadd.f32 %v3792_v28, %v2081_v11 }
0x1126   :  { %v2094_v17 = vpop.permute.xlu2 %2093 }
0x1127   :  { %v2096_v48 = vmul.f32 %v2094_v17, %v3186_v19 }
0x112f   :  { %v2104_v23 = vpop.permute.xlu2 %2103 }
0x1130   :  { %v2106_v30 = vmul.f32 %v2104_v23, %v3190_v21 }
0x1134   :  { %v2089_v22 = vpop.permute.xlu1 %2088  ;;  %v2084_v5 = vpop.permute.xlu0 %2083 }
0x1135   :  { %v2091_v9 = vmul.f32 %v2089_v22, %v3184_v18  ;;  %v2086_v61 = vmul.f32 %v2084_v5, %v3182_v16 }
0x1137   :  { %v2118_v53 = vadd.f32 %v2091_v9, %v2086_v61 }
0x1139   :  { %v2121_v42 = vadd.f32 %v2118_v53, %v2117_v52  ;;  %v4438_v53 = vld [vmem:[#allocation16_spill] sm:$0xff]  ;;  %v4439_v52 = vld [vmem:[#allocation21_spill] sm:$0xff] }
0x113d   :  { %v2099_v63 = vpop.permute.xlu1 %2098 }
0x113e   :  { %v2101_v55 = vmul.f32 %v2099_v63, %v3188_v20  ;;  %v2109_v41 = vpop.permute.xlu0 %2108 }
0x113f   :  { %v2111_v32 = vmul.f32 %v2109_v41, %v3199_v25 }
0x1140   :  { %v2119_v26 = vadd.f32 %v2101_v55, %v2096_v48 }
0x1141   :  { %v2120_v60 = vadd.f32 %v2111_v32, %v2106_v30  ;;  %v4437_v30 = vld [vmem:[#allocation19_spill] sm:$0xff] }
0x1143   :  { %v2122_v36 = vadd.f32 %v2120_v60, %v2119_v26 }
0x1145   :  { %v2123_v13 = vadd.f32 %v2122_v36, %v2121_v42  ;;  %v4440_v42 = vld [vmem:[#allocation14_spill] sm:$0xff] }
0x1146   :  { %v2114_v45 = vpop.permute.xlu1 %2113 }
0x1147   :  { %v2116_v58 = vmul.f32 %v2114_v45, %v3207_v34 }
0x1149   :  { %v2124_v49 = vadd.f32 %v2123_v13, %v2116_v58  ;;  %v4441_v58 = vld [vmem:[#allocation18_spill] sm:$0xff] }
0x114b   :  { %2999 = vtanh.f32 %v2124_v49  ;;  %v4442_v49 = vld [vmem:[#allocation15_spill] sm:$0xff] }
0x1151   :  { %v3000_v38 = vpop.eup %2999 }
0x1152   :  { %2143 = vperm.xlu0 %2910, %v3000_v38   ;;  %2133 = vperm.xlu1 %2908, %v3000_v38  }
0x1153   :  { %2128 = vperm.xlu2 %2907, %v3000_v38  }
0x115a   :  { %2915 = vset.pattern.permute.xlu0 %v4339_v46  ;;  %2911 = vset.pattern.permute.xlu1 %v4354_v12 }
0x115b   :  { %2909 = vset.pattern.permute.xlu2 %v4349_v7  ;;  %2168 = vperm.xlu0 %2915, %v3000_v38  }
0x115c   :  { %2148 = vperm.xlu1 %2911, %v3000_v38   ;;  %2138 = vperm.xlu2 %2909, %v3000_v38  }
0x1163   :  { %2920 = vset.pattern.permute.xlu0 %v4419_v35 }
0x1164   :  { %2913 = vset.pattern.permute.xlu1 %v4348_v4  ;;  %2912 = vset.pattern.permute.xlu2 %v4346_v2 }
0x1165   :  { %2193 = vperm.xlu0 %2920, %v3000_v38   ;;  %2158 = vperm.xlu1 %2913, %v3000_v38  }
0x1166   :  { %2153 = vperm.xlu2 %2912, %v3000_v38  }
0x116d   :  { %2916 = vset.pattern.permute.xlu1 %v4352_v29  ;;  %2925 = vset.pattern.permute.xlu0 %v4349_v7 }
0x116e   :  { %2914 = vset.pattern.permute.xlu2 %v4347_v6  ;;  %2173 = vperm.xlu1 %2916, %v3000_v38  }
0x116f   :  { %2163 = vperm.xlu2 %2914, %v3000_v38  }
0x1176   :  { %2918 = vset.pattern.permute.xlu1 %v4353_v54 }
0x1177   :  { %2917 = vset.pattern.permute.xlu2 %v4341_v50  ;;  %2183 = vperm.xlu1 %2918, %v3000_v38  }
0x1178   :  { %2178 = vperm.xlu2 %2917, %v3000_v38  }
0x117f   :  { %2921 = vset.pattern.permute.xlu1 %v4412_v62 }
0x1180   :  { %2919 = vset.pattern.permute.xlu2 %v4363_v3  ;;  %2198 = vperm.xlu1 %2921, %v3000_v38  }
0x1181   :  { %2188 = vperm.xlu2 %2919, %v3000_v38  }
0x1188   :  { %2923 = vset.pattern.permute.xlu1 %v4351_v44 }
0x1189   :  { %2922 = vset.pattern.permute.xlu2 %v4428_v33  ;;  %v4443_v33 = vld [vmem:[#allocation22_spill] sm:$0xff] }
0x118a   :  { %2203 = vperm.xlu2 %2922, %v3000_v38  }
0x1192   :  { %2924 = vset.pattern.permute.xlu2 %v4350_v8 }
0x11ad   :  { %v2129_v28 = vpop.permute.xlu2 %2128 }
0x11ae   :  { %v2131_v45 = vmul.f32 %v2129_v28, %v4440_v42 }
0x11b6   :  { %v2139_v39 = vpop.permute.xlu2 %2138 }
0x11b7   :  { %v2141_v13 = vmul.f32 %v2139_v39, %v4441_v58 }
0x11c0   :  { %v2154_v22 = vpop.permute.xlu2 %2153 }
0x11c1   :  { %v2156_v60 = vmul.f32 %v2154_v22, %v4438_v53 }
0x11c4   :  { %v2134_v57 = vpop.permute.xlu1 %2133  ;;  %v2144_v9 = vpop.permute.xlu0 %2143 }
0x11c5   :  { %v2136_v11 = vmul.f32 %v2134_v57, %v4431_v14  ;;  %v2146_v38 = vmul.f32 %v2144_v9, %v4442_v49 }
0x11c9   :  { %v2164_v23 = vpop.permute.xlu2 %2163 }
0x11ca   :  { %v2166_v14 = vmul.f32 %v2164_v23, %v4434_v47 }
0x11cd   :  { %v2169_v48 = vpop.permute.xlu0 %2168 }
0x11ce   :  { %v2149_v17 = vpop.permute.xlu1 %2148  ;;  %v2171_v10 = vmul.f32 %v2169_v48, %v4425_v24  ;;  %v2207_v48 = vadd.f32 %v4427_v56, %v2131_v45 }
0x11cf   :  { %v2151_v32 = vmul.f32 %v2149_v17, %v4437_v30  ;;  %v2208_v17 = vadd.f32 %v2141_v13, %v2136_v11 }
0x11d0   :  { %v2211_v24 = vadd.f32 %v2171_v10, %v2166_v14 }
0x11d1   :  { %v2209_v22 = vadd.f32 %v2151_v32, %v2146_v38 }
0x11d2   :  { %v2179_v63 = vpop.permute.xlu2 %2178 }
0x11d7   :  { %v2159_v5 = vpop.permute.xlu1 %2158  ;;  %v2194_v51 = vpop.permute.xlu0 %2193 }
0x11d8   :  { %v2161_v41 = vmul.f32 %v2159_v5, %v4429_v40  ;;  %v2181_v5 = vmul.f32 %v2179_v63, %v4443_v33 }
0x11da   :  { %v2210_v40 = vadd.f32 %v2161_v41, %v2156_v60 }
0x11db   :  { %v2189_v26 = vpop.permute.xlu2 %2188 }
0x11dc   :  { %v2191_v28 = vmul.f32 %v2189_v26, %v3265_v37  ;;  %v2216_v63 = vadd.f32 %v2210_v40, %v2209_v22 }
0x11e0   :  { %v2174_v61 = vpop.permute.xlu1 %2173 }
0x11e1   :  { %v2176_v36 = vmul.f32 %v2174_v61, %v4439_v52  ;;  %v2196_v61 = vmul.f32 %v2194_v51, %v4417_v43 }
0x11e3   :  { %v2212_v39 = vadd.f32 %v2181_v5, %v2176_v36  ;;  %v4444_v36 = vstv %s4009_s17 }
0x11e4   :  { %v2204_v23 = vpop.permute.xlu2 %2203 }
0x11e5   :  { %v2217_v11 = vadd.f32 %v2212_v39, %v2211_v24  ;;  %v2206_v51 = vmul.f32 %v2204_v23, %v3285_v59 }
0x11e9   :  { %v2184_v55 = vpop.permute.xlu1 %2183 }
0x11ea   :  { %v2186_v57 = vmul.f32 %v2184_v55, %v4435_v0  ;;  %v2215_v55 = vadd.f32 %v2208_v17, %v2207_v48  ;;  %v4092_v48 = vld [vmem:[%s4198_s5] ss:$0 sm:$0xff] }
0x11ec   :  { %v2213_v41 = vadd.f32 %v2191_v28, %v2186_v57  ;;  %v2219_v32 = vadd.f32 %v2216_v63, %v2215_v55 }
0x11f2   :  { %v2199_v30 = vpop.permute.xlu1 %2198 }
0x11f3   :  { %v2201_v9 = vmul.f32 %v2199_v30, %v4426_v27 }
0x11f5   :  { %v2214_v60 = vadd.f32 %v2201_v9, %v2196_v61 }
0x11f7   :  { %v2218_v13 = vadd.f32 %v2214_v60, %v2213_v41 }
0x11f9   :  { %v2220_v38 = vadd.f32 %v2218_v13, %v2217_v11 }
0x11fb   :  { %v2221_v0 = vadd.f32 %v2220_v38, %v2219_v32 }
0x11fd   :  { %v4069_v26 = vadd.f32 %v2221_v0, %v2206_v51 }
0x11ff   :  { %v2223_v30 = vmul.f32 %v4069_v26, %v4444_v36 }
0x1201   :  { %v2224_v56 = vadd.f32 %v2223_v30, %v3948_v31  ;;  %v4445_v30 = vmov 15  }
0x1203   :  { %2237 = vperm.xlu0 %2925, %v2224_v56   ;;  %2232 = vperm.xlu2 %2924, %v2224_v56  }
0x1204   :  { %2227 = vperm.xlu1 %2923, %v2224_v56  }
0x120b   :  { %2930 = vset.pattern.permute.xlu0 %v4347_v6  ;;  %2927 = vset.pattern.permute.xlu2 %v4354_v12 }
0x120c   :  { %2926 = vset.pattern.permute.xlu1 %v4345_v1  ;;  %2262 = vperm.xlu0 %2930, %v2224_v56  }
0x120d   :  { %2247 = vperm.xlu2 %2927, %v2224_v56   ;;  %2242 = vperm.xlu1 %2926, %v2224_v56  }
0x1214   :  { %2935 = vset.pattern.permute.xlu0 %v4354_v12 }
0x1215   :  { %2929 = vset.pattern.permute.xlu2 %v4348_v4  ;;  %2928 = vset.pattern.permute.xlu1 %v4346_v2 }
0x1216   :  { %2257 = vperm.xlu2 %2929, %v2224_v56   ;;  %2252 = vperm.xlu1 %2928, %v2224_v56  }
0x121e   :  { %2932 = vset.pattern.permute.xlu2 %v4350_v8  ;;  %2931 = vset.pattern.permute.xlu1 %v4351_v44 }
0x125d   :  { %v2233_v24 = vpop.permute.xlu2 %2232 }
0x125e   :  { %v2235_v17 = vmul.f32 %v2233_v24, %v3182_v16 }
0x1267   :  { %v2248_v14 = vpop.permute.xlu2 %2247 }
0x1268   :  { %v2250_v61 = vmul.f32 %v2248_v14, %v3188_v20 }
0x1270   :  { %v2258_v57 = vpop.permute.xlu2 %2257 }
0x1271   :  { %v2260_v39 = vmul.f32 %v2258_v57, %v3199_v25 }
0x1275   :  { %v2238_v10 = vpop.permute.xlu0 %2237 }
0x1276   :  { %v2228_v40 = vpop.permute.xlu1 %2227  ;;  %v2240_v45 = vmul.f32 %v2238_v10, %v3184_v18 }
0x1277   :  { %v2230_v5 = vmul.f32 %v2228_v40, %v3180_v15 }
0x1278   :  { %v2267_v9 = vadd.f32 %v2240_v45, %v2235_v17 }
0x1279   :  { %v2266_v63 = vadd.f32 %v4092_v48, %v2230_v5 }
0x127b   :  { %v2270_v13 = vadd.f32 %v2267_v9, %v2266_v63 }
0x127e   :  { %v2263_v11 = vpop.permute.xlu0 %2262 }
0x127f   :  { %v2243_v0 = vpop.permute.xlu1 %2242  ;;  %v2265_v32 = vmul.f32 %v2263_v11, %v3207_v34 }
0x1280   :  { %v2245_v22 = vmul.f32 %v2243_v0, %v3186_v19 }
0x1282   :  { %v2268_v60 = vadd.f32 %v2250_v61, %v2245_v22 }
0x1288   :  { %v2253_v28 = vpop.permute.xlu1 %2252 }
0x1289   :  { %v2255_v41 = vmul.f32 %v2253_v28, %v3190_v21 }
0x128b   :  { %v2269_v55 = vadd.f32 %v2260_v39, %v2255_v41  ;;  %v4446_v39 = vld [vmem:[#allocation19_spill] sm:$0xff] }
0x128d   :  { %v2271_v23 = vadd.f32 %v2269_v55, %v2268_v60  ;;  %v4447_v60 = vld [vmem:[#allocation12_spill] sm:$0xff] }
0x128f   :  { %v2272_v38 = vadd.f32 %v2271_v23, %v2270_v13  ;;  %v4448_v13 = vld [vmem:[#allocation13_spill] sm:$0xff] }
0x1291   :  { %v2273_v51 = vadd.f32 %v2272_v38, %v2265_v32 }
0x1293   :  { %3001 = vtanh.f32 %v2273_v51 }
0x1299   :  { %v3002_v36 = vpop.eup %3001 }
0x129a   :  { %2297 = vperm.xlu0 %2935, %v3002_v36   ;;  %2282 = vperm.xlu2 %2932, %v3002_v36  }
0x129b   :  { %2277 = vperm.xlu1 %2931, %v3002_v36  }
0x12a2   :  { %2940 = vset.pattern.permute.xlu0 %v4352_v29  ;;  %2934 = vset.pattern.permute.xlu2 %v4345_v1 }
0x12a3   :  { %2933 = vset.pattern.permute.xlu1 %v4349_v7  ;;  %2322 = vperm.xlu0 %2940, %v3002_v36  }
0x12a4   :  { %2292 = vperm.xlu2 %2934, %v3002_v36   ;;  %2287 = vperm.xlu1 %2933, %v3002_v36  }
0x12ab   :  { %2945 = vset.pattern.permute.xlu0 %v4412_v62 }
0x12ac   :  { %2937 = vset.pattern.permute.xlu2 %v4348_v4  ;;  %2936 = vset.pattern.permute.xlu1 %v4346_v2 }
0x12ad   :  { %2347 = vperm.xlu0 %2945, %v3002_v36   ;;  %2307 = vperm.xlu2 %2937, %v3002_v36  }
0x12ae   :  { %2302 = vperm.xlu1 %2936, %v3002_v36  }
0x12b5   :  { %2939 = vset.pattern.permute.xlu2 %v4339_v46  ;;  %2950 = vset.pattern.permute.xlu0 %v4345_v1 }
0x12b6   :  { %2938 = vset.pattern.permute.xlu1 %v4347_v6  ;;  %2317 = vperm.xlu2 %2939, %v3002_v36  }
0x12b7   :  { %2312 = vperm.xlu1 %2938, %v3002_v36  }
0x12be   :  { %2942 = vset.pattern.permute.xlu2 %v4353_v54 }
0x12bf   :  { %2941 = vset.pattern.permute.xlu1 %v4341_v50  ;;  %2332 = vperm.xlu2 %2942, %v3002_v36  }
0x12c0   :  { %2327 = vperm.xlu1 %2941, %v3002_v36  }
0x12c7   :  { %2944 = vset.pattern.permute.xlu2 %v4419_v35 }
0x12c8   :  { %2943 = vset.pattern.permute.xlu1 %v4363_v3  ;;  %2342 = vperm.xlu2 %2944, %v3002_v36  }
0x12c9   :  { %2337 = vperm.xlu1 %2943, %v3002_v36  }
0x12d0   :  { %2947 = vset.pattern.permute.xlu2 %v4351_v44 }
0x12d1   :  { %2946 = vset.pattern.permute.xlu1 %v4445_v30 }
0x12d2   :  { %2352 = vperm.xlu1 %2946, %v3002_v36  }
0x12da   :  { %2948 = vset.pattern.permute.xlu1 %v4350_v8 }
0x12f4   :  { %v2283_v56 = vpop.permute.xlu2 %2282 }
0x12f5   :  { %v2285_v23 = vmul.f32 %v2283_v56, %v4448_v13 }
0x12fe   :  { %v2293_v40 = vpop.permute.xlu2 %2292 }
0x12ff   :  { %v2295_v32 = vmul.f32 %v2293_v40, %v4442_v49 }
0x1307   :  { %v2308_v0 = vpop.permute.xlu2 %2307 }
0x1308   :  { %v2310_v55 = vmul.f32 %v2308_v0, %v4447_v60 }
0x130c   :  { %v2298_v5 = vpop.permute.xlu0 %2297 }
0x130d   :  { %v2278_v24 = vpop.permute.xlu1 %2277  ;;  %v2300_v9 = vmul.f32 %v2298_v5, %v4446_v39  ;;  %v4449_v39 = vld [vmem:[#allocation17_spill] sm:$0xff] }
0x130e   :  { %v2280_v38 = vmul.f32 %v2278_v24, %v4440_v42 }
0x1310   :  { %v2318_v45 = vpop.permute.xlu2 %2317 }
0x1315   :  { %v2323_v22 = vpop.permute.xlu0 %2322 }
0x1316   :  { %v2288_v14 = vpop.permute.xlu1 %2287  ;;  %v2325_v36 = vmul.f32 %v2323_v22, %v4439_v52  ;;  %v4131_v22 = vld [vmem:[%s4200_s7] ss:$0 sm:$0xff]  ;;  %s2563_s7 = sld [smem:[#allocation7 + $0x3]] }
0x1317   :  { %v2290_v63 = vmul.f32 %v2288_v14, %v4441_v58  ;;  %v2358_v14 = vadd.f32 %v2300_v9, %v2295_v32  ;;  %v2320_v58 = vmul.f32 %v2318_v45, %v4449_v39 }
0x1319   :  { %v2333_v17 = vpop.permute.xlu2 %2332  ;;  %v2357_v0 = vadd.f32 %v2290_v63, %v2285_v23 }
0x131f   :  { %v2348_v51 = vpop.permute.xlu0 %2347 }
0x1320   :  { %v2303_v10 = vpop.permute.xlu1 %2302  ;;  %v2350_v56 = vmul.f32 %v2348_v51, %v4426_v27 }
0x1321   :  { %v2305_v28 = vmul.f32 %v2303_v10, %v4438_v53 }
0x1322   :  { %v2343_v41 = vpop.permute.xlu2 %2342 }
0x1323   :  { %v2359_v35 = vadd.f32 %v2310_v55, %v2305_v28  ;;  %v2345_v10 = vmul.f32 %v2343_v41, %v4417_v43  ;;  %v2356_v28 = vadd.f32 %v4131_v22, %v2280_v38  ;;  %v2372_v43 = vstv %s2562_s18 }
0x1325   :  { %v2363_v9 = vadd.f32 %v2350_v56, %v2345_v10  ;;  %v2364_v63 = vadd.f32 %v2357_v0, %v2356_v28 }
0x1329   :  { %v2313_v57 = vpop.permute.xlu1 %2312 }
0x132a   :  { %v2315_v5 = vmul.f32 %v2313_v57, %v4434_v47  ;;  %v2365_v57 = vadd.f32 %v2359_v35, %v2358_v14 }
0x132c   :  { %v2360_v41 = vadd.f32 %v2320_v58, %v2315_v5  ;;  %v2368_v23 = vadd.f32 %v2365_v57, %v2364_v63 }
0x1332   :  { %v2328_v61 = vpop.permute.xlu1 %2327 }
0x1333   :  { %v2330_v11 = vmul.f32 %v2328_v61, %v4443_v33  ;;  %v4450_v61 = vld [vmem:[#allocation23_spill] sm:$0xff] }
0x1334   :  { %v2335_v33 = vmul.f32 %v2333_v17, %v4450_v61 }
0x1335   :  { %v2361_v40 = vadd.f32 %v2330_v11, %v2325_v36 }
0x1337   :  { %v2366_v55 = vadd.f32 %v2361_v40, %v2360_v41 }
0x133b   :  { %v2338_v53 = vpop.permute.xlu1 %2337 }
0x133c   :  { %v2340_v24 = vmul.f32 %v2338_v53, %v3265_v37  ;;  %v2522_v53 = vmul.f32 2.0, %v4069_v26  ;;  %v4451_v37 = vld [vmem:[#allocation28_spill] sm:$0xff] }
0x133e   :  { %v2362_v45 = vadd.f32 %v2340_v24, %v2335_v33  ;;  %v2523_v38 = vadd.f32 %v2522_v53, %v4451_v37  ;;  %v4454_v53 = vld [vmem:[#allocation18_spill] sm:$0xff] }
0x1340   :  { %v2367_v17 = vadd.f32 %v2363_v9, %v2362_v45 }
0x1342   :  { %v2369_v32 = vadd.f32 %v2367_v17, %v2366_v55 }
0x1344   :  { %v2370_v11 = vadd.f32 %v2369_v32, %v2368_v23  ;;  %v2353_v51 = vpop.permute.xlu1 %2352  ;;  %v4453_v32 = vld [vmem:[#allocation16_spill] sm:$0xff] }
0x1345   :  { %v2355_v36 = vmul.f32 %v2353_v51, %v3285_v59 }
0x1347   :  { %v2371_v27 = vadd.f32 %v2370_v11, %v2355_v36 }
0x1349   :  { %v2373_v35 = vmul.f32 %v2372_v43, %v2371_v27  ;;  %v2524_v10 = vmul.f32 2.0, %v2371_v27 }
0x134b   :  { %v2374_v33 = vadd.f32 %v2373_v35, %v3948_v31  ;;  %v4138_v58 = vadd.f32 %v2524_v10, %v2523_v38  ;;  %v4455_v38 = vld [vmem:[#allocation19_spill] sm:$0xff] }
0x134d   :  { %2392 = vperm.xlu0 %2950, %v2374_v33   ;;  %2382 = vperm.xlu1 %2948, %v2374_v33  }
0x134e   :  { %2377 = vperm.xlu2 %2947, %v2374_v33  }
0x1355   :  { %2951 = vset.pattern.permute.xlu1 %v4354_v12  ;;  %2955 = vset.pattern.permute.xlu0 %v4351_v44 }
0x1356   :  { %2949 = vset.pattern.permute.xlu2 %v4349_v7  ;;  %2397 = vperm.xlu1 %2951, %v2374_v33  }
0x1357   :  { %2387 = vperm.xlu2 %2949, %v2374_v33  }
0x135e   :  { %2953 = vset.pattern.permute.xlu1 %v4348_v4 }
0x135f   :  { %2952 = vset.pattern.permute.xlu2 %v4346_v2  ;;  %2407 = vperm.xlu1 %2953, %v2374_v33  }
0x1360   :  { %2402 = vperm.xlu2 %2952, %v2374_v33  }
0x1367   :  { %2956 = vset.pattern.permute.xlu1 %v4350_v8 }
0x1368   :  { %2954 = vset.pattern.permute.xlu2 %v4347_v6 }
0x1369   :  { %2412 = vperm.xlu2 %2954, %v2374_v33  }
0x1371   :  { %2957 = vset.pattern.permute.xlu2 %v4349_v7 }
0x13a8   :  { %v2378_v37 = vpop.permute.xlu2 %2377 }
0x13a9   :  { %v2380_v0 = vmul.f32 %v2378_v37, %v3180_v15 }
0x13ab   :  { %v2416_v9 = vadd.f32 %v4092_v48, %v2380_v0 }
0x13b1   :  { %v2388_v44 = vpop.permute.xlu2 %2387 }
0x13b2   :  { %v2390_v56 = vmul.f32 %v2388_v44, %v3184_v18 }
0x13ba   :  { %v2403_v26 = vpop.permute.xlu2 %2402 }
0x13bb   :  { %v2405_v24 = vmul.f32 %v2403_v26, %v3190_v21 }
0x13bf   :  { %v2383_v27 = vpop.permute.xlu1 %2382  ;;  %v2393_v14 = vpop.permute.xlu0 %2392 }
0x13c0   :  { %v2385_v5 = vmul.f32 %v2383_v27, %v3182_v16  ;;  %v2395_v28 = vmul.f32 %v2393_v14, %v3186_v19  ;;  %v4452_v19 = vmov 13   ;;  %v4458_v14 = vld [vmem:[#allocation25_spill] sm:$0xff] }
0x13c2   :  { %v2417_v7 = vadd.f32 %v2390_v56, %v2385_v5 }
0x13c3   :  { %v2413_v16 = vpop.permute.xlu2 %2412 }
0x13c4   :  { %v2420_v63 = vadd.f32 %v2417_v7, %v2416_v9  ;;  %v2415_v15 = vmul.f32 %v2413_v16, %v3207_v34 }
0x13c8   :  { %v2398_v43 = vpop.permute.xlu1 %2397 }
0x13c9   :  { %v2400_v40 = vmul.f32 %v2398_v43, %v3188_v20 }
0x13cb   :  { %v2418_v41 = vadd.f32 %v2400_v40, %v2395_v28  ;;  %v4459_v40 = vld [vmem:[#allocation26_spill] sm:$0xff] }
0x13d1   :  { %v2408_v8 = vpop.permute.xlu1 %2407 }
0x13d2   :  { %v2410_v57 = vmul.f32 %v2408_v8, %v3199_v25 }
0x13d4   :  { %v2419_v45 = vadd.f32 %v2410_v57, %v2405_v24 }
0x13d6   :  { %v2421_v55 = vadd.f32 %v2419_v45, %v2418_v41 }
0x13d8   :  { %v2422_v18 = vadd.f32 %v2421_v55, %v2420_v63  ;;  %v2527_v55 = vstv %s2563_s7 }
0x13da   :  { %v2423_v17 = vadd.f32 %v2422_v18, %v2415_v15 }
0x13dc   :  { %3003 = vtanh.f32 %v2423_v17 }
0x13e2   :  { %v3004_v20 = vpop.eup %3003 }
0x13e3   :  { %2437 = vperm.xlu2 %2957, %v3004_v20   ;;  %2432 = vperm.xlu1 %2956, %v3004_v20  }
0x13e4   :  { %2427 = vperm.xlu0 %2955, %v3004_v20  }
0x13eb   :  { %2959 = vset.pattern.permute.xlu2 %v4354_v12  ;;  %2958 = vset.pattern.permute.xlu1 %v4345_v1 }
0x13ec   :  { %2960 = vset.pattern.permute.xlu0 %v4346_v2  ;;  %2447 = vperm.xlu2 %2959, %v3004_v20  }
0x13ed   :  { %2442 = vperm.xlu1 %2958, %v3004_v20   ;;  %2452 = vperm.xlu0 %2960, %v3004_v20  }
0x13f4   :  { %2962 = vset.pattern.permute.xlu2 %v4347_v6 }
0x13f5   :  { %2961 = vset.pattern.permute.xlu1 %v4348_v4  ;;  %2965 = vset.pattern.permute.xlu0 %v4341_v50 }
0x13f6   :  { %2462 = vperm.xlu2 %2962, %v3004_v20   ;;  %2457 = vperm.xlu1 %2961, %v3004_v20  }
0x13f7   :  { %2477 = vperm.xlu0 %2965, %v3004_v20  }
0x13fe   :  { %2964 = vset.pattern.permute.xlu2 %v4352_v29  ;;  %2963 = vset.pattern.permute.xlu1 %v4339_v46 }
0x13ff   :  { %2970 = vset.pattern.permute.xlu0 %v4445_v30  ;;  %2472 = vperm.xlu2 %2964, %v3004_v20  }
0x1400   :  { %2467 = vperm.xlu1 %2963, %v3004_v20   ;;  %2502 = vperm.xlu0 %2970, %v3004_v20  }
0x1407   :  { %2967 = vset.pattern.permute.xlu2 %v4363_v3 }
0x1408   :  { %2966 = vset.pattern.permute.xlu1 %v4353_v54  ;;  %2487 = vperm.xlu2 %2967, %v3004_v20  }
0x1409   :  { %2482 = vperm.xlu1 %2966, %v3004_v20  }
0x1410   :  { %2969 = vset.pattern.permute.xlu2 %v4412_v62 }
0x1411   :  { %2968 = vset.pattern.permute.xlu1 %v4452_v19  ;;  %2497 = vperm.xlu2 %2969, %v3004_v20  }
0x1412   :  { %2492 = vperm.xlu1 %2968, %v3004_v20  }
0x143d   :  { %v2438_v21 = vpop.permute.xlu2 %2437 }
0x143e   :  { %v2440_v36 = vmul.f32 %v2438_v21, %v4454_v53 }
0x1446   :  { %v2448_v34 = vpop.permute.xlu2 %2447 }
0x1447   :  { %v2450_v35 = vmul.f32 %v2448_v34, %v4455_v38 }
0x1450   :  { %v2463_v50 = vpop.permute.xlu2 %2462 }
0x1451   :  { %v2465_v33 = vmul.f32 %v2463_v50, %v4434_v47 }
0x1455   :  { %v2433_v25 = vpop.permute.xlu1 %2432 }
0x1456   :  { %v2428_v2 = vpop.permute.xlu0 %2427  ;;  %v2435_v62 = vmul.f32 %v2433_v25, %v4448_v13 }
0x1457   :  { %v2430_v48 = vmul.f32 %v2428_v2, %v4440_v42 }
0x1458   :  { %v2507_v42 = vadd.f32 %v2440_v36, %v2435_v62 }
0x1459   :  { %v2473_v6 = vpop.permute.xlu2 %2472 }
0x145a   :  { %v2475_v44 = vmul.f32 %v2473_v6, %v4439_v52 }
0x145f   :  { %v2443_v46 = vpop.permute.xlu1 %2442  ;;  %v2453_v29 = vpop.permute.xlu0 %2452 }
0x1460   :  { %v2445_v30 = vmul.f32 %v2443_v46, %v4442_v49  ;;  %v2455_v11 = vmul.f32 %v2453_v29, %v4453_v32  ;;  %v2506_v49 = vadd.f32 %v4131_v22, %v2430_v48 }
0x1462   :  { %v2488_v12 = vpop.permute.xlu2 %2487  ;;  %v2508_v43 = vadd.f32 %v2450_v35, %v2445_v30 }
0x1468   :  { %v2458_v1 = vpop.permute.xlu1 %2457 }
0x1469   :  { %v2460_v3 = vmul.f32 %v2458_v1, %v4447_v60  ;;  %v2478_v23 = vpop.permute.xlu0 %2477  ;;  %v4456_v60 = vld [vmem:[#allocation22_spill] sm:$0xff] }
0x146a   :  { %v2480_v27 = vmul.f32 %v2478_v23, %v4456_v60 }
0x146b   :  { %v2498_v10 = vpop.permute.xlu2 %2497  ;;  %v2509_v37 = vadd.f32 %v2460_v3, %v2455_v11 }
0x146c   :  { %v2500_v0 = vmul.f32 %v2498_v10, %v4458_v14  ;;  %v2511_v24 = vadd.f32 %v2480_v27, %v2475_v44 }
0x146d   :  { %v2515_v47 = vadd.f32 %v2509_v37, %v2508_v43 }
0x1472   :  { %v2468_v4 = vpop.permute.xlu1 %2467  ;;  %v2503_v22 = vpop.permute.xlu0 %2502 }
0x1473   :  { %v2470_v51 = vmul.f32 %v2468_v4, %v4449_v39  ;;  %v4457_v39 = vld [vmem:[#allocation24_spill] sm:$0xff]  ;;  %v2505_v45 = vmul.f32 %v2503_v22, %v3285_v59 }
0x1474   :  { %v2490_v5 = vmul.f32 %v2488_v12, %v4457_v39 }
0x1475   :  { %v2510_v56 = vadd.f32 %v2470_v51, %v2465_v33 }
0x1477   :  { %v2516_v57 = vadd.f32 %v2511_v24, %v2510_v56 }
0x147b   :  { %v2483_v54 = vpop.permute.xlu1 %2482 }
0x147c   :  { %v2485_v13 = vmul.f32 %v2483_v54, %v4450_v61  ;;  %v2514_v61 = vadd.f32 %v2507_v42, %v2506_v49 }
0x147e   :  { %v2512_v28 = vadd.f32 %v2490_v5, %v2485_v13  ;;  %v2518_v41 = vadd.f32 %v2515_v47, %v2514_v61 }
0x1484   :  { %v2493_v26 = vpop.permute.xlu1 %2492 }
0x1485   :  { %v2495_v8 = vmul.f32 %v2493_v26, %v4459_v40 }
0x1487   :  { %v2513_v7 = vadd.f32 %v2500_v0, %v2495_v8 }
0x1489   :  { %v2517_v9 = vadd.f32 %v2513_v7, %v2512_v28 }
0x148b   :  { %v2519_v52 = vadd.f32 %v2517_v9, %v2516_v57 }
0x148d   :  { %v2520_v16 = vadd.f32 %v2519_v52, %v2518_v41 }
0x148f   :  { %v2521_v63 = vadd.f32 %v2520_v16, %v2505_v45 }
0x1491   :  { %v2526_v15 = vadd.f32 %v4138_v58, %v2521_v63 }
0x1493   :  { %v2528_v18 = vmul.f32 %v2527_v55, %v2526_v15 }
0x1495   :  { %v2529_v17 = vadd.f32 %v2528_v18, %v3948_v31 }
0x1497   :  { %2535 = vst.msk [vmem:[#allocation8 + $0x10] sm:$0xf] %vm2530_vm0, %v2529_v17 }
0x1498   :  { %2548 = dma.vmem_to_hbm [thread:$0]  %s2541_s19, 320, %s2543_s6, [#allocation3], %s3097_s22, %s3097_s22, %s3098_s23  }
0x1499   :  { %3075 = dma.done.wait [#allocation3], 320  }
0x149a   :  { %3076 = vsyncadd [#allocation3], 4294966976 }
0x149b   :  { %2553 = vsyncpa [#allocation3], 1 }
0x149c   :  { %2554 = vsyncpa [#allocation4], 1 }
0x149d   :  { %2555 = vsyncpa [#allocation6], 1 }

</bundles_post_ra>
